<compile_context>
chip_gen: v7x
topology: tpu7x:2x2x1
jax: 0.10.0
libtpu: 0.0.40
codegen_flags: <defaults>
</compile_context>

<pallas_src>
import functools

import jax
import jax.numpy as jnp
from jax.experimental import pallas as pl
from jax.experimental.pallas import tpu as pltpu


_NEG_SLOPE = 0.1


# ----------------------------------------------------------------------------
# In-kernel helpers (traced inside the Pallas kernel, all VMEM-resident)
# ----------------------------------------------------------------------------
def _lrelu(x):
    return jnp.where(x > 0.0, x, _NEG_SLOPE * x)


def _pad_hw1(x):
    """Zero-pad (H, W, C) by 1 on both spatial dims, fully in VMEM."""
    H, W, C = x.shape
    zr = jnp.zeros((1, W, C), x.dtype)
    x = jnp.concatenate([zr, x, zr], axis=0)
    zc = jnp.zeros((H + 2, 1, C), x.dtype)
    return jnp.concatenate([zc, x, zc], axis=1)


def _im2col3x3(x3, H, W):
    """(H, W, C) -> (H*W, 9*C) 'same' 3x3 window matrix (zero padded)."""
    C = x3.shape[-1]
    xp = _pad_hw1(x3)
    cols = [xp[dh:dh + H, dw:dw + W, :].reshape(H * W, C)
            for dh in range(3) for dw in range(3)]
    return jnp.concatenate(cols, axis=1)


def _conv3x3_lrelu(x_flat_bf16, H, W, w_ref, b_ref):
    """'same' 3x3 conv as a single im2col MXU matmul + bias + LeakyReLU."""
    C = x_flat_bf16.shape[-1]
    im = _im2col3x3(x_flat_bf16.reshape(H, W, C), H, W)          # (HW, 9*C) bf16
    acc = jnp.dot(im, w_ref[...], preferred_element_type=jnp.float32)
    return _lrelu(acc + b_ref[...])


# ----------------------------------------------------------------------------
# Fused Generator kernel (one grid step == one batch element)
# ----------------------------------------------------------------------------
def _generator_kernel(*refs, depth, levels):
    it = iter(refs)
    ctx_ref = next(it)                                    # (1, 1, ctx_dim)
    map_refs = [(next(it), next(it)) for _ in range(depth)]
    x_ref = next(it)                                      # (1, H*W, Cc) bf16
    lref = []
    for lv in levels:
        d = dict(dw=next(it), db=next(it))
        if lv["pool"]:
            d["pm"] = next(it)
        d["sw"] = next(it); d["sb"] = next(it)
        d["cw"] = next(it); d["cb"] = next(it)
        d["kw"] = next(it); d["kb"] = next(it)
        if lv["up"]:
            d["um"] = next(it)
        if lv["rgb"]:
            d["rw"] = next(it); d["rb"] = next(it)
        lref.append(d)
    o_ref = next(it)                                      # (1, H*W, rgb_ch)

    # ---- MappingNet: depth x (Linear + LeakyReLU(0.1)) ----------------------
    style = ctx_ref[0].astype(jnp.float32)                # (1, ctx_dim)
    for w_ref, b_ref in map_refs:
        style = jnp.dot(style.astype(jnp.bfloat16), w_ref[...],
                        preferred_element_type=jnp.float32) + b_ref[...]
        style = _lrelu(style)
    style_bf = style.astype(jnp.bfloat16)                 # (1, style_dim)

    # ---- Encoder: dBlocks (3x3 conv + LeakyReLU (+ 2x2 avg-pool)) -----------
    ys = []
    x = x_ref[0]                                          # (H*W, Cc) bf16
    for lv, d in zip(levels, lref):
        y = _conv3x3_lrelu(x, lv["H"], lv["W"], d["dw"], d["db"])
        yb = y.astype(jnp.bfloat16)                       # (H*W, 32)
        ys.append(yb)
        if lv["pool"]:                                    # pool = P @ y (MXU)
            x = jnp.dot(d["pm"][...], yb,
                        preferred_element_type=jnp.float32).astype(jnp.bfloat16)

    # ---- Decoder: SynthesisBlocks, coarse -> fine ----------------------------
    h = None
    for lv, d, y in zip(reversed(levels), reversed(lref), reversed(ys)):
        # cond 1x1 projection of the encoder feature
        cond = jnp.dot(y, d["cw"][...],
                       preferred_element_type=jnp.float32) + d["cb"][...]
        if lv["up"]:                                      # nearest 2x upsample
            cond = cond + jnp.dot(d["um"][...], h,
                                  preferred_element_type=jnp.float32)
        # style modulation: scale = 1 + style @ Ws + bs
        sc = 1.0 + jnp.dot(style_bf, d["sw"][...],
                           preferred_element_type=jnp.float32) + d["sb"][...]
        hmod = (cond * sc).astype(jnp.bfloat16)           # (H*W, inp_ch)
        acc = _conv3x3_lrelu(hmod, lv["H"], lv["W"], d["kw"], d["kb"])
        if lv["rgb"]:                                     # to-RGB 1x1
            rgb = jnp.dot(acc.astype(jnp.bfloat16), d["rw"][...],
                          preferred_element_type=jnp.float32) + d["rb"][...]
            o_ref[0] = rgb.astype(o_ref.dtype)
        else:
            h = acc.astype(jnp.bfloat16)


# ----------------------------------------------------------------------------
# Constant resampling operator matrices (entries 0 / 0.25 / 1, exact in bf16)
# ----------------------------------------------------------------------------
def _pool_indices(H, W):
    c = jnp.arange(H * W)
    return (c // W // 2) * (W // 2) + (c % W) // 2


@functools.lru_cache(maxsize=None)
def _pool_matrix(H, W):
    """(H*W/4, H*W) bf16: pooled = P @ y  (2x2 average pool, row-major flat)."""
    r = _pool_indices(H, W)
    P = (jnp.arange(H * W // 4)[:, None] == r[None, :]).astype(jnp.float32)
    return (P * 0.25).astype(jnp.bfloat16)


@functools.lru_cache(maxsize=None)
def _upsample_matrix(H, W):
    """(H*W, H*W/4) bf16: up = U @ x  (nearest 2x upsample, row-major flat)."""
    r = _pool_indices(H, W)
    U = (r[:, None] == jnp.arange(H * W // 4)[None, :]).astype(jnp.float32)
    return U.astype(jnp.bfloat16)


# ----------------------------------------------------------------------------
# Deterministic parameter init (Kaiming-uniform-ish, like nn.Linear/Conv2d)
# ----------------------------------------------------------------------------
def _init_pair(key, w_shape, fan_in, b_len):
    kw, kb = jax.random.split(key)
    lim = fan_in ** -0.5
    w = jax.random.uniform(kw, w_shape, jnp.float32, -lim, lim)
    b = jax.random.uniform(kb, (1, b_len), jnp.float32, -lim, lim)
    return w, b


def _full_spec(a):
    nd = a.ndim
    return pl.BlockSpec(a.shape, lambda n, _nd=nd: (0,) * _nd)


# ----------------------------------------------------------------------------
# Generator
# ----------------------------------------------------------------------------
class Generator:
    def __init__(self, config, key):
        depth = config["depth"]
        style_dim = config["style_dim"]
        context_dim = config["context_dim"]
        cond_channels = config["cond_channels"]
        self.rgb_channels = config["rgb_channels"]
        filters = list(config["filters"])
        fixed_channels = 32

        keys = iter(jax.random.split(key, 64))

        # MappingNet: depth x (Linear -> LeakyReLU(0.1)) — weights in bf16
        self.mapping_params = []
        for i in range(depth):
            fin = context_dim if i == 0 else style_dim
            w, b = _init_pair(next(keys), (fin, style_dim), fin, style_dim)
            self.mapping_params.append((w.astype(jnp.bfloat16), b))

        # SynthesisNet (dBlocks + SynthesisBlocks), per-level parameter dicts
        self.n_levels = len(filters)
        self.level_params = []
        for i in range(self.n_levels):
            is_first = i == 0
            is_last = i == self.n_levels - 1

            d_in = cond_channels if is_first else fixed_channels
            dw, db = _init_pair(next(keys), (3, 3, d_in, fixed_channels),
                                9 * d_in, fixed_channels)       # dBlock 3x3
            inp_ch = filters[i]
            out_ch = filters[max(i - 1, 0)]
            cw, cb = _init_pair(next(keys), (fixed_channels, inp_ch),
                                fixed_channels, inp_ch)         # cond 1x1 proj
            sw, sb = _init_pair(next(keys), (style_dim, inp_ch),
                                style_dim, inp_ch)              # style -> scale
            kw_, kb_ = _init_pair(next(keys), (3, 3, inp_ch, out_ch),
                                  9 * inp_ch, out_ch)           # main 3x3 conv
            p = dict(
                dw=dw.reshape(9 * d_in, fixed_channels).astype(jnp.bfloat16),
                db=db,
                sw=sw.astype(jnp.bfloat16), sb=sb,
                cw=cw.astype(jnp.bfloat16), cb=cb,
                kw=kw_.reshape(9 * inp_ch, out_ch).astype(jnp.bfloat16),
                kb=kb_,
                is_first=is_first, is_last=is_last)
            if is_first:
                rw, rb = _init_pair(next(keys), (out_ch, self.rgb_channels),
                                    out_ch, self.rgb_channels)  # to-RGB 1x1
                p["rw"], p["rb"] = rw.astype(jnp.bfloat16), rb
            self.level_params.append(p)

    # ---- forward -----------------------------------------------------------
    def __call__(self, x_nchw, context, noise=None):
        N, Cc, H, W = x_nchw.shape
        ctx_dim = context.shape[1]

        # NCHW -> flattened NHWC (spatial-major, channels on the lane axis)
        x = jnp.transpose(x_nchw, (0, 2, 3, 1)).reshape(N, H * W, Cc)
        x = x.astype(jnp.bfloat16)
        ctx3 = context.reshape(N, 1, ctx_dim).astype(jnp.float32)

        # Assemble the single fused pallas_call (all weights full-block).
        args = [ctx3]
        in_specs = [pl.BlockSpec((1, 1, ctx_dim), lambda n: (n, 0, 0))]
        for w, b in self.mapping_params:
            args += [w, b]
            in_specs += [_full_spec(w), _full_spec(b)]
        args.append(x)
        in_specs.append(pl.BlockSpec((1, H * W, Cc), lambda n: (n, 0, 0)))

        levels = []
        for i, p in enumerate(self.level_params):
            h_i, w_i = H >> i, W >> i
            lv = dict(H=h_i, W=w_i,
                      pool=not p["is_last"],
                      up=not p["is_last"],
                      rgb=p["is_first"])
            levels.append(lv)
            args += [p["dw"], p["db"]]
            in_specs += [_full_spec(p["dw"]), _full_spec(p["db"])]
            if lv["pool"]:
                pm = _pool_matrix(h_i, w_i)
                args.append(pm); in_specs.append(_full_spec(pm))
            for k in ("sw", "sb", "cw", "cb", "kw", "kb"):
                args.append(p[k]); in_specs.append(_full_spec(p[k]))
            if lv["up"]:
                um = _upsample_matrix(h_i, w_i)
                args.append(um); in_specs.append(_full_spec(um))
            if lv["rgb"]:
                args += [p["rw"], p["rb"]]
                in_specs += [_full_spec(p["rw"]), _full_spec(p["rb"])]

        rgb_ch = self.rgb_channels
        out = pl.pallas_call(
            functools.partial(_generator_kernel,
                              depth=len(self.mapping_params), levels=levels),
            out_shape=jax.ShapeDtypeStruct((N, H * W, rgb_ch), jnp.float32),
            grid=(N,),
            in_specs=in_specs,
            out_specs=pl.BlockSpec((1, H * W, rgb_ch), lambda n: (n, 0, 0)),
            compiler_params=pltpu.CompilerParams(
                dimension_semantics=("parallel",)),
        )(*args)

        if noise is not None:
            # TODO(synk): exact SynthesisBlock noise-injection semantics
            # unknown; simple additive broadcast (demo passes noise=None).
            out = out + jnp.asarray(noise, out.dtype)

        out = out.reshape(N, H, W, rgb_ch)
        return jnp.transpose(out, (0, 3, 1, 2)).astype(jnp.float32)  # NCHW


# ----------------------------------------------------------------------------
if __name__ == "__main__":
    config = dict(depth=2, style_dim=32, context_dim=16,
                  cond_channels=4, rgb_channels=3, filters=(32, 64))

    gen = Generator(config, jax.random.PRNGKey(0))

    kx, kc = jax.random.split(jax.random.PRNGKey(0), 2)
    x = jax.random.normal(kx, (2, 4, 16, 16), jnp.float32)        # NCHW input
    context = jax.random.normal(kc, (2, 16), jnp.float32)

    out = gen(x, context, noise=None)
    out = jax.block_until_ready(out)
    assert out.shape == (2, 3, 16, 16), out.shape
    assert jnp.all(jnp.isfinite(out))
    print("KERNEL_OK")
</pallas_src>

<mosaic_0001>
module attributes {stable_mosaic.version = 11 : i64} {
  func.func @_generator_kernel(%arg0: i32, %arg1: memref<1x1x16xf32, #tpu.memory_space<vmem>>, %arg2: memref<16x32xbf16, #tpu.memory_space<vmem>>, %arg3: memref<1x32xf32, #tpu.memory_space<vmem>>, %arg4: memref<32x32xbf16, #tpu.memory_space<vmem>>, %arg5: memref<1x32xf32, #tpu.memory_space<vmem>>, %arg6: memref<1x256x4xbf16, #tpu.memory_space<vmem>>, %arg7: memref<36x32xbf16, #tpu.memory_space<vmem>>, %arg8: memref<1x32xf32, #tpu.memory_space<vmem>>, %arg9: memref<64x256xbf16, #tpu.memory_space<vmem>>, %arg10: memref<32x32xbf16, #tpu.memory_space<vmem>>, %arg11: memref<1x32xf32, #tpu.memory_space<vmem>>, %arg12: memref<32x32xbf16, #tpu.memory_space<vmem>>, %arg13: memref<1x32xf32, #tpu.memory_space<vmem>>, %arg14: memref<288x32xbf16, #tpu.memory_space<vmem>>, %arg15: memref<1x32xf32, #tpu.memory_space<vmem>>, %arg16: memref<256x64xbf16, #tpu.memory_space<vmem>>, %arg17: memref<32x3xbf16, #tpu.memory_space<vmem>>, %arg18: memref<1x3xf32, #tpu.memory_space<vmem>>, %arg19: memref<288x32xbf16, #tpu.memory_space<vmem>>, %arg20: memref<1x32xf32, #tpu.memory_space<vmem>>, %arg21: memref<32x64xbf16, #tpu.memory_space<vmem>>, %arg22: memref<1x64xf32, #tpu.memory_space<vmem>>, %arg23: memref<32x64xbf16, #tpu.memory_space<vmem>>, %arg24: memref<1x64xf32, #tpu.memory_space<vmem>>, %arg25: memref<576x32xbf16, #tpu.memory_space<vmem>>, %arg26: memref<1x32xf32, #tpu.memory_space<vmem>>, %arg27: memref<1x256x3xf32, #tpu.memory_space<vmem>>) attributes {dimension_semantics = [#tpu.dimension_semantics<parallel>], iteration_bounds = array<i64: 2>, scalar_prefetch = 0 : i64, scratch_operands = 0 : i64, tpu.core_type = #tpu.core_type<tc>, window_params = [{transform_indices = @transform_0, window_bounds = array<i64: 1, 1, 16>}, {pipeline_mode = #tpu.pipeline_mode<synchronous>, transform_indices = @transform_1, window_bounds = array<i64: 16, 32>}, {pipeline_mode = #tpu.pipeline_mode<synchronous>, transform_indices = @transform_2, window_bounds = array<i64: 1, 32>}, {pipeline_mode = #tpu.pipeline_mode<synchronous>, transform_indices = @transform_3, window_bounds = array<i64: 32, 32>}, {pipeline_mode = #tpu.pipeline_mode<synchronous>, transform_indices = @transform_4, window_bounds = array<i64: 1, 32>}, {transform_indices = @transform_5, window_bounds = array<i64: 1, 256, 4>}, {pipeline_mode = #tpu.pipeline_mode<synchronous>, transform_indices = @transform_6, window_bounds = array<i64: 36, 32>}, {pipeline_mode = #tpu.pipeline_mode<synchronous>, transform_indices = @transform_7, window_bounds = array<i64: 1, 32>}, {pipeline_mode = #tpu.pipeline_mode<synchronous>, transform_indices = @transform_8, window_bounds = array<i64: 64, 256>}, {pipeline_mode = #tpu.pipeline_mode<synchronous>, transform_indices = @transform_9, window_bounds = array<i64: 32, 32>}, {pipeline_mode = #tpu.pipeline_mode<synchronous>, transform_indices = @transform_10, window_bounds = array<i64: 1, 32>}, {pipeline_mode = #tpu.pipeline_mode<synchronous>, transform_indices = @transform_11, window_bounds = array<i64: 32, 32>}, {pipeline_mode = #tpu.pipeline_mode<synchronous>, transform_indices = @transform_12, window_bounds = array<i64: 1, 32>}, {pipeline_mode = #tpu.pipeline_mode<synchronous>, transform_indices = @transform_13, window_bounds = array<i64: 288, 32>}, {pipeline_mode = #tpu.pipeline_mode<synchronous>, transform_indices = @transform_14, window_bounds = array<i64: 1, 32>}, {pipeline_mode = #tpu.pipeline_mode<synchronous>, transform_indices = @transform_15, window_bounds = array<i64: 256, 64>}, {pipeline_mode = #tpu.pipeline_mode<synchronous>, transform_indices = @transform_16, window_bounds = array<i64: 32, 3>}, {pipeline_mode = #tpu.pipeline_mode<synchronous>, transform_indices = @transform_17, window_bounds = array<i64: 1, 3>}, {pipeline_mode = #tpu.pipeline_mode<synchronous>, transform_indices = @transform_18, window_bounds = array<i64: 288, 32>}, {pipeline_mode = #tpu.pipeline_mode<synchronous>, transform_indices = @transform_19, window_bounds = array<i64: 1, 32>}, {pipeline_mode = #tpu.pipeline_mode<synchronous>, transform_indices = @transform_20, window_bounds = array<i64: 32, 64>}, {pipeline_mode = #tpu.pipeline_mode<synchronous>, transform_indices = @transform_21, window_bounds = array<i64: 1, 64>}, {pipeline_mode = #tpu.pipeline_mode<synchronous>, transform_indices = @transform_22, window_bounds = array<i64: 32, 64>}, {pipeline_mode = #tpu.pipeline_mode<synchronous>, transform_indices = @transform_23, window_bounds = array<i64: 1, 64>}, {pipeline_mode = #tpu.pipeline_mode<synchronous>, transform_indices = @transform_24, window_bounds = array<i64: 576, 32>}, {pipeline_mode = #tpu.pipeline_mode<synchronous>, transform_indices = @transform_25, window_bounds = array<i64: 1, 32>}, {transform_indices = @transform_26, window_bounds = array<i64: 1, 256, 3>}]} {
    %c0 = arith.constant 0 : index
    %c0_0 = arith.constant 0 : index
    %c0_1 = arith.constant 0 : index
    %0 = vector.load %arg1[%c0, %c0_0, %c0_1] : memref<1x1x16xf32, #tpu.memory_space<vmem>>, vector<1x1x16xf32>
    %1 = vector.shape_cast %0 : vector<1x1x16xf32> to vector<1x16xf32>
    %2 = arith.truncf %1 : vector<1x16xf32> to vector<1x16xbf16>
    %c0_2 = arith.constant 0 : index
    %c0_3 = arith.constant 0 : index
    %3 = vector.load %arg2[%c0_2, %c0_3] : memref<16x32xbf16, #tpu.memory_space<vmem>>, vector<16x32xbf16>
    %cst = arith.constant dense<0.000000e+00> : vector<1x32xf32>
    %4 = tpu.matmul %2, %3, %cst {dimension_numbers = #tpu.dot_dimension_numbers<[1], [0], [0], [1], [0, 0, 1, 1], [], []>} : vector<1x16xbf16>, vector<16x32xbf16>, vector<1x32xf32> -> vector<1x32xf32>
    %c0_4 = arith.constant 0 : index
    %c0_5 = arith.constant 0 : index
    %5 = vector.load %arg3[%c0_4, %c0_5] : memref<1x32xf32, #tpu.memory_space<vmem>>, vector<1x32xf32>
    %6 = arith.addf %4, %5 : vector<1x32xf32>
    %cst_6 = arith.constant 0.000000e+00 : f32
    %7 = vector.broadcast %cst_6 : f32 to vector<1x32xf32>
    %8 = arith.cmpf ogt, %6, %7 : vector<1x32xf32>
    %cst_7 = arith.constant 1.000000e-01 : f32
    %9 = vector.broadcast %cst_7 : f32 to vector<1x32xf32>
    %10 = arith.mulf %9, %6 : vector<1x32xf32>
    %11 = arith.select %8, %6, %10 : vector<1x32xi1>, vector<1x32xf32>
    %12 = arith.truncf %11 : vector<1x32xf32> to vector<1x32xbf16>
    %c0_8 = arith.constant 0 : index
    %c0_9 = arith.constant 0 : index
    %13 = vector.load %arg4[%c0_8, %c0_9] : memref<32x32xbf16, #tpu.memory_space<vmem>>, vector<32x32xbf16>
    %cst_10 = arith.constant dense<0.000000e+00> : vector<1x32xf32>
    %14 = tpu.matmul %12, %13, %cst_10 {dimension_numbers = #tpu.dot_dimension_numbers<[1], [0], [0], [1], [0, 0, 1, 1], [], []>} : vector<1x32xbf16>, vector<32x32xbf16>, vector<1x32xf32> -> vector<1x32xf32>
    %c0_11 = arith.constant 0 : index
    %c0_12 = arith.constant 0 : index
    %15 = vector.load %arg5[%c0_11, %c0_12] : memref<1x32xf32, #tpu.memory_space<vmem>>, vector<1x32xf32>
    %16 = arith.addf %14, %15 : vector<1x32xf32>
    %cst_13 = arith.constant 0.000000e+00 : f32
    %17 = vector.broadcast %cst_13 : f32 to vector<1x32xf32>
    %18 = arith.cmpf ogt, %16, %17 : vector<1x32xf32>
    %cst_14 = arith.constant 1.000000e-01 : f32
    %19 = vector.broadcast %cst_14 : f32 to vector<1x32xf32>
    %20 = arith.mulf %19, %16 : vector<1x32xf32>
    %21 = arith.select %18, %16, %20 : vector<1x32xi1>, vector<1x32xf32>
    %22 = arith.truncf %21 : vector<1x32xf32> to vector<1x32xbf16>
    %c0_15 = arith.constant 0 : index
    %c0_16 = arith.constant 0 : index
    %c0_17 = arith.constant 0 : index
    %23 = vector.load %arg6[%c0_15, %c0_16, %c0_17] : memref<1x256x4xbf16, #tpu.memory_space<vmem>>, vector<1x256x4xbf16>
    %24 = vector.shape_cast %23 : vector<1x256x4xbf16> to vector<256x4xbf16>
    %25 = vector.shape_cast %24 : vector<256x4xbf16> to vector<16x16x4xbf16>
    %cst_18 = arith.constant 0.000000e+00 : bf16
    %26 = vector.broadcast %cst_18 : bf16 to vector<1x16x4xbf16>
    %27 = tpu.concatenate %26, %25, %26 in 0 : vector<1x16x4xbf16>, vector<16x16x4xbf16>, vector<1x16x4xbf16> -> vector<18x16x4xbf16>
    %cst_19 = arith.constant 0.000000e+00 : bf16
    %28 = vector.broadcast %cst_19 : bf16 to vector<18x1x4xbf16>
    %29 = tpu.concatenate %28, %27, %28 in 1 : vector<18x1x4xbf16>, vector<18x16x4xbf16>, vector<18x1x4xbf16> -> vector<18x18x4xbf16>
    %30 = vector.extract_strided_slice %29 {offsets = [0, 0, 0], sizes = [16, 16, 4], strides = [1, 1, 1]} : vector<18x18x4xbf16> to vector<16x16x4xbf16>
    %31 = vector.shape_cast %30 : vector<16x16x4xbf16> to vector<256x4xbf16>
    %32 = vector.extract_strided_slice %29 {offsets = [0, 1, 0], sizes = [16, 16, 4], strides = [1, 1, 1]} : vector<18x18x4xbf16> to vector<16x16x4xbf16>
    %33 = vector.shape_cast %32 : vector<16x16x4xbf16> to vector<256x4xbf16>
    %34 = vector.extract_strided_slice %29 {offsets = [0, 2, 0], sizes = [16, 16, 4], strides = [1, 1, 1]} : vector<18x18x4xbf16> to vector<16x16x4xbf16>
    %35 = vector.shape_cast %34 : vector<16x16x4xbf16> to vector<256x4xbf16>
    %36 = vector.extract_strided_slice %29 {offsets = [1, 0, 0], sizes = [16, 16, 4], strides = [1, 1, 1]} : vector<18x18x4xbf16> to vector<16x16x4xbf16>
    %37 = vector.shape_cast %36 : vector<16x16x4xbf16> to vector<256x4xbf16>
    %38 = vector.extract_strided_slice %29 {offsets = [1, 1, 0], sizes = [16, 16, 4], strides = [1, 1, 1]} : vector<18x18x4xbf16> to vector<16x16x4xbf16>
    %39 = vector.shape_cast %38 : vector<16x16x4xbf16> to vector<256x4xbf16>
    %40 = vector.extract_strided_slice %29 {offsets = [1, 2, 0], sizes = [16, 16, 4], strides = [1, 1, 1]} : vector<18x18x4xbf16> to vector<16x16x4xbf16>
    %41 = vector.shape_cast %40 : vector<16x16x4xbf16> to vector<256x4xbf16>
    %42 = vector.extract_strided_slice %29 {offsets = [2, 0, 0], sizes = [16, 16, 4], strides = [1, 1, 1]} : vector<18x18x4xbf16> to vector<16x16x4xbf16>
    %43 = vector.shape_cast %42 : vector<16x16x4xbf16> to vector<256x4xbf16>
    %44 = vector.extract_strided_slice %29 {offsets = [2, 1, 0], sizes = [16, 16, 4], strides = [1, 1, 1]} : vector<18x18x4xbf16> to vector<16x16x4xbf16>
    %45 = vector.shape_cast %44 : vector<16x16x4xbf16> to vector<256x4xbf16>
    %46 = vector.extract_strided_slice %29 {offsets = [2, 2, 0], sizes = [16, 16, 4], strides = [1, 1, 1]} : vector<18x18x4xbf16> to vector<16x16x4xbf16>
    %47 = vector.shape_cast %46 : vector<16x16x4xbf16> to vector<256x4xbf16>
    %48 = tpu.concatenate %31, %33, %35, %37, %39, %41, %43, %45, %47 in 1 : vector<256x4xbf16>, vector<256x4xbf16>, vector<256x4xbf16>, vector<256x4xbf16>, vector<256x4xbf16>, vector<256x4xbf16>, vector<256x4xbf16>, vector<256x4xbf16>, vector<256x4xbf16> -> vector<256x36xbf16>
    %c0_20 = arith.constant 0 : index
    %c0_21 = arith.constant 0 : index
    %49 = vector.load %arg7[%c0_20, %c0_21] : memref<36x32xbf16, #tpu.memory_space<vmem>>, vector<36x32xbf16>
    %cst_22 = arith.constant dense<0.000000e+00> : vector<256x32xf32>
    %50 = tpu.matmul %48, %49, %cst_22 {dimension_numbers = #tpu.dot_dimension_numbers<[1], [0], [0], [1], [0, 0, 1, 1], [], []>} : vector<256x36xbf16>, vector<36x32xbf16>, vector<256x32xf32> -> vector<256x32xf32>
    %c0_23 = arith.constant 0 : index
    %c0_24 = arith.constant 0 : index
    %51 = vector.load %arg8[%c0_23, %c0_24] : memref<1x32xf32, #tpu.memory_space<vmem>>, vector<1x32xf32>
    %52 = vector.broadcast %51 : vector<1x32xf32> to vector<256x32xf32>
    %53 = arith.addf %50, %52 : vector<256x32xf32>
    %cst_25 = arith.constant 0.000000e+00 : f32
    %54 = vector.broadcast %cst_25 : f32 to vector<256x32xf32>
    %55 = arith.cmpf ogt, %53, %54 : vector<256x32xf32>
    %cst_26 = arith.constant 1.000000e-01 : f32
    %56 = vector.broadcast %cst_26 : f32 to vector<256x32xf32>
    %57 = arith.mulf %56, %53 : vector<256x32xf32>
    %58 = arith.select %55, %53, %57 : vector<256x32xi1>, vector<256x32xf32>
    %59 = arith.truncf %58 : vector<256x32xf32> to vector<256x32xbf16>
    %c0_27 = arith.constant 0 : index
    %c0_28 = arith.constant 0 : index
    %60 = vector.load %arg9[%c0_27, %c0_28] : memref<64x256xbf16, #tpu.memory_space<vmem>>, vector<64x256xbf16>
    %cst_29 = arith.constant dense<0.000000e+00> : vector<64x32xf32>
    %61 = tpu.matmul %60, %59, %cst_29 {dimension_numbers = #tpu.dot_dimension_numbers<[1], [0], [0], [1], [0, 0, 1, 1], [], []>} : vector<64x256xbf16>, vector<256x32xbf16>, vector<64x32xf32> -> vector<64x32xf32>
    %62 = arith.truncf %61 : vector<64x32xf32> to vector<64x32xbf16>
    %63 = vector.shape_cast %62 : vector<64x32xbf16> to vector<8x8x32xbf16>
    %cst_30 = arith.constant 0.000000e+00 : bf16
    %64 = vector.broadcast %cst_30 : bf16 to vector<1x8x32xbf16>
    %65 = tpu.concatenate %64, %63, %64 in 0 : vector<1x8x32xbf16>, vector<8x8x32xbf16>, vector<1x8x32xbf16> -> vector<10x8x32xbf16>
    %cst_31 = arith.constant 0.000000e+00 : bf16
    %66 = vector.broadcast %cst_31 : bf16 to vector<10x1x32xbf16>
    %67 = tpu.concatenate %66, %65, %66 in 1 : vector<10x1x32xbf16>, vector<10x8x32xbf16>, vector<10x1x32xbf16> -> vector<10x10x32xbf16>
    %68 = vector.extract_strided_slice %67 {offsets = [0, 0, 0], sizes = [8, 8, 32], strides = [1, 1, 1]} : vector<10x10x32xbf16> to vector<8x8x32xbf16>
    %69 = vector.shape_cast %68 : vector<8x8x32xbf16> to vector<64x32xbf16>
    %70 = vector.extract_strided_slice %67 {offsets = [0, 1, 0], sizes = [8, 8, 32], strides = [1, 1, 1]} : vector<10x10x32xbf16> to vector<8x8x32xbf16>
    %71 = vector.shape_cast %70 : vector<8x8x32xbf16> to vector<64x32xbf16>
    %72 = vector.extract_strided_slice %67 {offsets = [0, 2, 0], sizes = [8, 8, 32], strides = [1, 1, 1]} : vector<10x10x32xbf16> to vector<8x8x32xbf16>
    %73 = vector.shape_cast %72 : vector<8x8x32xbf16> to vector<64x32xbf16>
    %74 = vector.extract_strided_slice %67 {offsets = [1, 0, 0], sizes = [8, 8, 32], strides = [1, 1, 1]} : vector<10x10x32xbf16> to vector<8x8x32xbf16>
    %75 = vector.shape_cast %74 : vector<8x8x32xbf16> to vector<64x32xbf16>
    %76 = vector.extract_strided_slice %67 {offsets = [1, 1, 0], sizes = [8, 8, 32], strides = [1, 1, 1]} : vector<10x10x32xbf16> to vector<8x8x32xbf16>
    %77 = vector.shape_cast %76 : vector<8x8x32xbf16> to vector<64x32xbf16>
    %78 = vector.extract_strided_slice %67 {offsets = [1, 2, 0], sizes = [8, 8, 32], strides = [1, 1, 1]} : vector<10x10x32xbf16> to vector<8x8x32xbf16>
    %79 = vector.shape_cast %78 : vector<8x8x32xbf16> to vector<64x32xbf16>
    %80 = vector.extract_strided_slice %67 {offsets = [2, 0, 0], sizes = [8, 8, 32], strides = [1, 1, 1]} : vector<10x10x32xbf16> to vector<8x8x32xbf16>
    %81 = vector.shape_cast %80 : vector<8x8x32xbf16> to vector<64x32xbf16>
    %82 = vector.extract_strided_slice %67 {offsets = [2, 1, 0], sizes = [8, 8, 32], strides = [1, 1, 1]} : vector<10x10x32xbf16> to vector<8x8x32xbf16>
    %83 = vector.shape_cast %82 : vector<8x8x32xbf16> to vector<64x32xbf16>
    %84 = vector.extract_strided_slice %67 {offsets = [2, 2, 0], sizes = [8, 8, 32], strides = [1, 1, 1]} : vector<10x10x32xbf16> to vector<8x8x32xbf16>
    %85 = vector.shape_cast %84 : vector<8x8x32xbf16> to vector<64x32xbf16>
    %86 = tpu.concatenate %69, %71, %73, %75, %77, %79, %81, %83, %85 in 1 : vector<64x32xbf16>, vector<64x32xbf16>, vector<64x32xbf16>, vector<64x32xbf16>, vector<64x32xbf16>, vector<64x32xbf16>, vector<64x32xbf16>, vector<64x32xbf16>, vector<64x32xbf16> -> vector<64x288xbf16>
    %c0_32 = arith.constant 0 : index
    %c0_33 = arith.constant 0 : index
    %87 = vector.load %arg19[%c0_32, %c0_33] : memref<288x32xbf16, #tpu.memory_space<vmem>>, vector<288x32xbf16>
    %cst_34 = arith.constant dense<0.000000e+00> : vector<64x32xf32>
    %88 = tpu.matmul %86, %87, %cst_34 {dimension_numbers = #tpu.dot_dimension_numbers<[1], [0], [0], [1], [0, 0, 1, 1], [], []>} : vector<64x288xbf16>, vector<288x32xbf16>, vector<64x32xf32> -> vector<64x32xf32>
    %c0_35 = arith.constant 0 : index
    %c0_36 = arith.constant 0 : index
    %89 = vector.load %arg20[%c0_35, %c0_36] : memref<1x32xf32, #tpu.memory_space<vmem>>, vector<1x32xf32>
    %90 = vector.broadcast %89 : vector<1x32xf32> to vector<64x32xf32>
    %91 = arith.addf %88, %90 : vector<64x32xf32>
    %cst_37 = arith.constant 0.000000e+00 : f32
    %92 = vector.broadcast %cst_37 : f32 to vector<64x32xf32>
    %93 = arith.cmpf ogt, %91, %92 : vector<64x32xf32>
    %cst_38 = arith.constant 1.000000e-01 : f32
    %94 = vector.broadcast %cst_38 : f32 to vector<64x32xf32>
    %95 = arith.mulf %94, %91 : vector<64x32xf32>
    %96 = arith.select %93, %91, %95 : vector<64x32xi1>, vector<64x32xf32>
    %97 = arith.truncf %96 : vector<64x32xf32> to vector<64x32xbf16>
    %c0_39 = arith.constant 0 : index
    %c0_40 = arith.constant 0 : index
    %98 = vector.load %arg23[%c0_39, %c0_40] : memref<32x64xbf16, #tpu.memory_space<vmem>>, vector<32x64xbf16>
    %cst_41 = arith.constant dense<0.000000e+00> : vector<64x64xf32>
    %99 = tpu.matmul %97, %98, %cst_41 {dimension_numbers = #tpu.dot_dimension_numbers<[1], [0], [0], [1], [0, 0, 1, 1], [], []>} : vector<64x32xbf16>, vector<32x64xbf16>, vector<64x64xf32> -> vector<64x64xf32>
    %c0_42 = arith.constant 0 : index
    %c0_43 = arith.constant 0 : index
    %100 = vector.load %arg24[%c0_42, %c0_43] : memref<1x64xf32, #tpu.memory_space<vmem>>, vector<1x64xf32>
    %101 = vector.broadcast %100 : vector<1x64xf32> to vector<64x64xf32>
    %102 = arith.addf %99, %101 : vector<64x64xf32>
    %c0_44 = arith.constant 0 : index
    %c0_45 = arith.constant 0 : index
    %103 = vector.load %arg21[%c0_44, %c0_45] : memref<32x64xbf16, #tpu.memory_space<vmem>>, vector<32x64xbf16>
    %cst_46 = arith.constant dense<0.000000e+00> : vector<1x64xf32>
    %104 = tpu.matmul %22, %103, %cst_46 {dimension_numbers = #tpu.dot_dimension_numbers<[1], [0], [0], [1], [0, 0, 1, 1], [], []>} : vector<1x32xbf16>, vector<32x64xbf16>, vector<1x64xf32> -> vector<1x64xf32>
    %cst_47 = arith.constant 1.000000e+00 : f32
    %105 = vector.broadcast %cst_47 : f32 to vector<1x64xf32>
    %106 = arith.addf %105, %104 : vector<1x64xf32>
    %c0_48 = arith.constant 0 : index
    %c0_49 = arith.constant 0 : index
    %107 = vector.load %arg22[%c0_48, %c0_49] : memref<1x64xf32, #tpu.memory_space<vmem>>, vector<1x64xf32>
    %108 = arith.addf %106, %107 : vector<1x64xf32>
    %109 = vector.broadcast %108 : vector<1x64xf32> to vector<64x64xf32>
    %110 = arith.mulf %102, %109 : vector<64x64xf32>
    %111 = arith.truncf %110 : vector<64x64xf32> to vector<64x64xbf16>
    %112 = vector.shape_cast %111 : vector<64x64xbf16> to vector<8x8x64xbf16>
    %cst_50 = arith.constant 0.000000e+00 : bf16
    %113 = vector.broadcast %cst_50 : bf16 to vector<1x8x64xbf16>
    %114 = tpu.concatenate %113, %112, %113 in 0 : vector<1x8x64xbf16>, vector<8x8x64xbf16>, vector<1x8x64xbf16> -> vector<10x8x64xbf16>
    %cst_51 = arith.constant 0.000000e+00 : bf16
    %115 = vector.broadcast %cst_51 : bf16 to vector<10x1x64xbf16>
    %116 = tpu.concatenate %115, %114, %115 in 1 : vector<10x1x64xbf16>, vector<10x8x64xbf16>, vector<10x1x64xbf16> -> vector<10x10x64xbf16>
    %117 = vector.extract_strided_slice %116 {offsets = [0, 0, 0], sizes = [8, 8, 64], strides = [1, 1, 1]} : vector<10x10x64xbf16> to vector<8x8x64xbf16>
    %118 = vector.shape_cast %117 : vector<8x8x64xbf16> to vector<64x64xbf16>
    %119 = vector.extract_strided_slice %116 {offsets = [0, 1, 0], sizes = [8, 8, 64], strides = [1, 1, 1]} : vector<10x10x64xbf16> to vector<8x8x64xbf16>
    %120 = vector.shape_cast %119 : vector<8x8x64xbf16> to vector<64x64xbf16>
    %121 = vector.extract_strided_slice %116 {offsets = [0, 2, 0], sizes = [8, 8, 64], strides = [1, 1, 1]} : vector<10x10x64xbf16> to vector<8x8x64xbf16>
    %122 = vector.shape_cast %121 : vector<8x8x64xbf16> to vector<64x64xbf16>
    %123 = vector.extract_strided_slice %116 {offsets = [1, 0, 0], sizes = [8, 8, 64], strides = [1, 1, 1]} : vector<10x10x64xbf16> to vector<8x8x64xbf16>
    %124 = vector.shape_cast %123 : vector<8x8x64xbf16> to vector<64x64xbf16>
    %125 = vector.extract_strided_slice %116 {offsets = [1, 1, 0], sizes = [8, 8, 64], strides = [1, 1, 1]} : vector<10x10x64xbf16> to vector<8x8x64xbf16>
    %126 = vector.shape_cast %125 : vector<8x8x64xbf16> to vector<64x64xbf16>
    %127 = vector.extract_strided_slice %116 {offsets = [1, 2, 0], sizes = [8, 8, 64], strides = [1, 1, 1]} : vector<10x10x64xbf16> to vector<8x8x64xbf16>
    %128 = vector.shape_cast %127 : vector<8x8x64xbf16> to vector<64x64xbf16>
    %129 = vector.extract_strided_slice %116 {offsets = [2, 0, 0], sizes = [8, 8, 64], strides = [1, 1, 1]} : vector<10x10x64xbf16> to vector<8x8x64xbf16>
    %130 = vector.shape_cast %129 : vector<8x8x64xbf16> to vector<64x64xbf16>
    %131 = vector.extract_strided_slice %116 {offsets = [2, 1, 0], sizes = [8, 8, 64], strides = [1, 1, 1]} : vector<10x10x64xbf16> to vector<8x8x64xbf16>
    %132 = vector.shape_cast %131 : vector<8x8x64xbf16> to vector<64x64xbf16>
    %133 = vector.extract_strided_slice %116 {offsets = [2, 2, 0], sizes = [8, 8, 64], strides = [1, 1, 1]} : vector<10x10x64xbf16> to vector<8x8x64xbf16>
    %134 = vector.shape_cast %133 : vector<8x8x64xbf16> to vector<64x64xbf16>
    %135 = tpu.concatenate %118, %120, %122, %124, %126, %128, %130, %132, %134 in 1 : vector<64x64xbf16>, vector<64x64xbf16>, vector<64x64xbf16>, vector<64x64xbf16>, vector<64x64xbf16>, vector<64x64xbf16>, vector<64x64xbf16>, vector<64x64xbf16>, vector<64x64xbf16> -> vector<64x576xbf16>
    %c0_52 = arith.constant 0 : index
    %c0_53 = arith.constant 0 : index
    %136 = vector.load %arg25[%c0_52, %c0_53] : memref<576x32xbf16, #tpu.memory_space<vmem>>, vector<576x32xbf16>
    %cst_54 = arith.constant dense<0.000000e+00> : vector<64x32xf32>
    %137 = tpu.matmul %135, %136, %cst_54 {dimension_numbers = #tpu.dot_dimension_numbers<[1], [0], [0], [1], [0, 0, 1, 1], [], []>} : vector<64x576xbf16>, vector<576x32xbf16>, vector<64x32xf32> -> vector<64x32xf32>
    %c0_55 = arith.constant 0 : index
    %c0_56 = arith.constant 0 : index
    %138 = vector.load %arg26[%c0_55, %c0_56] : memref<1x32xf32, #tpu.memory_space<vmem>>, vector<1x32xf32>
    %139 = vector.broadcast %138 : vector<1x32xf32> to vector<64x32xf32>
    %140 = arith.addf %137, %139 : vector<64x32xf32>
    %cst_57 = arith.constant 0.000000e+00 : f32
    %141 = vector.broadcast %cst_57 : f32 to vector<64x32xf32>
    %142 = arith.cmpf ogt, %140, %141 : vector<64x32xf32>
    %cst_58 = arith.constant 1.000000e-01 : f32
    %143 = vector.broadcast %cst_58 : f32 to vector<64x32xf32>
    %144 = arith.mulf %143, %140 : vector<64x32xf32>
    %145 = arith.select %142, %140, %144 : vector<64x32xi1>, vector<64x32xf32>
    %146 = arith.truncf %145 : vector<64x32xf32> to vector<64x32xbf16>
    %c0_59 = arith.constant 0 : index
    %c0_60 = arith.constant 0 : index
    %147 = vector.load %arg12[%c0_59, %c0_60] : memref<32x32xbf16, #tpu.memory_space<vmem>>, vector<32x32xbf16>
    %cst_61 = arith.constant dense<0.000000e+00> : vector<256x32xf32>
    %148 = tpu.matmul %59, %147, %cst_61 {dimension_numbers = #tpu.dot_dimension_numbers<[1], [0], [0], [1], [0, 0, 1, 1], [], []>} : vector<256x32xbf16>, vector<32x32xbf16>, vector<256x32xf32> -> vector<256x32xf32>
    %c0_62 = arith.constant 0 : index
    %c0_63 = arith.constant 0 : index
    %149 = vector.load %arg13[%c0_62, %c0_63] : memref<1x32xf32, #tpu.memory_space<vmem>>, vector<1x32xf32>
    %150 = vector.broadcast %149 : vector<1x32xf32> to vector<256x32xf32>
    %151 = arith.addf %148, %150 : vector<256x32xf32>
    %c0_64 = arith.constant 0 : index
    %c0_65 = arith.constant 0 : index
    %152 = vector.load %arg16[%c0_64, %c0_65] : memref<256x64xbf16, #tpu.memory_space<vmem>>, vector<256x64xbf16>
    %cst_66 = arith.constant dense<0.000000e+00> : vector<256x32xf32>
    %153 = tpu.matmul %152, %146, %cst_66 {dimension_numbers = #tpu.dot_dimension_numbers<[1], [0], [0], [1], [0, 0, 1, 1], [], []>} : vector<256x64xbf16>, vector<64x32xbf16>, vector<256x32xf32> -> vector<256x32xf32>
    %154 = arith.addf %151, %153 : vector<256x32xf32>
    %c0_67 = arith.constant 0 : index
    %c0_68 = arith.constant 0 : index
    %155 = vector.load %arg10[%c0_67, %c0_68] : memref<32x32xbf16, #tpu.memory_space<vmem>>, vector<32x32xbf16>
    %cst_69 = arith.constant dense<0.000000e+00> : vector<1x32xf32>
    %156 = tpu.matmul %22, %155, %cst_69 {dimension_numbers = #tpu.dot_dimension_numbers<[1], [0], [0], [1], [0, 0, 1, 1], [], []>} : vector<1x32xbf16>, vector<32x32xbf16>, vector<1x32xf32> -> vector<1x32xf32>
    %cst_70 = arith.constant 1.000000e+00 : f32
    %157 = vector.broadcast %cst_70 : f32 to vector<1x32xf32>
    %158 = arith.addf %157, %156 : vector<1x32xf32>
    %c0_71 = arith.constant 0 : index
    %c0_72 = arith.constant 0 : index
    %159 = vector.load %arg11[%c0_71, %c0_72] : memref<1x32xf32, #tpu.memory_space<vmem>>, vector<1x32xf32>
    %160 = arith.addf %158, %159 : vector<1x32xf32>
    %161 = vector.broadcast %160 : vector<1x32xf32> to vector<256x32xf32>
    %162 = arith.mulf %154, %161 : vector<256x32xf32>
    %163 = arith.truncf %162 : vector<256x32xf32> to vector<256x32xbf16>
    %164 = vector.shape_cast %163 : vector<256x32xbf16> to vector<16x16x32xbf16>
    %cst_73 = arith.constant 0.000000e+00 : bf16
    %165 = vector.broadcast %cst_73 : bf16 to vector<1x16x32xbf16>
    %166 = tpu.concatenate %165, %164, %165 in 0 : vector<1x16x32xbf16>, vector<16x16x32xbf16>, vector<1x16x32xbf16> -> vector<18x16x32xbf16>
    %cst_74 = arith.constant 0.000000e+00 : bf16
    %167 = vector.broadcast %cst_74 : bf16 to vector<18x1x32xbf16>
    %168 = tpu.concatenate %167, %166, %167 in 1 : vector<18x1x32xbf16>, vector<18x16x32xbf16>, vector<18x1x32xbf16> -> vector<18x18x32xbf16>
    %169 = vector.extract_strided_slice %168 {offsets = [0, 0, 0], sizes = [16, 16, 32], strides = [1, 1, 1]} : vector<18x18x32xbf16> to vector<16x16x32xbf16>
    %170 = vector.shape_cast %169 : vector<16x16x32xbf16> to vector<256x32xbf16>
    %171 = vector.extract_strided_slice %168 {offsets = [0, 1, 0], sizes = [16, 16, 32], strides = [1, 1, 1]} : vector<18x18x32xbf16> to vector<16x16x32xbf16>
    %172 = vector.shape_cast %171 : vector<16x16x32xbf16> to vector<256x32xbf16>
    %173 = vector.extract_strided_slice %168 {offsets = [0, 2, 0], sizes = [16, 16, 32], strides = [1, 1, 1]} : vector<18x18x32xbf16> to vector<16x16x32xbf16>
    %174 = vector.shape_cast %173 : vector<16x16x32xbf16> to vector<256x32xbf16>
    %175 = vector.extract_strided_slice %168 {offsets = [1, 0, 0], sizes = [16, 16, 32], strides = [1, 1, 1]} : vector<18x18x32xbf16> to vector<16x16x32xbf16>
    %176 = vector.shape_cast %175 : vector<16x16x32xbf16> to vector<256x32xbf16>
    %177 = vector.extract_strided_slice %168 {offsets = [1, 1, 0], sizes = [16, 16, 32], strides = [1, 1, 1]} : vector<18x18x32xbf16> to vector<16x16x32xbf16>
    %178 = vector.shape_cast %177 : vector<16x16x32xbf16> to vector<256x32xbf16>
    %179 = vector.extract_strided_slice %168 {offsets = [1, 2, 0], sizes = [16, 16, 32], strides = [1, 1, 1]} : vector<18x18x32xbf16> to vector<16x16x32xbf16>
    %180 = vector.shape_cast %179 : vector<16x16x32xbf16> to vector<256x32xbf16>
    %181 = vector.extract_strided_slice %168 {offsets = [2, 0, 0], sizes = [16, 16, 32], strides = [1, 1, 1]} : vector<18x18x32xbf16> to vector<16x16x32xbf16>
    %182 = vector.shape_cast %181 : vector<16x16x32xbf16> to vector<256x32xbf16>
    %183 = vector.extract_strided_slice %168 {offsets = [2, 1, 0], sizes = [16, 16, 32], strides = [1, 1, 1]} : vector<18x18x32xbf16> to vector<16x16x32xbf16>
    %184 = vector.shape_cast %183 : vector<16x16x32xbf16> to vector<256x32xbf16>
    %185 = vector.extract_strided_slice %168 {offsets = [2, 2, 0], sizes = [16, 16, 32], strides = [1, 1, 1]} : vector<18x18x32xbf16> to vector<16x16x32xbf16>
    %186 = vector.shape_cast %185 : vector<16x16x32xbf16> to vector<256x32xbf16>
    %187 = tpu.concatenate %170, %172, %174, %176, %178, %180, %182, %184, %186 in 1 : vector<256x32xbf16>, vector<256x32xbf16>, vector<256x32xbf16>, vector<256x32xbf16>, vector<256x32xbf16>, vector<256x32xbf16>, vector<256x32xbf16>, vector<256x32xbf16>, vector<256x32xbf16> -> vector<256x288xbf16>
    %c0_75 = arith.constant 0 : index
    %c0_76 = arith.constant 0 : index
    %188 = vector.load %arg14[%c0_75, %c0_76] : memref<288x32xbf16, #tpu.memory_space<vmem>>, vector<288x32xbf16>
    %cst_77 = arith.constant dense<0.000000e+00> : vector<256x32xf32>
    %189 = tpu.matmul %187, %188, %cst_77 {dimension_numbers = #tpu.dot_dimension_numbers<[1], [0], [0], [1], [0, 0, 1, 1], [], []>} : vector<256x288xbf16>, vector<288x32xbf16>, vector<256x32xf32> -> vector<256x32xf32>
    %c0_78 = arith.constant 0 : index
    %c0_79 = arith.constant 0 : index
    %190 = vector.load %arg15[%c0_78, %c0_79] : memref<1x32xf32, #tpu.memory_space<vmem>>, vector<1x32xf32>
    %191 = vector.broadcast %190 : vector<1x32xf32> to vector<256x32xf32>
    %192 = arith.addf %189, %191 : vector<256x32xf32>
    %cst_80 = arith.constant 0.000000e+00 : f32
    %193 = vector.broadcast %cst_80 : f32 to vector<256x32xf32>
    %194 = arith.cmpf ogt, %192, %193 : vector<256x32xf32>
    %cst_81 = arith.constant 1.000000e-01 : f32
    %195 = vector.broadcast %cst_81 : f32 to vector<256x32xf32>
    %196 = arith.mulf %195, %192 : vector<256x32xf32>
    %197 = arith.select %194, %192, %196 : vector<256x32xi1>, vector<256x32xf32>
    %198 = arith.truncf %197 : vector<256x32xf32> to vector<256x32xbf16>
    %c0_82 = arith.constant 0 : index
    %c0_83 = arith.constant 0 : index
    %199 = vector.load %arg17[%c0_82, %c0_83] : memref<32x3xbf16, #tpu.memory_space<vmem>>, vector<32x3xbf16>
    %cst_84 = arith.constant dense<0.000000e+00> : vector<256x3xf32>
    %200 = tpu.matmul %198, %199, %cst_84 {dimension_numbers = #tpu.dot_dimension_numbers<[1], [0], [0], [1], [0, 0, 1, 1], [], []>} : vector<256x32xbf16>, vector<32x3xbf16>, vector<256x3xf32> -> vector<256x3xf32>
    %c0_85 = arith.constant 0 : index
    %c0_86 = arith.constant 0 : index
    %201 = vector.load %arg18[%c0_85, %c0_86] : memref<1x3xf32, #tpu.memory_space<vmem>>, vector<1x3xf32>
    %202 = vector.broadcast %201 : vector<1x3xf32> to vector<256x3xf32>
    %203 = arith.addf %200, %202 : vector<256x3xf32>
    %c0_87 = arith.constant 0 : index
    %c0_88 = arith.constant 0 : index
    %c0_89 = arith.constant 0 : index
    %204 = vector.load %arg27[%c0_87, %c0_88, %c0_89] : memref<1x256x3xf32, #tpu.memory_space<vmem>>, vector<1x256x3xf32>
    %205 = vector.shape_cast %204 : vector<1x256x3xf32> to vector<256x3xf32>
    %206 = vector.shape_cast %203 : vector<256x3xf32> to vector<1x256x3xf32>
    tpu.vector_store %arg27[%c0_87, %c0_88, %c0_89], %206 {strides = array<i32>} : memref<1x256x3xf32, #tpu.memory_space<vmem>>, vector<1x256x3xf32>,
    return
  }
  func.func @transform_0(%arg0: i32) -> (i32, i32, i32) {
    %c0_i32 = arith.constant 0 : i32
    %c0_i32_0 = arith.constant 0 : i32
    %c0_i32_1 = arith.constant 0 : i32
    return %arg0, %c0_i32, %c0_i32_0 : i32, i32, i32
  }
  func.func @transform_1(%arg0: i32) -> (i32, i32) {
    %c0_i32 = arith.constant 0 : i32
    %c0_i32_0 = arith.constant 0 : i32
    %c0_i32_1 = arith.constant 0 : i32
    return %c0_i32, %c0_i32_0 : i32, i32
  }
  func.func @transform_2(%arg0: i32) -> (i32, i32) {
    %c0_i32 = arith.constant 0 : i32
    %c0_i32_0 = arith.constant 0 : i32
    %c0_i32_1 = arith.constant 0 : i32
    return %c0_i32, %c0_i32_0 : i32, i32
  }
  func.func @transform_3(%arg0: i32) -> (i32, i32) {
    %c0_i32 = arith.constant 0 : i32
    %c0_i32_0 = arith.constant 0 : i32
    %c0_i32_1 = arith.constant 0 : i32
    return %c0_i32, %c0_i32_0 : i32, i32
  }
  func.func @transform_4(%arg0: i32) -> (i32, i32) {
    %c0_i32 = arith.constant 0 : i32
    %c0_i32_0 = arith.constant 0 : i32
    %c0_i32_1 = arith.constant 0 : i32
    return %c0_i32, %c0_i32_0 : i32, i32
  }
  func.func @transform_5(%arg0: i32) -> (i32, i32, i32) {
    %c0_i32 = arith.constant 0 : i32
    %c0_i32_0 = arith.constant 0 : i32
    %c0_i32_1 = arith.constant 0 : i32
    return %arg0, %c0_i32, %c0_i32_0 : i32, i32, i32
  }
  func.func @transform_6(%arg0: i32) -> (i32, i32) {
    %c0_i32 = arith.constant 0 : i32
    %c0_i32_0 = arith.constant 0 : i32
    %c0_i32_1 = arith.constant 0 : i32
    return %c0_i32, %c0_i32_0 : i32, i32
  }
  func.func @transform_7(%arg0: i32) -> (i32, i32) {
    %c0_i32 = arith.constant 0 : i32
    %c0_i32_0 = arith.constant 0 : i32
    %c0_i32_1 = arith.constant 0 : i32
    return %c0_i32, %c0_i32_0 : i32, i32
  }
  func.func @transform_8(%arg0: i32) -> (i32, i32) {
    %c0_i32 = arith.constant 0 : i32
    %c0_i32_0 = arith.constant 0 : i32
    %c0_i32_1 = arith.constant 0 : i32
    return %c0_i32, %c0_i32_0 : i32, i32
  }
  func.func @transform_9(%arg0: i32) -> (i32, i32) {
    %c0_i32 = arith.constant 0 : i32
    %c0_i32_0 = arith.constant 0 : i32
    %c0_i32_1 = arith.constant 0 : i32
    return %c0_i32, %c0_i32_0 : i32, i32
  }
  func.func @transform_10(%arg0: i32) -> (i32, i32) {
    %c0_i32 = arith.constant 0 : i32
    %c0_i32_0 = arith.constant 0 : i32
    %c0_i32_1 = arith.constant 0 : i32
    return %c0_i32, %c0_i32_0 : i32, i32
  }
  func.func @transform_11(%arg0: i32) -> (i32, i32) {
    %c0_i32 = arith.constant 0 : i32
    %c0_i32_0 = arith.constant 0 : i32
    %c0_i32_1 = arith.constant 0 : i32
    return %c0_i32, %c0_i32_0 : i32, i32
  }
  func.func @transform_12(%arg0: i32) -> (i32, i32) {
    %c0_i32 = arith.constant 0 : i32
    %c0_i32_0 = arith.constant 0 : i32
    %c0_i32_1 = arith.constant 0 : i32
    return %c0_i32, %c0_i32_0 : i32, i32
  }
  func.func @transform_13(%arg0: i32) -> (i32, i32) {
    %c0_i32 = arith.constant 0 : i32
    %c0_i32_0 = arith.constant 0 : i32
    %c0_i32_1 = arith.constant 0 : i32
    return %c0_i32, %c0_i32_0 : i32, i32
  }
  func.func @transform_14(%arg0: i32) -> (i32, i32) {
    %c0_i32 = arith.constant 0 : i32
    %c0_i32_0 = arith.constant 0 : i32
    %c0_i32_1 = arith.constant 0 : i32
    return %c0_i32, %c0_i32_0 : i32, i32
  }
  func.func @transform_15(%arg0: i32) -> (i32, i32) {
    %c0_i32 = arith.constant 0 : i32
    %c0_i32_0 = arith.constant 0 : i32
    %c0_i32_1 = arith.constant 0 : i32
    return %c0_i32, %c0_i32_0 : i32, i32
  }
  func.func @transform_16(%arg0: i32) -> (i32, i32) {
    %c0_i32 = arith.constant 0 : i32
    %c0_i32_0 = arith.constant 0 : i32
    %c0_i32_1 = arith.constant 0 : i32
    return %c0_i32, %c0_i32_0 : i32, i32
  }
  func.func @transform_17(%arg0: i32) -> (i32, i32) {
    %c0_i32 = arith.constant 0 : i32
    %c0_i32_0 = arith.constant 0 : i32
    %c0_i32_1 = arith.constant 0 : i32
    return %c0_i32, %c0_i32_0 : i32, i32
  }
  func.func @transform_18(%arg0: i32) -> (i32, i32) {
    %c0_i32 = arith.constant 0 : i32
    %c0_i32_0 = arith.constant 0 : i32
    %c0_i32_1 = arith.constant 0 : i32
    return %c0_i32, %c0_i32_0 : i32, i32
  }
  func.func @transform_19(%arg0: i32) -> (i32, i32) {
    %c0_i32 = arith.constant 0 : i32
    %c0_i32_0 = arith.constant 0 : i32
    %c0_i32_1 = arith.constant 0 : i32
    return %c0_i32, %c0_i32_0 : i32, i32
  }
  func.func @transform_20(%arg0: i32) -> (i32, i32) {
    %c0_i32 = arith.constant 0 : i32
    %c0_i32_0 = arith.constant 0 : i32
    %c0_i32_1 = arith.constant 0 : i32
    return %c0_i32, %c0_i32_0 : i32, i32
  }
  func.func @transform_21(%arg0: i32) -> (i32, i32) {
    %c0_i32 = arith.constant 0 : i32
    %c0_i32_0 = arith.constant 0 : i32
    %c0_i32_1 = arith.constant 0 : i32
    return %c0_i32, %c0_i32_0 : i32, i32
  }
  func.func @transform_22(%arg0: i32) -> (i32, i32) {
    %c0_i32 = arith.constant 0 : i32
    %c0_i32_0 = arith.constant 0 : i32
    %c0_i32_1 = arith.constant 0 : i32
    return %c0_i32, %c0_i32_0 : i32, i32
  }
  func.func @transform_23(%arg0: i32) -> (i32, i32) {
    %c0_i32 = arith.constant 0 : i32
    %c0_i32_0 = arith.constant 0 : i32
    %c0_i32_1 = arith.constant 0 : i32
    return %c0_i32, %c0_i32_0 : i32, i32
  }
  func.func @transform_24(%arg0: i32) -> (i32, i32) {
    %c0_i32 = arith.constant 0 : i32
    %c0_i32_0 = arith.constant 0 : i32
    %c0_i32_1 = arith.constant 0 : i32
    return %c0_i32, %c0_i32_0 : i32, i32
  }
  func.func @transform_25(%arg0: i32) -> (i32, i32) {
    %c0_i32 = arith.constant 0 : i32
    %c0_i32_0 = arith.constant 0 : i32
    %c0_i32_1 = arith.constant 0 : i32
    return %c0_i32, %c0_i32_0 : i32, i32
  }
  func.func @transform_26(%arg0: i32) -> (i32, i32, i32) {
    %c0_i32 = arith.constant 0 : i32
    %c0_i32_0 = arith.constant 0 : i32
    %c0_i32_1 = arith.constant 0 : i32
    return %arg0, %c0_i32, %c0_i32_0 : i32, i32, i32
  }
}

</mosaic_0001>

<bundles_post_ra>
// kernel: tpu_custom_call.1
= control target key start
LH: loop header
LB: loop body
LE: loop exit
PB: predicated region body
PF: predicated region fallthrough
CT: control target
= control target key end

     0   :  { %s8346_s27 = smov 0   ;;  %s11123_s0 = inlined_call_operand.vmem [shape: f32[2,1,16], index: 0, kind: input, shape index: {}]   ;;  %s11124_s1 = inlined_call_operand.vmem [shape: bf16[16,32], index: 1, kind: input, shape index: {}]   ;;  %s11125_s2 = inlined_call_operand.vmem [shape: f32[1,32], index: 2, kind: input, shape index: {}]   ;;  %s11126_s3 = inlined_call_operand.vmem [shape: bf16[32,32], index: 3, kind: input, shape index: {}]   ;;  %s11127_s4 = inlined_call_operand.vmem [shape: f32[1,32], index: 4, kind: input, shape index: {}]   ;;  %s11128_s5 = inlined_call_operand.vmem [shape: bf16[2,256,4], index: 5, kind: input, shape index: {}]   ;;  %s11129_s6 = inlined_call_operand.vmem [shape: bf16[36,32], index: 6, kind: input, shape index: {}]   ;;  %s11130_s7 = inlined_call_operand.vmem [shape: f32[1,32], index: 7, kind: input, shape index: {}]   ;;  %s11131_s8 = inlined_call_operand.vmem [shape: bf16[64,256], index: 8, kind: input, shape index: {}]   ;;  %s11132_s9 = inlined_call_operand.vmem [shape: bf16[32,32], index: 9, kind: input, shape index: {}]   ;;  %s11133_s10 = inlined_call_operand.vmem [shape: f32[1,32], index: 10, kind: input, shape index: {}]   ;;  %s11134_s11 = inlined_call_operand.vmem [shape: bf16[32,32], index: 11, kind: input, shape index: {}]   ;;  %s11135_s12 = inlined_call_operand.vmem [shape: f32[1,32], index: 12, kind: input, shape index: {}]   ;;  %s11136_s13 = inlined_call_operand.vmem [shape: bf16[288,32], index: 13, kind: input, shape index: {}]   ;;  %s11137_s14 = inlined_call_operand.vmem [shape: f32[1,32], index: 14, kind: input, shape index: {}]   ;;  %s11138_s15 = inlined_call_operand.vmem [shape: bf16[256,64], index: 15, kind: input, shape index: {}]   ;;  %s11139_s16 = inlined_call_operand.vmem [shape: bf16[32,3], index: 16, kind: input, shape index: {}]   ;;  %s11140_s17 = inlined_call_operand.vmem [shape: f32[1,3], index: 17, kind: input, shape index: {}]   ;;  %s11141_s18 = inlined_call_operand.vmem [shape: bf16[288,32], index: 18, kind: input, shape index: {}]   ;;  %s11142_s19 = inlined_call_operand.vmem [shape: f32[1,32], index: 19, kind: input, shape index: {}]   ;;  %s11143_s20 = inlined_call_operand.vmem [shape: bf16[32,64], index: 20, kind: input, shape index: {}]   ;;  %s11144_s21 = inlined_call_operand.vmem [shape: f32[1,64], index: 21, kind: input, shape index: {}]   ;;  %s11145_s22 = inlined_call_operand.vmem [shape: bf16[32,64], index: 22, kind: input, shape index: {}]   ;;  %s11146_s23 = inlined_call_operand.vmem [shape: f32[1,64], index: 23, kind: input, shape index: {}]   ;;  %s11147_s24 = inlined_call_operand.vmem [shape: bf16[576,32], index: 24, kind: input, shape index: {}]   ;;  %s11148_s25 = inlined_call_operand.vmem [shape: f32[1,32], index: 25, kind: input, shape index: {}]   ;;  %s11149_s26 = inlined_call_operand.vmem [shape: f32[2,256,3], index: 26, kind: output, shape index: {}]  }
   0x1   :  { %11186 = sst [smem:[#allocation12_spill]] %s11123_s0 }
   0x2   :  { %11187 = sst [smem:[#allocation13_spill]] %s11124_s1 }
   0x3   :  { %11188 = sst [smem:[#allocation14_spill]] %s11125_s2 }
   0x4   :  { %11189 = sst [smem:[#allocation15_spill]] %s11126_s3 }
   0x5   :  { %11190 = sst [smem:[#allocation16_spill]] %s11127_s4 }
   0x6   :  { %11191 = sst [smem:[#allocation17_spill]] %s11128_s5 }
   0x7   :  { %11192 = sst [smem:[#allocation18_spill]] %s11129_s6 }
   0x8   :  { %11193 = sst [smem:[#allocation19_spill]] %s11130_s7 }
   0x9   :  { %11194 = sst [smem:[#allocation20_spill]] %s11131_s8 }
   0xa   :  { %11195 = sst [smem:[#allocation21_spill]] %s11132_s9 }
   0xb   :  { %11196 = sst [smem:[#allocation22_spill]] %s11133_s10 }
   0xc   :  { %11197 = sst [smem:[#allocation23_spill]] %s11134_s11 }
   0xd LB: > { %s6939_s3 = sadd.s32 4294967295, %s8196_s27   ;;  %p6943_p0 = scmp.ge.s32.totalorder %s8196_s27, 1  ;;  %s8196_s27 = sphi %s8346_s27, %s36_s27  }
   0xe   : > { %p720_p1 = scmp.lt.s32.totalorder %s8196_s27, 3 }
  0x10   : > { %p721_p2 = pnand %p6943_p0, %p720_p1 }
  0x12   : > { %724 = sbr.rel (%p721_p2) target bundleno = 2885 (0xb45), region = 124 }
  0x19   : > { %vm1196_vm0 = vcmask 1040384   ;;  %vm1197_vm1 = vsmask.f32 256  ;;  %v8198_v0 = vmov 0   ;;  %v11198_v2 = vmov 0  ;;  %p793_p3 = scmp.lt.s32.totalorder %s6939_s3, 1 }
  0x1a   : > { %v1046_v1 = vrot.slane %v8198_v0, 7  ;;  %vm8354_vm2 = vmand %vm1196_vm0, %vm1197_vm1  ;;  %vm1458_vm3 = vcmask 1046528   ;;  %vm1233_vm4 = vsmask.f32 7424  ;;  %s11202_s4 = sld [smem:[#allocation17_spill]]  ;;  %s11160_s0 = smov 8  }
  0x1b   : > { %v11199_v2 = vsel %vm8354_vm2, 4294967295, %v11198_v2  ;;  %s11248_s3 = smov (!%p793_p3, %s6939_s3), 1  ;;  %s8200_s9 = smov 4   ;;  %vm2102_vm5 = vcmask 1041408   ;;  %vm1780_vm6 = vcmask 31744   ;;  %vm1813_vm7 = vcmask 64512  }
  0x1c   : > { %11200 = vst [vmem:[#allocation2_spill] sm:$0xff] %v11199_v2  ;;  %v8360_v3 = vsel %vm8354_vm2, 0, %v1046_v1  ;;  %v1216_v4 = vsel %vm8354_vm2, %v1046_v1, 0  ;;  %s7302_s7 = sshll.u32 %s11248_s3, 7  ;;  %s11158_s30 = smov 12   ;;  %vm1846_vm8 = vcmask 97280  }
  0x1d   : > { %11201 = vst [vmem:[#allocation3_spill] sm:$0xff] %v8360_v3  ;;  %v1459_v5 = vrot.slane %v8360_v3, 1  ;;  %v1460_v6 = vrot.slane %v1216_v4, 1  ;;  %v1235_v7 = vshrl.u32 %v8360_v3, 16  ;;  %v1237_v8 = vshll.u32 %v8360_v3, 16  ;;  %s11203_s10 = sld [smem:[#allocation18_spill]] }
  0x1e   : > { %v1242_v9 = vshll.u32 %v1216_v4, 16  ;;  %s8202_s6 = smov 24   ;;  %s11154_s28 = smov 20   ;;  %vm818_vm9 = vcmask 130048   ;;  %vm1911_vm10 = vcmask 162816   ;;  %vm1944_vm11 = vcmask 195584  }
  0x1f   : > { %v8371_v10 = vsel %vm1458_vm3, %v1459_v5, %v1460_v6  ;;  %v1239_v11 = vrot.slane %v1237_v8, 1  ;;  %s11156_s8 = smov 16   ;;  %s11162_s2 = smov 32   ;;  %vm1977_vm12 = vcmask 228352   ;;  %vm883_vm13 = vcmask 261120  }
  0x20   : > { %s8376_s29 = scalar_lea.vmem %s11202_s4, %s7302_s7  ;;  %1556 = vrot.lane.b32.xlu1 %v8371_v10, %s11160_s0  ;;  %v1244_v12 = vrot.slane %v1242_v9, 1  ;;  %s8205_s4 = smov 28   ;;  %vm2069_vm14 = vcmask 293888   ;;  %vm8208_vm15 = vmmov 0  }
  0x21   : > { %v8058_v13 = vld [vmem:[%s8376_s29 + $0x8] sm:$0xff]   ;;  %v1240_v14 = vor.u32 %v1239_v11, %v1235_v7  ;;  %v8059_v15 = vld [vmem:[%s8376_s29] sm:$0xff]   ;;  %v8060_v21 = vld [vmem:[%s8376_s29 + $0x10] sm:$0xff]   ;;  %s11204_s1 = sld [smem:[#allocation13_spill]]  ;;  %s11211_s5 = sld [smem:[#allocation15_spill]] }
  0x22   : > { %v1058_v16 = vshrl.u32 %v8058_v13, 16  ;;  %v1061_v17 = vshll.u32 %v8058_v13, 16  ;;  %v1051_v19 = vshrl.u32 %v8059_v15, 16  ;;  %v1054_v20 = vshll.u32 %v8059_v15, 16  ;;  %v8061_v53 = vld [vmem:[%s8376_s29 + $0x18] sm:$0xff]   ;;  %v8062_v8 = vld [vmem:[%s8376_s29 + $0x20] sm:$0xff]  }
  0x23   : > { %v8383_v18 = vsel %vm1233_vm4, %v1240_v14, %v1244_v12  ;;  %v1065_v24 = vshrl.u32 %v8060_v21, 16  ;;  %v1068_v25 = vshll.u32 %v8060_v21, 16  ;;  %v8067_v42 = vld [vmem:[%s11203_s10] sm:$0xff]   ;;  %v8069_v54 = vld [vmem:[%s11203_s10 + $0x8] sm:$0xff]   ;;  %v1072_v62 = vshrl.u32 %v8061_v53, 16  ;;  %s11232_s11 = sld [smem:[#allocation23_spill]] }
  0x24   : > { %1524 = vrot.lane.b32.xlu0 %v8383_v18, %s8200_s9  ;;  %v1060_v22 = vrot.slane %v1058_v16, 7  ;;  %v1053_v23 = vrot.slane %v1051_v19, 7  ;;  %7730 = vmatprep.subr.bf16.mxu0 %v8067_v42  ;;  %v1075_v5 = vshll.u32 %v8061_v53, 16  ;;  %v1079_v13 = vshrl.u32 %v8062_v8, 16 }
  0x25   : > { %v1067_v28 = vrot.slane %v1065_v24, 7  ;;  %7731 = vmatpush3.bf16.msra.mxu0 %v8067_v42  ;;  %v1074_v4 = vrot.slane %v1072_v62, 7  ;;  %v8070_v16 = vld [vmem:[%s11203_s10 + $0x10] ss:$0 sps:$4 sm:$0x33]  }
  0x26   : > { %v1063_v26 = vor.u32 %v1061_v17, %v1060_v22  ;;  %v1056_v27 = vor.u32 %v1054_v20, %v1053_v23  ;;  %v1217_v29 = vsel %vm8354_vm2, %v1053_v23, 0  ;;  %v1218_v35 = vsel %vm8354_vm2, %v1060_v22, 0  ;;  %7732 = vmatprep.subr.bf16.mxu0 %v8069_v54 }
  0x27   : > { %v1070_v32 = vor.u32 %v1068_v25, %v1067_v28  ;;  %v1463_v34 = vrot.slane %v1217_v29, 1  ;;  %v1254_v39 = vshll.u32 %v1217_v29, 16  ;;  %v1466_v44 = vrot.slane %v1218_v35, 1  ;;  %v8063_v29 = vld [vmem:[%s8376_s29 + $0x28] sm:$0xff]  }
  0x28   : > { %v8392_v30 = vsel %vm8354_vm2, 0, %v1063_v26  ;;  %v8398_v31 = vsel %vm8354_vm2, 0, %v1056_v27  ;;  %v1266_v45 = vshll.u32 %v1218_v35, 16  ;;  %v1219_v52 = vsel %vm8354_vm2, %v1067_v28, 0 }
  0x29   : > { %1590 = vrot.lane.b32.xlu1 %v8392_v30, %s11158_s30  ;;  %1588 = vrot.lane.b32.xlu0 %v8398_v31, %s11158_s30  ;;  %v1462_v33 = vrot.slane %v8398_v31, 1  ;;  %v1249_v36 = vshll.u32 %v8398_v31, 16  ;;  %v8408_v37 = vsel %vm8354_vm2, 0, %v1070_v32  ;;  %v1247_v38 = vshrl.u32 %v8398_v31, 16 }
  0x2a   : > { %v1261_v40 = vshll.u32 %v8392_v30, 16  ;;  %v1465_v43 = vrot.slane %v8392_v30, 1  ;;  %v1259_v47 = vshrl.u32 %v8392_v30, 16  ;;  %v1273_v49 = vshll.u32 %v8408_v37, 16  ;;  %7733 = vmatpush3.bf16.msra.mxu0 %v8069_v54 }
  0x2b   : > { %v1251_v41 = vrot.slane %v1249_v36, 1  ;;  %v1464_v46 = vsel %vm1458_vm3, %v1462_v33, %v1463_v34  ;;  %v1256_v51 = vrot.slane %v1254_v39, 1  ;;  %v1268_v56 = vrot.slane %v1266_v45, 1  ;;  %8036 = vmatprep.subr.msk.bf16.mxu0 %vm2102_vm5, %v8070_v16  ;;  %v8064_v45 = vld [vmem:[%s8376_s29 + $0x30] sm:$0xff]  }
  0x2c   : > { %v1263_v48 = vrot.slane %v1261_v40, 1  ;;  %v1467_v55 = vsel %vm1458_vm3, %v1465_v43, %v1466_v44  ;;  %v1271_v58 = vshrl.u32 %v8408_v37, 16  ;;  %v1275_v59 = vrot.slane %v1273_v49, 1 }
  0x2d   : > { %1686 = vrot.lane.b32.xlu1 %v8408_v37, %s8202_s6  ;;  %1684 = vrot.lane.b32.xlu0 %v8392_v30, %s8202_s6  ;;  %v1252_v50 = vor.u32 %v1251_v41, %v1247_v38  ;;  %v1278_v60 = vshll.u32 %v1219_v52, 16  ;;  %v1077_v7 = vor.u32 %v1075_v5, %v1074_v4  ;;  %v1468_v9 = vrot.slane %v8408_v37, 1 }
  0x2e   : > { %v1264_v57 = vor.u32 %v1263_v48, %v1259_v47  ;;  %v1276_v0 = vor.u32 %v1275_v59, %v1271_v58  ;;  %v1469_v11 = vrot.slane %v1219_v52, 1  ;;  %v1220_v14 = vsel %vm8354_vm2, %v1074_v4, 0 }
  0x2f   : > { %v1257_v61 = vsel %vm1233_vm4, %v1252_v50, %v1256_v51  ;;  %v1280_v1 = vrot.slane %v1278_v60, 1  ;;  %v8446_v12 = vsel %vm8354_vm2, 0, %v1077_v7  ;;  %v1081_v19 = vrot.slane %v1079_v13, 7  ;;  %v8065_v60 = vld [vmem:[%s8376_s29 + $0x38] sm:$0xff]  }
  0x30   : > { %v1269_v63 = vsel %vm1233_vm4, %v1264_v57, %v1268_v56  ;;  %v1285_v15 = vshll.u32 %v8446_v12, 16  ;;  %v1470_v17 = vsel %vm1458_vm3, %v1468_v9, %v1469_v11  ;;  %v1082_v20 = vshll.u32 %v8062_v8, 16 }
  0x31   : > { %1558 = vrot.lane.b32.xlu1 %v1464_v46, %s11160_s0  ;;  %1652 = vrot.lane.b32.xlu0 %v1464_v46, %s11154_s28  ;;  %v1281_v6 = vsel %vm1233_vm4, %v1276_v0, %v1280_v1  ;;  %v1290_v21 = vshll.u32 %v1220_v14, 16  ;;  %v1283_v22 = vshrl.u32 %v8446_v12, 16  ;;  %v2104_v25 = vsel %vm2102_vm5, %v8070_v16, 0 }
  0x32   : > { %v1287_v23 = vrot.slane %v1285_v15, 1  ;;  %v1084_v24 = vor.u32 %v1082_v20, %v1081_v19  ;;  %7735 = vmatpush3.bf16.msra.mxu0 %v2104_v25  ;;  %v1472_v32 = vrot.slane %v1220_v14, 1  ;;  %v1471_v34 = vrot.slane %v8446_v12, 1  ;;  %v8066_v20 = vld [vmem:[%s8376_s29 + $0x40] sm:$0xff]  }
  0x33   : > { %v1292_v27 = vrot.slane %v1290_v21, 1  ;;  %v1221_v36 = vsel %vm8354_vm2, %v1081_v19, 0  ;;  %v1086_v38 = vshrl.u32 %v8063_v29, 16  ;;  %v1089_v44 = vshll.u32 %v8063_v29, 16 }
  0x34   : > { %v1288_v26 = vor.u32 %v1287_v23, %v1283_v22  ;;  %v8464_v28 = vsel %vm8354_vm2, 0, %v1084_v24  ;;  %v1473_v39 = vsel %vm1458_vm3, %v1471_v34, %v1472_v32  ;;  %v1302_v42 = vshll.u32 %v1221_v36, 16 }
  0x35   : > { %1654 = vrot.lane.b32.xlu1 %v1467_v55, %s11154_s28  ;;  %1526 = vrot.lane.b32.xlu0 %v1257_v61, %s8200_s9  ;;  %v1297_v35 = vshll.u32 %v8464_v28, 16  ;;  %v1295_v40 = vshrl.u32 %v8464_v28, 16  ;;  %v1088_v43 = vrot.slane %v1086_v38, 7  ;;  %v1474_v49 = vrot.slane %v8464_v28, 1 }
  0x36   : > { %v1293_v33 = vsel %vm1233_vm4, %v1288_v26, %v1292_v27  ;;  %v1304_v47 = vrot.slane %v1302_v42, 1  ;;  %v1475_v50 = vrot.slane %v1221_v36, 1  ;;  %v1093_v51 = vshrl.u32 %v8064_v45, 16 }
  0x37   : > { %v1299_v41 = vrot.slane %v1297_v35, 1  ;;  %v1091_v48 = vor.u32 %v1089_v44, %v1088_v43  ;;  %v1222_v54 = vsel %vm8354_vm2, %v1088_v43, 0  ;;  %v1096_v58 = vshll.u32 %v8064_v45, 16  ;;  %v8068_v43 = vld [vmem:[%s8376_s29 + $0x48] sm:$0xff]  }
  0x38   : > { %v1476_v56 = vsel %vm1458_vm3, %v1474_v49, %v1475_v50  ;;  %v1095_v57 = vrot.slane %v1093_v51, 7  ;;  %v1314_v59 = vshll.u32 %v1222_v54, 16  ;;  %v1100_v5 = vshrl.u32 %v8065_v60, 16 }
  0x39   : > { %1622 = vrot.lane.b32.xlu1 %v1269_v63, %s11156_s8  ;;  %1620 = vrot.lane.b32.xlu0 %v1257_v61, %s11156_s8  ;;  %v1300_v46 = vor.u32 %v1299_v41, %v1295_v40  ;;  %v8491_v53 = vsel %vm8354_vm2, 0, %v1091_v48  ;;  %v1103_v15 = vshll.u32 %v8065_v60, 16  ;;  %v1107_v24 = vshrl.u32 %v8066_v20, 16 }
  0x3a   : > { %v1307_v61 = vshrl.u32 %v8491_v53, 16  ;;  %v1316_v1 = vrot.slane %v1314_v59, 1  ;;  %v1223_v7 = vsel %vm8354_vm2, %v1095_v57, 0  ;;  %v1477_v9 = vrot.slane %v8491_v53, 1 }
  0x3b   : > { %v1305_v52 = vsel %vm1233_vm4, %v1300_v46, %v1304_v47  ;;  %v1102_v13 = vrot.slane %v1100_v5, 7  ;;  %v1326_v14 = vshll.u32 %v1223_v7, 16  ;;  %v1481_v26 = vrot.slane %v1223_v7, 1  ;;  %v8071_v5 = vld [vmem:[%s8376_s29 + $0x50] sm:$0xff]  }
  0x3c   : > { %v1110_v34 = vshll.u32 %v8066_v20, 16  ;;  %v1114_v51 = vshrl.u32 %v8068_v43, 16 }
  0x3d   : > { %1718 = vrot.lane.b32.xlu1 %v1281_v6, %s8205_s4  ;;  %1716 = vrot.lane.b32.xlu0 %v1269_v63, %s8205_s4  ;;  %v1105_v21 = vor.u32 %v1103_v15, %v1102_v13  ;;  %v1328_v23 = vrot.slane %v1326_v14, 1  ;;  %v1224_v29 = vsel %vm8354_vm2, %v1102_v13, 0  ;;  %v1121_v13 = vshrl.u32 %v8071_v5, 16 }
  0x3e   : > { %v1338_v40 = vshll.u32 %v1224_v29, 16  ;;  %v1484_v49 = vrot.slane %v1224_v29, 1  ;;  %v1116_v59 = vrot.slane %v1114_v51, 7 }
  0x3f   : > { %v8532_v27 = vsel %vm8354_vm2, 0, %v1105_v21  ;;  %v1123_v20 = vrot.slane %v1121_v13, 7  ;;  %v1124_v21 = vshll.u32 %v8071_v5, 16 }
  0x40   : > { %v1333_v35 = vshll.u32 %v8532_v27, 16  ;;  %v1340_v45 = vrot.slane %v1338_v40, 1  ;;  %v1483_v48 = vrot.slane %v8532_v27, 1 }
  0x41   : > { %1528 = vrot.lane.b32.xlu1 %v1269_v63, %s8200_s9  ;;  %1748 = vrot.lane.b32.xlu0 %v1467_v55, %s11162_s2  ;;  %v1098_v63 = vor.u32 %v1096_v58, %v1095_v57  ;;  %v1126_v29 = vor.u32 %v1124_v21, %v1123_v20 }
  0x42   : > { %v1335_v41 = vrot.slane %v1333_v35, 1  ;;  %v1485_v57 = vsel %vm1458_vm3, %v1483_v48, %v1484_v49 }
  0x43   : > { %v8509_v4 = vsel %vm8354_vm2, 0, %v1098_v63 }
  0x44   : > { %v1321_v11 = vshll.u32 %v8509_v4, 16  ;;  %v1480_v25 = vrot.slane %v8509_v4, 1 }
  0x45   : > { %1530 = vrot.lane.b32.xlu1 %v1281_v6, %s8200_s9  ;;  %1750 = vrot.lane.b32.xlu0 %v1470_v17, %s11162_s2 }
  0x46   : > { %v1323_v19 = vrot.slane %v1321_v11, 1  ;;  %v1482_v38 = vsel %vm1458_vm3, %v1480_v25, %v1481_v26 }
  0x49   : > { %1562 = vrot.lane.b32.xlu1 %v1470_v17, %s11160_s0  ;;  %1560 = vrot.lane.b32.xlu0 %v1467_v55, %s11160_s0  ;;  %v1309_v55 = vshll.u32 %v8491_v53, 16 }
  0x4b   : > { %v1311_v62 = vrot.slane %v1309_v55, 1 }
  0x4d   : > { %1594 = vrot.lane.b32.xlu1 %v8446_v12, %s11158_s30  ;;  %1592 = vrot.lane.b32.xlu0 %v8408_v37, %s11158_s30  ;;  %v1312_v0 = vor.u32 %v1311_v62, %v1307_v61 }
  0x4f   : > { %v1317_v8 = vsel %vm1233_vm4, %v1312_v0, %v1316_v1 }
  0x51   : > { %1626 = vrot.lane.b32.xlu1 %v1293_v33, %s11156_s8  ;;  %1624 = vrot.lane.b32.xlu0 %v1281_v6, %s11156_s8  ;;  %v1478_v6 = vrot.slane %v1222_v54, 1 }
  0x53   : > { %v1479_v16 = vsel %vm1458_vm3, %v1477_v9, %v1478_v6 }
  0x55   : > { %1658 = vrot.lane.b32.xlu1 %v1473_v39, %s11154_s28  ;;  %1656 = vrot.lane.b32.xlu0 %v1470_v17, %s11154_s28  ;;  %v1319_v17 = vshrl.u32 %v8509_v4, 16 }
  0x57   : > { %v1324_v22 = vor.u32 %v1323_v19, %v1319_v17  ;;  %v1226_v19 = vsel %vm8354_vm2, %v1116_v59, 0 }
  0x58   : > { %v1362_v25 = vshll.u32 %v1226_v19, 16 }
  0x59   : > { %1690 = vrot.lane.b32.xlu1 %v8464_v28, %s8202_s6  ;;  %1688 = vrot.lane.b32.xlu0 %v8446_v12, %s8202_s6  ;;  %v1329_v32 = vsel %vm1233_vm4, %v1324_v22, %v1328_v23 }
  0x5d   : > { %1722 = vrot.lane.b32.xlu1 %v1305_v52, %s8205_s4  ;;  %1720 = vrot.lane.b32.xlu0 %v1293_v33, %s8205_s4 }
  0x61   : > { %1532 = vrot.lane.b32.xlu1 %v1293_v33, %s8200_s9  ;;  %1752 = vrot.lane.b32.xlu0 %v1473_v39, %s11162_s2  ;;  %v1109_v33 = vrot.slane %v1107_v24, 7 }
  0x63   : > { %v1112_v36 = vor.u32 %v1110_v34, %v1109_v33  ;;  %v1225_v46 = vsel %vm8354_vm2, %v1109_v33, 0 }
  0x64   : > { %v1350_v50 = vshll.u32 %v1225_v46, 16  ;;  %v1487_v9 = vrot.slane %v1225_v46, 1 }
  0x65   : > { %1534 = vrot.lane.b32.xlu1 %v1305_v52, %s8200_s9  ;;  %1754 = vrot.lane.b32.xlu0 %v1476_v56, %s11162_s2  ;;  %v8550_v42 = vsel %vm8354_vm2, 0, %v1112_v36 }
  0x66   : > { %v1345_v47 = vshll.u32 %v8550_v42, 16  ;;  %v1343_v55 = vshrl.u32 %v8550_v42, 16  ;;  %v1352_v58 = vrot.slane %v1350_v50, 1 }
  0x69   : > { %1566 = vrot.lane.b32.xlu1 %v1476_v56, %s11160_s0  ;;  %1564 = vrot.lane.b32.xlu0 %v1473_v39, %s11160_s0  ;;  %v1331_v39 = vshrl.u32 %v8532_v27, 16 }
  0x6b   : > { %v1336_v44 = vor.u32 %v1335_v41, %v1331_v39  ;;  %v8612_v41 = vsel %vm8354_vm2, 0, %v1126_v29 }
  0x6c   : > { %v1369_v50 = vshll.u32 %v8612_v41, 16 }
  0x6d   : > { %1598 = vrot.lane.b32.xlu1 %v8491_v53, %s11158_s30  ;;  %1596 = vrot.lane.b32.xlu0 %v8464_v28, %s11158_s30  ;;  %v1341_v54 = vsel %vm1233_vm4, %v1336_v44, %v1340_v45 }
  0x71   : > { %1630 = vrot.lane.b32.xlu1 %v1317_v8, %s11156_s8  ;;  %1628 = vrot.lane.b32.xlu0 %v1305_v52, %s11156_s8  ;;  %v1117_v52 = vshll.u32 %v8068_v43, 16 }
  0x73   : > { %v1119_v1 = vor.u32 %v1117_v52, %v1116_v59 }
  0x75   : > { %1662 = vrot.lane.b32.xlu1 %v1479_v16, %s11154_s28  ;;  %1660 = vrot.lane.b32.xlu0 %v1476_v56, %s11154_s28  ;;  %v1347_v56 = vrot.slane %v1345_v47, 1  ;;  %v8586_v11 = vsel %vm8354_vm2, 0, %v1119_v1  ;;  %v1490_v47 = vrot.slane %v1226_v19, 1 }
  0x76   : > { %v1357_v15 = vshll.u32 %v8586_v11, 16  ;;  %v1355_v23 = vshrl.u32 %v8586_v11, 16  ;;  %v1489_v46 = vrot.slane %v8586_v11, 1 }
  0x77   : > { %v1348_v62 = vor.u32 %v1347_v56, %v1343_v55  ;;  %v8072_v55 = vld [vmem:[%s8376_s29 + $0x58] sm:$0xff]  }
  0x78   : > { %v1359_v24 = vrot.slane %v1357_v15, 1  ;;  %v1128_v1 = vshrl.u32 %v8072_v55, 16 }
  0x79   : > { %1694 = vrot.lane.b32.xlu1 %v8509_v4, %s8202_s6  ;;  %1692 = vrot.lane.b32.xlu0 %v8491_v53, %s8202_s6  ;;  %v8575_v63 = vsel %vm1233_vm4, %v1348_v62, %v1352_v58  ;;  %v8637_v58 = vsel %vm1458_vm3, %v1489_v46, %v1490_v47 }
  0x7a   : > { %v1360_v36 = vor.u32 %v1359_v24, %v1355_v23  ;;  %v1130_v15 = vrot.slane %v1128_v1, 7  ;;  %v8073_v24 = vld [vmem:[%s8376_s29 + $0x60] sm:$0xff]  }
  0x7b   : > { %v1138_v46 = vshll.u32 %v8073_v24, 16 }
  0x7d   : > { %1726 = vrot.lane.b32.xlu1 %v1329_v32, %s8205_s4  ;;  %1724 = vrot.lane.b32.xlu0 %v1317_v8, %s8205_s4 }
  0x81   : > { %1536 = vrot.lane.b32.xlu1 %v1317_v8, %s8200_s9  ;;  %1756 = vrot.lane.b32.xlu0 %v1479_v16, %s11162_s2  ;;  %v1486_v8 = vrot.slane %v8550_v42, 1 }
  0x83   : > { %v8592_v17 = vsel %vm1458_vm3, %v1486_v8, %v1487_v9 }
  0x85   : > { %1538 = vrot.lane.b32.xlu1 %v1329_v32, %s8200_s9  ;;  %1758 = vrot.lane.b32.xlu0 %v1482_v38, %s11162_s2 }
  0x89   : > { %1570 = vrot.lane.b32.xlu1 %v1482_v38, %s11160_s0  ;;  %1568 = vrot.lane.b32.xlu0 %v1479_v16, %s11160_s0 }
  0x8d   : > { %1602 = vrot.lane.b32.xlu1 %v8532_v27, %s11158_s30  ;;  %1600 = vrot.lane.b32.xlu0 %v8509_v4, %s11158_s30 }
  0x91   : > { %1634 = vrot.lane.b32.xlu1 %v1341_v54, %s11156_s8  ;;  %1632 = vrot.lane.b32.xlu0 %v1329_v32, %s11156_s8 }
  0x92   : > { %v1557_v60 = vpop.permute.xlu1 %1556 }
  0x95   : > { %1666 = vrot.lane.b32.xlu1 %v1485_v57, %s11154_s28  ;;  %1664 = vrot.lane.b32.xlu0 %v1482_v38, %s11154_s28  ;;  %v1364_v38 = vrot.slane %v1362_v25, 1  ;;  %v11164_v25 = vmov 0.0  }
  0x96   : > { %v1525_v61 = vpop.permute.xlu0 %1524  ;;  %7716 = vmatprep.subr.bf16.mxu1 %v11164_v25  ;;  %7718 = vmatprep.mubr.msk.bf16.mxu1 %vm8208_vm15, %v11164_v25 }
  0x97   : > { %v1782_v32 = vsel %vm1780_vm6, %v8360_v3, %v1525_v61  ;;  %v8624_v49 = vsel %vm1233_vm4, %v1360_v36, %v1364_v38  ;;  %v1371_v61 = vrot.slane %v1369_v50, 1  ;;  %v1135_v38 = vshrl.u32 %v8073_v24, 16 }
  0x98   : > { %v1815_v39 = vsel %vm1813_vm7, %v1782_v32, %v1557_v60  ;;  %v1367_v60 = vshrl.u32 %v8612_v41, 16 }
  0x99   : > { %1698 = vrot.lane.b32.xlu1 %v8550_v42, %s8202_s6  ;;  %1696 = vrot.lane.b32.xlu0 %v8532_v27, %s8202_s6 }
  0x9a   : > { %v1372_v9 = vor.u32 %v1371_v61, %v1367_v60 }
  0x9b   : > { %v1591_v0 = vpop.permute.xlu1 %1590  ;;  %v1589_v6 = vpop.permute.xlu0 %1588 }
  0x9d   : > { %1730 = vrot.lane.b32.xlu1 %v8575_v63, %s8205_s4  ;;  %1728 = vrot.lane.b32.xlu0 %v1341_v54, %s8205_s4 }
  0x9f   : > { %v8581_v7 = vpop.permute.xlu1 %1686  ;;  %v1685_v14 = vpop.permute.xlu0 %1684 }
  0xa1   : > { %1540 = vrot.lane.b32.xlu1 %v1341_v54, %s8200_s9  ;;  %1760 = vrot.lane.b32.xlu0 %v1485_v57, %s11162_s2  ;;  %v8630_v54 = vsel %vm8354_vm2, %v1123_v20, 0 }
  0xa2   : > { %v1374_v62 = vshll.u32 %v8630_v54, 16 }
  0xa3   : > { %v1559_v16 = vpop.permute.xlu1 %1558  ;;  %v1653_v22 = vpop.permute.xlu0 %1652 }
  0xa4   : > { %v1376_v13 = vrot.slane %v1374_v62, 1 }
  0xa5   : > { %1542 = vrot.lane.b32.xlu1 %v8575_v63, %s8200_s9  ;;  %1762 = vrot.lane.b32.xlu0 %v8592_v17, %s11162_s2 }
  0xa6   : > { %v8668_v21 = vsel %vm1233_vm4, %v1372_v9, %v1376_v13  ;;  %v8074_v9 = vld [vmem:[%s8376_s29 + $0x68] sm:$0xff]  }
  0xa7   : > { %v1655_v26 = vpop.permute.xlu1 %1654  ;;  %v1527_v33 = vpop.permute.xlu0 %1526 }
  0xa8   : > { %v1784_v34 = vsel %vm1780_vm6, %v8398_v31, %v1527_v33  ;;  %v1848_v31 = vsel %vm1846_vm8, %v1815_v39, %v1589_v6 }
  0xa9   : > { %1574 = vrot.lane.b32.xlu1 %v8592_v17, %s11160_s0  ;;  %v1817_v35 = vsel %vm1813_vm7, %v1784_v34, %v1559_v16  ;;  %1572 = vrot.lane.b32.xlu0 %v1485_v57, %s11160_s0  ;;  %v1131_v16 = vshll.u32 %v8072_v55, 16  ;;  %v1492_v34 = vrot.slane %v8612_v41, 1 }
  0xaa   : > { %v1850_v43 = vsel %vm1846_vm8, %v1817_v35, %v1591_v0  ;;  %v1493_v35 = vrot.slane %v8630_v54, 1 }
  0xab   : > { %v1623_v40 = vpop.permute.xlu1 %1622  ;;  %v1621_v44 = vpop.permute.xlu0 %1620  ;;  %v1133_v23 = vor.u32 %v1131_v16, %v1130_v15 }
  0xac   : > { %v1880_v45 = vsel %vm818_vm9, %v1848_v31, %v1621_v44  ;;  %v1882_v51 = vsel %vm818_vm9, %v1850_v43, %v1623_v40  ;;  %v1494_v43 = vsel %vm1458_vm3, %v1492_v34, %v1493_v35  ;;  %v1228_v44 = vsel %vm8354_vm2, %v1130_v15, 0 }
  0xad   : > { %1606 = vrot.lane.b32.xlu1 %v8586_v11, %s11158_s30  ;;  %v1913_v48 = vsel %vm1911_vm10, %v1880_v45, %v1653_v22  ;;  %1604 = vrot.lane.b32.xlu0 %v8550_v42, %s11158_s30  ;;  %v1915_v59 = vsel %vm1911_vm10, %v1882_v51, %v1655_v26  ;;  %s11205_s30 = sld [smem:[#allocation12_spill]]  ;;  %v8689_v36 = vsel %vm8354_vm2, 0, %v1133_v23  ;;  %v1137_v45 = vrot.slane %v1135_v38, 7 }
  0xae   : > { %v1946_v57 = vsel %vm1944_vm11, %v1913_v48, %v1685_v14  ;;  %v1948_v8 = vsel %vm1944_vm11, %v1915_v59, %v8581_v7  ;;  %v1381_v40 = vshll.u32 %v8689_v36, 16  ;;  %v1379_v48 = vshrl.u32 %v8689_v36, 16 }
  0xaf   : > { %v1719_v52 = vpop.permute.xlu1 %1718  ;;  %v1717_v56 = vpop.permute.xlu0 %1716  ;;  %v1386_v50 = vshll.u32 %v1228_v44, 16  ;;  %v1495_v61 = vrot.slane %v8689_v36, 1  ;;  %v1496_v62 = vrot.slane %v1228_v44, 1  ;;  %v1145_v44 = vshll.u32 %v8074_v9, 16 }
  0xb0   : > { %v1979_v5 = vsel %vm1977_vm12, %v1946_v57, %v1717_v56  ;;  %v1981_v7 = vsel %vm1977_vm12, %v1948_v8, %v1719_v52  ;;  %v1140_v52 = vor.u32 %v1138_v46, %v1137_v45 }
  0xb1   : > { %1638 = vrot.lane.b32.xlu1 %v8624_v49, %s11156_s8  ;;  %1636 = vrot.lane.b32.xlu0 %v8575_v63, %s11156_s8  ;;  %v1388_v56 = vrot.slane %v1386_v50, 1  ;;  %s11209_s8 = smov 20  }
  0xb2   : > { %v8711_v59 = vsel %vm8354_vm2, 0, %v1140_v52 }
  0xb3   : > { %v8644_v0 = vpop.permute.xlu1 %1528  ;;  %v1749_v6 = vpop.permute.xlu0 %1748  ;;  %s795_s0 = scalar_lea.vmem %s11205_s30, %s11248_s3  ;;  %s11207_s30 = smov 12   ;;  %v1498_v52 = vrot.slane %v8711_v59, 1 }
  0xb4   : > { %v2011_v63 = vsel %vm883_vm13, %v1979_v5, %v1749_v6  ;;  %v807_v26 = vld [vmem:[%s795_s0] sm:$0x1]  ;;  %s11206_s0 = smov 8   ;;  %v1786_v1 = vsel %vm1780_vm6, %v8392_v30, %v8644_v0  ;;  %v1393_v5 = vshll.u32 %v8711_v59, 16  ;;  %v1497_v30 = vsel %vm1458_vm3, %v1495_v61, %v1496_v62 }
  0xb5   : > { %1670 = vrot.lane.b32.xlu1 %v8637_v58, %s11154_s28  ;;  %1668 = vrot.lane.b32.xlu0 %v8592_v17, %s11154_s28  ;;  %v8077_v17 = vld [vmem:[%s11204_s1] sm:$0xff]   ;;  %v808_v32 = vpack.c.bf16 %v807_v26, %v807_v26  ;;  %s11208_s28 = smov 16   ;;  %v1391_v0 = vshrl.u32 %v8711_v59, 16  ;;  %s11227_s1 = smov 32  }
  0xb6   : > { %7736 = vmatprep.mubr.msk.bf16.mxu0 %vm2069_vm14, %v2011_v63  ;;  %7717 = vmatpush3.bf16.msra.mxu1 %v8077_v17  ;;  %v1229_v63 = vsel %vm8354_vm2, %v1137_v45, 0 }
  0xb7   : > { %v8655_v14 = vpop.permute.xlu1 %1530  ;;  %v1751_v19 = vpop.permute.xlu0 %1750  ;;  %7722 = vmatprep.subr.bf16.mxu1 %v11164_v25  ;;  %v1398_v17 = vshll.u32 %v1229_v63, 16 }
  0xb8   : > { %v2013_v20 = vsel %vm883_vm13, %v1981_v7, %v1751_v19  ;;  %v1788_v7 = vsel %vm1780_vm6, %v8408_v37, %v8655_v14 }
  0xb9   : > { %1702 = vrot.lane.b32.xlu1 %v8612_v41, %s8202_s6  ;;  %1700 = vrot.lane.b32.xlu0 %v8586_v11, %s8202_s6  ;;  %v1400_v38 = vrot.slane %v1398_v17, 1 }
  0xba   : > { %7737 = vmatmul.mubr.msk.bf16.vlgmr.msra.gmra.mrb[0].mxu0 %vm2069_vm14, %v2013_v20  ;;  %7719 = vmatmul.mubr.msk.bf16.vlgmr.msra.gmra.mrb[0].mxu1 %vm818_vm9, %v808_v32  ;;  %v1395_v20 = vrot.slane %v1393_v5, 1 }
  0xbb   : > { %v8674_v22 = vpop.permute.xlu1 %1562  ;;  %v1561_v29 = vpop.permute.xlu0 %1560  ;;  %7726 = vmatprep.mubr.msk.bf16.mxu1 %vm8208_vm15, %v11164_v25 }
  0xbc   : > { %v1819_v6 = vsel %vm1813_vm7, %v1786_v1, %v1561_v29  ;;  %v1821_v23 = vsel %vm1813_vm7, %v1788_v7, %v8674_v22  ;;  %v1142_v29 = vshrl.u32 %v8074_v9, 16  ;;  %v1396_v22 = vor.u32 %v1395_v20, %v1391_v0 }
  0xbd   : > { %1734 = vrot.lane.b32.xlu1 %v8668_v21, %s8205_s4  ;;  %1732 = vrot.lane.b32.xlu0 %v8624_v49, %s8205_s4 }
  0xbf   : > { %v1595_v33 = vpop.permute.xlu1 %1594  ;;  %v1593_v39 = vpop.permute.xlu0 %1592 }
  0xc0   : > { %v1852_v13 = vsel %vm1846_vm8, %v1819_v6, %v1593_v39  ;;  %v1854_v32 = vsel %vm1846_vm8, %v1821_v23, %v1595_v33 }
  0xc1   : > { %1544 = vrot.lane.b32.xlu1 %v8624_v49, %s8200_s9  ;;  %1764 = vrot.lane.b32.xlu0 %v8637_v58, %s11162_s2  ;;  %v1383_v49 = vrot.slane %v1381_v40, 1  ;;  %v1144_v40 = vrot.slane %v1142_v29, 7 }
  0xc3   : > { %v1627_v31 = vpop.permute.xlu1 %1626  ;;  %v1625_v47 = vpop.permute.xlu0 %1624  ;;  %v1384_v55 = vor.u32 %v1383_v49, %v1379_v48  ;;  %v1147_v48 = vor.u32 %v1145_v44, %v1144_v40  ;;  %v8075_v49 = vld [vmem:[%s8376_s29 + $0x70] sm:$0xff]   ;;  %v1230_v1 = vsel %vm8354_vm2, %v1144_v40, 0 }
  0xc4   : > { %v1884_v16 = vsel %vm818_vm9, %v1852_v13, %v1625_v47  ;;  %v1886_v14 = vsel %vm818_vm9, %v1854_v32, %v1627_v31  ;;  %v1152_v6 = vshll.u32 %v8075_v49, 16  ;;  %v1410_v9 = vshll.u32 %v1230_v1, 16 }
  0xc5   : > { %1546 = vrot.lane.b32.xlu1 %v8668_v21, %s8200_s9  ;;  %1766 = vrot.lane.b32.xlu0 %v1494_v43, %s11162_s2 }
  0xc6   : > { %v1412_v7 = vrot.slane %v1410_v9, 1 }
  0xc7   : > { %v1659_v51 = vpop.permute.xlu1 %1658  ;;  %v1657_v54 = vpop.permute.xlu0 %1656 }
  0xc8   : > { %v1917_v19 = vsel %vm1911_vm10, %v1884_v16, %v1657_v54  ;;  %v1499_v54 = vrot.slane %v1229_v63, 1 }
  0xc9   : > { %1578 = vrot.lane.b32.xlu1 %v1494_v43, %s11206_s0  ;;  %1576 = vrot.lane.b32.xlu0 %v8637_v58, %s11206_s0  ;;  %v1389_v58 = vsel %vm1233_vm4, %v1384_v55, %v1388_v56  ;;  %v8768_v55 = vsel %vm8354_vm2, 0, %v1147_v48  ;;  %v1149_v56 = vshrl.u32 %v8075_v49, 16 }
  0xca   : > { %v1500_v62 = vsel %vm1458_vm3, %v1498_v52, %v1499_v54  ;;  %v1403_v63 = vshrl.u32 %v8768_v55, 16  ;;  %v1501_v23 = vrot.slane %v8768_v55, 1 }
  0xcb   : > { %v1691_v57 = vpop.permute.xlu1 %1690  ;;  %v1689_v60 = vpop.permute.xlu0 %1688  ;;  %v1151_v5 = vrot.slane %v1149_v56, 7 }
  0xcc   : > { %v1950_v24 = vsel %vm1944_vm11, %v1917_v19, %v1689_v60  ;;  %v1405_v60 = vshll.u32 %v8768_v55, 16 }
  0xcd   : > { %1610 = vrot.lane.b32.xlu1 %v8689_v36, %s11207_s30  ;;  %1608 = vrot.lane.b32.xlu0 %v8612_v41, %s11207_s30 }
  0xcf   : > { %v1723_v8 = vpop.permute.xlu1 %1722  ;;  %v1721_v15 = vpop.permute.xlu0 %1720 }
  0xd0   : > { %v1983_v34 = vsel %vm1977_vm12, %v1950_v24, %v1721_v15  ;;  %v1154_v15 = vor.u32 %v1152_v6, %v1151_v5  ;;  %v1502_v24 = vrot.slane %v1230_v1, 1 }
  0xd1   : > { %1642 = vrot.lane.b32.xlu1 %v1389_v58, %s11208_s28  ;;  %1640 = vrot.lane.b32.xlu0 %v8668_v21, %s11208_s28  ;;  %v1919_v21 = vsel %vm1911_vm10, %v1886_v14, %v1659_v51  ;;  %v1231_v14 = vsel %vm8354_vm2, %v1151_v5, 0 }
  0xd2   : > { %v1952_v33 = vsel %vm1944_vm11, %v1919_v21, %v1691_v57  ;;  %v8783_v20 = vsel %vm8354_vm2, 0, %v1154_v15  ;;  %v1505_v15 = vrot.slane %v1231_v14, 1 }
  0xd3   : > { %v8741_v26 = vpop.permute.xlu1 %1532  ;;  %v1753_v37 = vpop.permute.xlu0 %1752  ;;  %v1985_v31 = vsel %vm1977_vm12, %v1952_v33, %v1723_v8  ;;  %v1417_v32 = vshll.u32 %v8783_v20, 16 }
  0xd4   : > { %v2015_v35 = vsel %vm883_vm13, %v1983_v34, %v1753_v37  ;;  %v1790_v29 = vsel %vm1780_vm6, %v8446_v12, %v8741_v26  ;;  %v1503_v12 = vsel %vm1458_vm3, %v1501_v23, %v1502_v24  ;;  %v1415_v26 = vshrl.u32 %v8783_v20, 16 }
  0xd5   : > { %1674 = vrot.lane.b32.xlu1 %v1497_v30, %s11209_s8  ;;  %1672 = vrot.lane.b32.xlu0 %v1494_v43, %s11209_s8  ;;  %v1401_v43 = vsel %vm1233_vm4, %v1396_v22, %v1400_v38  ;;  %v1419_v44 = vrot.slane %v1417_v32, 1 }
  0xd6   : > { %7740 = vmatprep.mubr.msk.bf16.mxu0 %vm2069_vm14, %v2015_v35  ;;  %v8076_v35 = vld [vmem:[%s8376_s29 + $0x78] sm:$0xff]   ;;  %s11172_s29 = smov 64  }
  0xd7   : > { %v8752_v39 = vpop.permute.xlu1 %1534  ;;  %v1755_v45 = vpop.permute.xlu0 %1754  ;;  %v1156_v49 = vshrl.u32 %v8076_v35, 16  ;;  %v1159_v1 = vshll.u32 %v8076_v35, 16 }
  0xd8   : > { %v2017_v46 = vsel %vm883_vm13, %v1985_v31, %v1755_v45  ;;  %v1792_v33 = vsel %vm1780_vm6, %v8464_v28, %v8752_v39  ;;  %v1422_v31 = vshll.u32 %v1231_v14, 16 }
  0xd9   : > { %1706 = vrot.lane.b32.xlu1 %v8711_v59, %s8202_s6  ;;  %1704 = vrot.lane.b32.xlu0 %v8689_v36, %s8202_s6 }
  0xda   : > { %7741 = vmatmul.mubr.msk.bf16.gmra.mrb[4].mxu0 %vm2069_vm14, %v2017_v46 }
  0xdb   : > { %v1567_v47 = vpop.permute.xlu1 %1566  ;;  %v1565_v50 = vpop.permute.xlu0 %1564 }
  0xdc   : > { %v1823_v34 = vsel %vm1813_vm7, %v1790_v29, %v1565_v50  ;;  %v1825_v45 = vsel %vm1813_vm7, %v1792_v33, %v1567_v47  ;;  %v1424_v47 = vrot.slane %v1422_v31, 1 }
  0xdd   : > { %1738 = vrot.lane.b32.xlu1 %v1401_v43, %s8205_s4  ;;  %1736 = vrot.lane.b32.xlu0 %v1389_v58, %s8205_s4 }
  0xdf   : > { %v1599_v51 = vpop.permute.xlu1 %1598  ;;  %v1597_v57 = vpop.permute.xlu0 %1596 }
  0xe0   : > { %v1856_v21 = vsel %vm1846_vm8, %v1823_v34, %v1597_v57  ;;  %v1858_v50 = vsel %vm1846_vm8, %v1825_v45, %v1599_v51 }
  0xe1   : > { %1548 = vrot.lane.b32.xlu1 %v1389_v58, %s8200_s9  ;;  %1768 = vrot.lane.b32.xlu0 %v1497_v30, %s11162_s2  ;;  %v1407_v58 = vrot.slane %v1405_v60, 1  ;;  %v1158_v60 = vrot.slane %v1156_v49, 7 }
  0xe3   : > { %v1631_v61 = vpop.permute.xlu1 %1630  ;;  %v1629_v8 = vpop.permute.xlu0 %1628  ;;  %v1408_v0 = vor.u32 %v1407_v58, %v1403_v63  ;;  %v1161_v63 = vor.u32 %v1159_v1, %v1158_v60  ;;  %v1232_v23 = vsel %vm8354_vm2, %v1158_v60, 0 }
  0xe4   : > { %v1888_v38 = vsel %vm818_vm9, %v1856_v21, %v1629_v8  ;;  %v1890_v56 = vsel %vm818_vm9, %v1858_v50, %v1631_v61  ;;  %v1515_v34 = vshll.u32 %v1232_v23, 16 }
  0xe5   : > { %1550 = vrot.lane.b32.xlu1 %v1401_v43, %s8200_s9  ;;  %1770 = vrot.lane.b32.xlu0 %v1500_v62, %s11162_s2 }
  0xe6   : > { %v1517_v35 = vrot.slane %v1515_v34, 1 }
  0xe7   : > { %v1663_v13 = vpop.permute.xlu1 %1662  ;;  %v1661_v16 = vpop.permute.xlu0 %1660 }
  0xe8   : > { %v1921_v40 = vsel %vm1911_vm10, %v1888_v38, %v1661_v16  ;;  %v1923_v39 = vsel %vm1911_vm10, %v1890_v56, %v1663_v13  ;;  %v1504_v13 = vrot.slane %v8783_v20, 1  ;;  %v1215_v16 = vsel %vm8354_vm2, 0, %v1161_v63 }
  0xe9   : > { %1582 = vrot.lane.b32.xlu1 %v1500_v62, %s11206_s0  ;;  %1580 = vrot.lane.b32.xlu0 %v1497_v30, %s11206_s0  ;;  %v1413_v30 = vsel %vm1233_vm4, %v1408_v0, %v1412_v7  ;;  %v1510_v7 = vshll.u32 %v1215_v16, 16  ;;  %v1508_v29 = vshrl.u32 %v1215_v16, 16  ;;  %v1521_v33 = vrot.slane %v1215_v16, 1 }
  0xeb   : > { %v1695_v19 = vpop.permute.xlu1 %1694  ;;  %v1693_v17 = vpop.permute.xlu0 %1692  ;;  %v1512_v32 = vrot.slane %v1510_v7, 1 }
  0xec   : > { %v1954_v46 = vsel %vm1944_vm11, %v1921_v40, %v1693_v17  ;;  %v1956_v57 = vsel %vm1944_vm11, %v1923_v39, %v1695_v19  ;;  %v1506_v17 = vsel %vm1458_vm3, %v1504_v13, %v1505_v15  ;;  %v1522_v40 = vrot.slane %v1232_v23, 1 }
  0xed   : > { %1614 = vrot.lane.b32.xlu1 %v8768_v55, %s11207_s30  ;;  %1612 = vrot.lane.b32.xlu0 %v8711_v59, %s11207_s30 }
  0xee   : > { %v1523_v49 = vsel %vm1458_vm3, %v1521_v33, %v1522_v40 }
  0xef   : > { %v1727_v37 = vpop.permute.xlu1 %1726  ;;  %v1725_v22 = vpop.permute.xlu0 %1724 }
  0xf0   : > { %v1987_v52 = vsel %vm1977_vm12, %v1954_v46, %v1725_v22  ;;  %v1989_v5 = vsel %vm1977_vm12, %v1956_v57, %v1727_v37 }
  0xf1   : > { %1646 = vrot.lane.b32.xlu1 %v1413_v30, %s11208_s28  ;;  %1644 = vrot.lane.b32.xlu0 %v1401_v43, %s11208_s28  ;;  %v1420_v43 = vor.u32 %v1419_v44, %v1415_v26 }
  0xf3   : > { %v1537_v48 = vpop.permute.xlu1 %1536  ;;  %v1757_v54 = vpop.permute.xlu0 %1756 }
  0xf4   : > { %v2019_v28 = vsel %vm883_vm13, %v1987_v52, %v1757_v54  ;;  %v1794_v38 = vsel %vm1780_vm6, %v8491_v53, %v1537_v48 }
  0xf5   : > { %1678 = vrot.lane.b32.xlu1 %v1503_v12, %s11209_s8  ;;  %1676 = vrot.lane.b32.xlu0 %v1500_v62, %s11209_s8  ;;  %v1425_v62 = vsel %vm1233_vm4, %v1420_v43, %v1424_v47 }
  0xf6   : > { %7744 = vmatprep.mubr.msk.bf16.mxu0 %vm2069_vm14, %v2019_v28 }
  0xf7   : > { %v1539_v51 = vpop.permute.xlu1 %1538  ;;  %v1759_v61 = vpop.permute.xlu0 %1758 }
  0xf8   : > { %v2021_v6 = vsel %vm883_vm13, %v1989_v5, %v1759_v61  ;;  %v1796_v53 = vsel %vm1780_vm6, %v8509_v4, %v1539_v51 }
  0xf9   : > { %1710 = vrot.lane.b32.xlu1 %v8783_v20, %s8202_s6  ;;  %1708 = vrot.lane.b32.xlu0 %v8768_v55, %s8202_s6 }
  0xfa   : > { %7745 = vmatmul.mubr.msk.bf16.gmra.mrb[8].mxu0 %vm2069_vm14, %v2021_v6 }
  0xfb   : > { %v1571_v8 = vpop.permute.xlu1 %1570  ;;  %v1569_v58 = vpop.permute.xlu0 %1568 }
  0xfc   : > { %v1827_v44 = vsel %vm1813_vm7, %v1794_v38, %v1569_v58  ;;  %v1829_v50 = vsel %vm1813_vm7, %v1796_v53, %v1571_v8 }
  0xfd   : > { %1742 = vrot.lane.b32.xlu1 %v1425_v62, %s8205_s4  ;;  %1740 = vrot.lane.b32.xlu0 %v1413_v30, %s8205_s4 }
  0xff   : > { %v1603_v9 = vpop.permute.xlu1 %1602  ;;  %v1601_v0 = vpop.permute.xlu0 %1600 }
 0x100   : > { %v1862_v56 = vsel %vm1846_vm8, %v1829_v50, %v1603_v9 }
 0x101   : > { %1552 = vrot.lane.b32.xlu1 %v1413_v30, %s8200_s9  ;;  %1772 = vrot.lane.b32.xlu0 %v1503_v12, %s11162_s2  ;;  %v1513_v30 = vor.u32 %v1512_v32, %v1508_v29 }
 0x103   : > { %v1635_v19 = vpop.permute.xlu1 %1634  ;;  %v1633_v24 = vpop.permute.xlu0 %1632  ;;  %v1518_v26 = vsel %vm1233_vm4, %v1513_v30, %v1517_v35 }
 0x104   : > { %v1894_v43 = vsel %vm818_vm9, %v1862_v56, %v1635_v19 }
 0x105   : > { %1554 = vrot.lane.b32.xlu1 %v1425_v62, %s8200_s9  ;;  %1774 = vrot.lane.b32.xlu0 %v1506_v17, %s11162_s2 }
 0x107   : > { %v1667_v37 = vpop.permute.xlu1 %1666  ;;  %v1665_v14 = vpop.permute.xlu0 %1664 }
 0x108   : > { %v1927_v47 = vsel %vm1911_vm10, %v1894_v43, %v1667_v37 }
 0x109   : > { %1586 = vrot.lane.b32.xlu1 %v1506_v17, %s11206_s0  ;;  %1584 = vrot.lane.b32.xlu0 %v1503_v12, %s11206_s0  ;;  %v1860_v12 = vsel %vm1846_vm8, %v1827_v44, %v1601_v0  ;;  %s11229_s0 = sld [smem:[#allocation16_spill]] }
 0x10a   : > { %v1892_v46 = vsel %vm818_vm9, %v1860_v12, %v1633_v24 }
 0x10b   : > { %v1699_v21 = vpop.permute.xlu1 %1698  ;;  %v1697_v22 = vpop.permute.xlu0 %1696  ;;  %v1925_v48 = vsel %vm1911_vm10, %v1892_v46, %v1665_v14 }
 0x10c   : > { %v1958_v52 = vsel %vm1944_vm11, %v1925_v48, %v1697_v22  ;;  %v1960_v57 = vsel %vm1944_vm11, %v1927_v47, %v1699_v21 }
 0x10d   : > { %1618 = vrot.lane.b32.xlu1 %v1215_v16, %s11207_s30  ;;  %1616 = vrot.lane.b32.xlu0 %v8783_v20, %s11207_s30  ;;  %s11212_s30 = sld [smem:[#allocation14_spill]] }
 0x10f   : > { %v1731_v31 = vpop.permute.xlu1 %1730  ;;  %v1729_v45 = vpop.permute.xlu0 %1728 }
 0x110   : > { %v1991_v28 = vsel %vm1977_vm12, %v1958_v52, %v1729_v45  ;;  %v1993_v60 = vsel %vm1977_vm12, %v1960_v57, %v1731_v31 }
 0x111   : > { %1650 = vrot.lane.b32.xlu1 %v1518_v26, %s11208_s28  ;;  %1648 = vrot.lane.b32.xlu0 %v1425_v62, %s11208_s28  ;;  %s7303_s28 = sshll.u32 %s11248_s3, 8 }
 0x112   : > { %s11022_s7 = scalar_lea.vmem %s11149_s26, %s7303_s28 }
 0x113   : > { %v1541_v54 = vpop.permute.xlu1 %1540  ;;  %v1761_v39 = vpop.permute.xlu0 %1760 }
 0x114   : > { %v2023_v4 = vsel %vm883_vm13, %v1991_v28, %v1761_v39  ;;  %v1798_v0 = vsel %vm1780_vm6, %v8532_v27, %v1541_v54 }
 0x115   : > { %1682 = vrot.lane.b32.xlu1 %v1523_v49, %s11209_s8  ;;  %1680 = vrot.lane.b32.xlu0 %v1506_v17, %s11209_s8  ;;  %s11170_s8 = smov 96  }
 0x116   : > { %7748 = vmatprep.mubr.msk.bf16.mxu0 %vm2069_vm14, %v2023_v4 }
 0x117   : > { %v1543_v51 = vpop.permute.xlu1 %1542  ;;  %v1763_v1 = vpop.permute.xlu0 %1762 }
 0x118   : > { %v2025_v5 = vsel %vm883_vm13, %v1993_v60, %v1763_v1  ;;  %v1800_v29 = vsel %vm1780_vm6, %v8550_v42, %v1543_v51 }
 0x119   : > { %1714 = vrot.lane.b32.xlu1 %v8360_v3, %s8202_s6  ;;  %1712 = vrot.lane.b32.xlu0 %v1215_v16, %s8202_s6  ;;  %s11210_s6 = sld [smem:[#allocation19_spill]] }
 0x11a   : > { %7749 = vmatmul.mubr.msk.bf16.gmra.mrb[12].mxu0 %vm2069_vm14, %v2025_v5 }
 0x11b   : > { %v1575_v61 = vpop.permute.xlu1 %1574  ;;  %v1573_v6 = vpop.permute.xlu0 %1572 }
 0x11c   : > { %v1831_v7 = vsel %vm1813_vm7, %v1798_v0, %v1573_v6  ;;  %v1833_v34 = vsel %vm1813_vm7, %v1800_v29, %v1575_v61 }
 0x11d   : > { %1746 = vrot.lane.b32.xlu1 %v8383_v18, %s8205_s4  ;;  %1744 = vrot.lane.b32.xlu0 %v1518_v26, %s8205_s4  ;;  %s11245_s4 = smov 96  }
 0x11f   : > { %v1607_v62 = vpop.permute.xlu1 %1606  ;;  %v1605_v8 = vpop.permute.xlu0 %1604 }
 0x120   : > { %v1864_v17 = vsel %vm1846_vm8, %v1831_v7, %v1605_v8  ;;  %v1866_v27 = vsel %vm1846_vm8, %v1833_v34, %v1607_v62 }
 0x121   : > { %1778 = vrot.lane.b32.xlu1 %v8371_v10, %s11162_s2  ;;  %1776 = vrot.lane.b32.xlu0 %v1523_v49, %s11162_s2 }
 0x123   : > { %v1639_v63 = vpop.permute.xlu1 %1638  ;;  %v1637_v58 = vpop.permute.xlu0 %1636 }
 0x124   : > { %v1896_v24 = vsel %vm818_vm9, %v1864_v17, %v1637_v58  ;;  %v1898_v21 = vsel %vm818_vm9, %v1866_v27, %v1639_v63 }
 0x127   : > { %v1671_v9 = vpop.permute.xlu1 %1670  ;;  %v1669_v13 = vpop.permute.xlu0 %1668 }
 0x128   : > { %v1929_v32 = vsel %vm1911_vm10, %v1896_v24, %v1669_v13  ;;  %v1931_v38 = vsel %vm1911_vm10, %v1898_v21, %v1671_v9 }
 0x12b   : > { %v1703_v15 = vpop.permute.xlu1 %1702  ;;  %v1701_v16 = vpop.permute.xlu0 %1700 }
 0x12c   : > { %v1962_v37 = vsel %vm1944_vm11, %v1929_v32, %v1701_v16  ;;  %v1964_v42 = vsel %vm1944_vm11, %v1931_v38, %v1703_v15 }
 0x12f   : > { %v1735_v19 = vpop.permute.xlu1 %1734  ;;  %v1733_v23 = vpop.permute.xlu0 %1732 }
 0x130   : > { %v1995_v30 = vsel %vm1977_vm12, %v1962_v37, %v1733_v23  ;;  %v1997_v33 = vsel %vm1977_vm12, %v1964_v42, %v1735_v19 }
 0x133   : > { %v1545_v14 = vpop.permute.xlu1 %1544  ;;  %v1765_v35 = vpop.permute.xlu0 %1764 }
 0x134   : > { %v2027_v22 = vsel %vm883_vm13, %v1995_v30, %v1765_v35  ;;  %v1802_v56 = vsel %vm1780_vm6, %v8586_v11, %v1545_v14 }
 0x135   : > { %7752 = vmatprep.mubr.msk.bf16.mxu0 %vm2069_vm14, %v2027_v22 }
 0x137   : > { %v1547_v26 = vpop.permute.xlu1 %1546  ;;  %v1767_v40 = vpop.permute.xlu0 %1766 }
 0x138   : > { %v2029_v44 = vsel %vm883_vm13, %v1997_v33, %v1767_v40  ;;  %v1804_v57 = vsel %vm1780_vm6, %v8612_v41, %v1547_v26 }
 0x139   : > { %7753 = vmatmul.mubr.msk.bf16.gmra.mrb[16].mxu0 %vm2069_vm14, %v2029_v44 }
 0x13b   : > { %v1579_v31 = vpop.permute.xlu1 %1578  ;;  %v1577_v12 = vpop.permute.xlu0 %1576 }
 0x13c   : > { %v1835_v28 = vsel %vm1813_vm7, %v1802_v56, %v1577_v12  ;;  %v1837_v60 = vsel %vm1813_vm7, %v1804_v57, %v1579_v31 }
 0x13f   : > { %v1611_v45 = vpop.permute.xlu1 %1610  ;;  %v1609_v46 = vpop.permute.xlu0 %1608 }
 0x140   : > { %v1868_v43 = vsel %vm1846_vm8, %v1835_v28, %v1609_v46  ;;  %v1870_v11 = vsel %vm1846_vm8, %v1837_v60, %v1611_v45 }
 0x143   : > { %v1643_v53 = vpop.permute.xlu1 %1642  ;;  %v1641_v48 = vpop.permute.xlu0 %1640 }
 0x144   : > { %v1900_v47 = vsel %vm818_vm9, %v1868_v43, %v1641_v48  ;;  %v1902_v62 = vsel %vm818_vm9, %v1870_v11, %v1643_v53 }
 0x147   : > { %v1675_v49 = vpop.permute.xlu1 %1674  ;;  %v1673_v50 = vpop.permute.xlu0 %1672 }
 0x148   : > { %v1933_v51 = vsel %vm1911_vm10, %v1900_v47, %v1673_v50  ;;  %v1935_v63 = vsel %vm1911_vm10, %v1902_v62, %v1675_v49 }
 0x14b   : > { %v1707_v52 = vpop.permute.xlu1 %1706  ;;  %v1705_v54 = vpop.permute.xlu0 %1704 }
 0x14c   : > { %v1966_v1 = vsel %vm1944_vm11, %v1933_v51, %v1705_v54  ;;  %v1968_v41 = vsel %vm1944_vm11, %v1935_v63, %v1707_v52  ;;  %v8945_v51 = vld [vmem:[%s11210_s6] ss:$0 sm:$0xff]  ;;  %s11213_s6 = sld [smem:[#allocation20_spill]] }
 0x14f   : > { %v1739_v39 = vpop.permute.xlu1 %1738  ;;  %v1737_v4 = vpop.permute.xlu0 %1736 }
 0x150   : > { %v1999_v61 = vsel %vm1977_vm12, %v1966_v1, %v1737_v4  ;;  %v2001_v9 = vsel %vm1977_vm12, %v1968_v41, %v1739_v39 }
 0x153   : > { %v1549_v5 = vpop.permute.xlu1 %1548  ;;  %v1769_v6 = vpop.permute.xlu0 %1768 }
 0x154   : > { %v2031_v8 = vsel %vm883_vm13, %v1999_v61, %v1769_v6  ;;  %v1806_v37 = vsel %vm1780_vm6, %v8689_v36, %v1549_v5 }
 0x155   : > { %7756 = vmatprep.mubr.msk.bf16.mxu0 %vm2069_vm14, %v2031_v8 }
 0x157   : > { %v1551_v58 = vpop.permute.xlu1 %1550  ;;  %v1771_v13 = vpop.permute.xlu0 %1770 }
 0x158   : > { %v2033_v15 = vsel %vm883_vm13, %v2001_v9, %v1771_v13  ;;  %v1808_v22 = vsel %vm1780_vm6, %v8711_v59, %v1551_v58 }
 0x159   : > { %7757 = vmatmul.mubr.msk.bf16.gmra.mrb[20].mxu0 %vm2069_vm14, %v2033_v15  ;;  %v8078_v15 = vld [vmem:[%s11211_s5] sm:$0xff]  }
 0x15a   : > { %7723 = vmatpush3.bf16.msra.mxu1 %v8078_v15 }
 0x15b   : > { %v1583_v16 = vpop.permute.xlu1 %1582  ;;  %v1581_v0 = vpop.permute.xlu0 %1580  ;;  %7724 = vmatprep.subr.bf16.mxu1 %v11164_v25 }
 0x15c   : > { %v1839_v14 = vsel %vm1813_vm7, %v1806_v37, %v1581_v0  ;;  %v1841_v42 = vsel %vm1813_vm7, %v1808_v22, %v1583_v16 }
 0x15f   : > { %v1615_v7 = vpop.permute.xlu1 %1614  ;;  %v1613_v19 = vpop.permute.xlu0 %1612 }
 0x160   : > { %v1872_v30 = vsel %vm1846_vm8, %v1839_v14, %v1613_v19  ;;  %v1874_v36 = vsel %vm1846_vm8, %v1841_v42, %v1615_v7 }
 0x163   : > { %v1647_v17 = vpop.permute.xlu1 %1646  ;;  %v1645_v23 = vpop.permute.xlu0 %1644 }
 0x164   : > { %v1904_v21 = vsel %vm818_vm9, %v1872_v30, %v1645_v23  ;;  %v1906_v31 = vsel %vm818_vm9, %v1874_v36, %v1647_v17 }
 0x167   : > { %v1679_v24 = vpop.permute.xlu1 %1678  ;;  %v1677_v29 = vpop.permute.xlu0 %1676 }
 0x168   : > { %v1937_v38 = vsel %vm1911_vm10, %v1904_v21, %v1677_v29  ;;  %v1939_v45 = vsel %vm1911_vm10, %v1906_v31, %v1679_v24 }
 0x16b   : > { %v1711_v32 = vpop.permute.xlu1 %1710  ;;  %v1709_v34 = vpop.permute.xlu0 %1708 }
 0x16c   : > { %v1970_v26 = vsel %vm1944_vm11, %v1937_v38, %v1709_v34  ;;  %v1972_v59 = vsel %vm1944_vm11, %v1939_v45, %v1711_v32  ;;  %v811_v32 = vld [vmem:[%s11212_s30] sm:$0x1]  ;;  %v8079_v38 = vld [vmem:[%s11211_s5 + $0x8] sm:$0xff]  }
 0x16d   : > { %7725 = vmatpush3.bf16.msra.mxu1 %v8079_v38 }
 0x16f   : > { %v1743_v27 = vpop.permute.xlu1 %1742  ;;  %v1741_v35 = vpop.permute.xlu0 %1740 }
 0x170   : > { %v2003_v40 = vsel %vm1977_vm12, %v1970_v26, %v1741_v35  ;;  %v2005_v53 = vsel %vm1977_vm12, %v1972_v59, %v1743_v27 }
 0x173   : > { %v1553_v33 = vpop.permute.xlu1 %1552  ;;  %v1773_v44 = vpop.permute.xlu0 %1772 }
 0x174   : > { %v2035_v12 = vsel %vm883_vm13, %v2003_v40, %v1773_v44  ;;  %v1810_v60 = vsel %vm1780_vm6, %v8768_v55, %v1553_v33 }
 0x175   : > { %7760 = vmatprep.mubr.msk.bf16.mxu0 %vm2069_vm14, %v2035_v12 }
 0x177   : > { %v1555_v46 = vpop.permute.xlu1 %1554  ;;  %v1775_v48 = vpop.permute.xlu0 %1774 }
 0x178   : > { %v2037_v49 = vsel %vm883_vm13, %v2005_v53, %v1775_v48  ;;  %v1812_v47 = vsel %vm1780_vm6, %v8783_v20, %v1555_v46 }
 0x179   : > { %7761 = vmatmul.mubr.msk.bf16.gmra.mrb[24].mxu0 %vm2069_vm14, %v2037_v49 }
 0x17b   : > { %v1587_v50 = vpop.permute.xlu1 %1586  ;;  %v1585_v52 = vpop.permute.xlu0 %1584 }
 0x17c   : > { %v1845_v1 = vsel %vm1813_vm7, %v1812_v47, %v1587_v50  ;;  %v1843_v11 = vsel %vm1813_vm7, %v1810_v60, %v1585_v52 }
 0x17f   : > { %v1619_v54 = vpop.permute.xlu1 %1618  ;;  %v1617_v56 = vpop.permute.xlu0 %1616 }
 0x180   : > { %v1878_v61 = vsel %vm1846_vm8, %v1845_v1, %v1619_v54  ;;  %v1876_v62 = vsel %vm1846_vm8, %v1843_v11, %v1617_v56 }
 0x183   : > { %v1651_v28 = vpop.permute.xlu1 %1650  ;;  %v1649_v39 = vpop.permute.xlu0 %1648 }
 0x184   : > { %v1910_v20 = vsel %vm818_vm9, %v1878_v61, %v1651_v28  ;;  %v1908_v41 = vsel %vm818_vm9, %v1876_v62, %v1649_v39 }
 0x187   : > { %v1683_v43 = vpop.permute.xlu1 %1682  ;;  %v1681_v4 = vpop.permute.xlu0 %1680 }
 0x188   : > { %v1943_v58 = vsel %vm1911_vm10, %v1910_v20, %v1683_v43  ;;  %v1941_v16 = vsel %vm1911_vm10, %v1908_v41, %v1681_v4 }
 0x18b   : > { %v1715_v57 = vpop.permute.xlu1 %1714  ;;  %v1713_v5 = vpop.permute.xlu0 %1712 }
 0x18c   : > { %v1976_v0 = vsel %vm1944_vm11, %v1943_v58, %v1715_v57  ;;  %v1974_v34 = vsel %vm1944_vm11, %v1941_v16, %v1713_v5 }
 0x18d   : > { %v7738_v6 = vpop.f32.mrb[0].mxu0  ;;  %v856_v27 = vpop.f32.mrb[0].mxu1 }
 0x18e   : > { %v2149_v8 = vadd.f32 %v7738_v6, %v8945_v51  ;;  %v2140_v63 = vpop.f32.mrb[1].mxu0  ;;  %v857_v22 = vadd.f32 %v856_v27, %v811_v32  ;;  %v7720_v42 = vpop.f32.mrb[1].mxu1 }
 0x18f   : > { %v2141_v55 = vadd.f32 %v8945_v51, %v2140_v63  ;;  %v7739_v9 = vpop.f32.mrb[2].mxu0  ;;  %v1747_v13 = vpop.permute.xlu1 %1746 }
 0x190   : > { %v2301_v7 = vmul.f32 0.1, %v2149_v8  ;;  %v2152_v19 = vadd.f32 %v7739_v9, %v8945_v51  ;;  %v2143_v17 = vpop.f32.mrb[3].mxu0  ;;  %v1745_v23 = vpop.permute.xlu0 %1744  ;;  %vm2269_vm0 = vcmp.gt.f32.partialorder %v2149_v8, 0.0  ;;  %v2009_v14 = vsel %vm1977_vm12, %v1976_v0, %v1747_v13 }
 0x191   : > { %vm2267_vm1 = vcmp.gt.f32.partialorder %v2141_v55, 0.0  ;;  %v2299_v24 = vmul.f32 0.1, %v2141_v55  ;;  %v2144_v29 = vadd.f32 %v8945_v51, %v2143_v17  ;;  %v2007_v35 = vsel %vm1977_vm12, %v1974_v34, %v1745_v23  ;;  %v859_v31 = vpop.f32.mrb[2].mxu1 }
 0x192   : > { %vm2270_vm5 = vcmp.gt.f32.partialorder %v2152_v19, 0.0  ;;  %v2302_v37 = vmul.f32 0.1, %v2152_v19  ;;  %v2333_v26 = vsel %vm2269_vm0, %v2149_v8, %v2301_v7  ;;  %vm862_vm7 = vcmp.gt.f32.partialorder %v857_v22, 0.0  ;;  %v7721_v46 = vpop.f32.mrb[3].mxu1 }
 0x193   : > { %vm2268_vm6 = vcmp.gt.f32.partialorder %v2144_v29, 0.0  ;;  %v2300_v30 = vmul.f32 0.1, %v2144_v29  ;;  %v1779_v21 = vpop.permute.xlu1 %1778  ;;  %v2331_v33 = vsel %vm2267_vm1, %v2141_v55, %v2299_v24  ;;  %v863_v48 = vmul.f32 0.1, %v857_v22 }
 0x194   : > { %v2334_v36 = vsel %vm2270_vm5, %v2152_v19, %v2302_v37  ;;  %v2041_v40 = vsel %vm883_vm13, %v2009_v14, %v1779_v21  ;;  %v1777_v44 = vpop.permute.xlu0 %1776 }
 0x195   : > { %v8978_v12 = vpack.c.bf16 %v2334_v36, %v2333_v26  ;;  %v2332_v45 = vsel %vm2268_vm6, %v2144_v29, %v2300_v30  ;;  %v2039_v59 = vsel %vm883_vm13, %v2007_v35, %v1777_v44  ;;  %v864_v49 = vsel %vm862_vm7, %v857_v22, %v863_v48 }
 0x196   : > { %v8981_v53 = vpack.c.bf16 %v2332_v45, %v2331_v33  ;;  %7764 = vmatprep.mubr.msk.bf16.mxu0 %vm2069_vm14, %v2039_v59  ;;  %v865_v50 = vpack.c.bf16 %v864_v49, %v864_v49  ;;  %v8082_v49 = vld [vmem:[%s11213_s6 + $0x4] ss:$8 sps:$4 sm:$0xff]  }
 0x197   : > { %7765 = vmatmul.mubr.msk.bf16.gmra.mrb[28].mxu0 %vm2069_vm14, %v2041_v40 }
 0x198   : > { %7727 = vmatmul.mubr.msk.bf16.vlgmr.msra.gmra.mrb[4].mxu1 %vm883_vm13, %v865_v50 }
 0x199   : > { %2459 = vmatprep.mubr.bf16.mxu1 %v8082_v49 }
 0x1ad   : > { %v7742_v52 = vpop.f32.mrb[4].mxu0 }
 0x1ae   : > { %v2165_v54 = vadd.f32 %v7742_v52, %v8945_v51  ;;  %v2156_v56 = vpop.f32.mrb[5].mxu0 }
 0x1af   : > { %v2157_v28 = vadd.f32 %v8945_v51, %v2156_v56  ;;  %v7743_v39 = vpop.f32.mrb[6].mxu0 }
 0x1b0   : > { %v2305_v43 = vmul.f32 0.1, %v2165_v54  ;;  %v2168_v4 = vadd.f32 %v7743_v39, %v8945_v51  ;;  %v2159_v47 = vpop.f32.mrb[7].mxu0  ;;  %vm2273_vm8 = vcmp.gt.f32.partialorder %v2165_v54, 0.0 }
 0x1b1   : > { %v2303_v57 = vmul.f32 0.1, %v2157_v28  ;;  %v2160_v60 = vadd.f32 %v8945_v51, %v2159_v47  ;;  %vm2271_vm9 = vcmp.gt.f32.partialorder %v2157_v28, 0.0 }
 0x1b2   : > { %vm2274_vm10 = vcmp.gt.f32.partialorder %v2168_v4, 0.0  ;;  %v2306_v1 = vmul.f32 0.1, %v2168_v4  ;;  %v2337_v11 = vsel %vm2273_vm8, %v2165_v54, %v2305_v43 }
 0x1b3   : > { %vm2272_vm11 = vcmp.gt.f32.partialorder %v2160_v60, 0.0  ;;  %v2304_v5 = vmul.f32 0.1, %v2160_v60  ;;  %v2335_v6 = vsel %vm2271_vm9, %v2157_v28, %v2303_v57 }
 0x1b4   : > { %v2338_v61 = vsel %vm2274_vm10, %v2168_v4, %v2306_v1 }
 0x1b5   : > { %v8990_v62 = vpack.c.bf16 %v2338_v61, %v2337_v11  ;;  %v2336_v20 = vsel %vm2272_vm11, %v2160_v60, %v2304_v5 }
 0x1b6   : > { %v8992_v8 = vpack.c.bf16 %v2336_v20, %v2335_v6 }
 0x1cd   : > { %v7746_v63 = vpop.f32.mrb[8].mxu0 }
 0x1ce   : > { %v2181_v41 = vadd.f32 %v7746_v63, %v8945_v51  ;;  %v2172_v58 = vpop.f32.mrb[9].mxu0 }
 0x1cf   : > { %v2173_v55 = vadd.f32 %v8945_v51, %v2172_v58  ;;  %v7747_v9 = vpop.f32.mrb[10].mxu0 }
 0x1d0   : > { %v2309_v13 = vmul.f32 0.1, %v2181_v41  ;;  %v2184_v15 = vadd.f32 %v7747_v9, %v8945_v51  ;;  %v2175_v16 = vpop.f32.mrb[11].mxu0  ;;  %vm2277_vm12 = vcmp.gt.f32.partialorder %v2181_v41, 0.0 }
 0x1d1   : > { %v2307_v0 = vmul.f32 0.1, %v2173_v55  ;;  %v2176_v7 = vadd.f32 %v8945_v51, %v2175_v16  ;;  %vm2275_vm14 = vcmp.gt.f32.partialorder %v2173_v55, 0.0 }
 0x1d2   : > { %vm2278_vm0 = vcmp.gt.f32.partialorder %v2184_v15, 0.0  ;;  %v2310_v19 = vmul.f32 0.1, %v2184_v15  ;;  %v2341_v23 = vsel %vm2277_vm12, %v2181_v41, %v2309_v13 }
 0x1d3   : > { %vm2276_vm1 = vcmp.gt.f32.partialorder %v2176_v7, 0.0  ;;  %v2308_v17 = vmul.f32 0.1, %v2176_v7  ;;  %v2339_v29 = vsel %vm2275_vm14, %v2173_v55, %v2307_v0 }
 0x1d4   : > { %v2342_v24 = vsel %vm2278_vm0, %v2184_v15, %v2310_v19 }
 0x1d5   : > { %v8998_v32 = vpack.c.bf16 %v2342_v24, %v2341_v23  ;;  %v2340_v34 = vsel %vm2276_vm1, %v2176_v7, %v2308_v17 }
 0x1d6   : > { %v9000_v37 = vpack.c.bf16 %v2340_v34, %v2339_v29 }
 0x1ed   : > { %v7750_v14 = vpop.f32.mrb[12].mxu0 }
 0x1ee   : > { %v2197_v27 = vadd.f32 %v7750_v14, %v8945_v51  ;;  %v2188_v30 = vpop.f32.mrb[13].mxu0 }
 0x1ef   : > { %v2189_v35 = vadd.f32 %v8945_v51, %v2188_v30  ;;  %v7751_v21 = vpop.f32.mrb[14].mxu0 }
 0x1f0   : > { %v2313_v22 = vmul.f32 0.1, %v2197_v27  ;;  %v2200_v38 = vadd.f32 %v7751_v21, %v8945_v51  ;;  %v2191_v42 = vpop.f32.mrb[15].mxu0  ;;  %vm2281_vm5 = vcmp.gt.f32.partialorder %v2197_v27, 0.0 }
 0x1f1   : > { %v2311_v26 = vmul.f32 0.1, %v2189_v35  ;;  %v2192_v33 = vadd.f32 %v8945_v51, %v2191_v42  ;;  %vm2279_vm6 = vcmp.gt.f32.partialorder %v2189_v35, 0.0 }
 0x1f2   : > { %vm2282_vm7 = vcmp.gt.f32.partialorder %v2200_v38, 0.0  ;;  %v2314_v36 = vmul.f32 0.1, %v2200_v38  ;;  %v2345_v44 = vsel %vm2281_vm5, %v2197_v27, %v2313_v22 }
 0x1f3   : > { %vm2280_vm8 = vcmp.gt.f32.partialorder %v2192_v33, 0.0  ;;  %v2312_v40 = vmul.f32 0.1, %v2192_v33  ;;  %v2343_v45 = vsel %vm2279_vm6, %v2189_v35, %v2311_v26 }
 0x1f4   : > { %v2346_v31 = vsel %vm2282_vm7, %v2200_v38, %v2314_v36 }
 0x1f5   : > { %v9006_v59 = vpack.c.bf16 %v2346_v31, %v2345_v44  ;;  %v2344_v46 = vsel %vm2280_vm8, %v2192_v33, %v2312_v40 }
 0x1f6   : > { %v9008_v48 = vpack.c.bf16 %v2344_v46, %v2343_v45 }
 0x20c   : > { %v7754_v50 = vpop.f32.mrb[16].mxu0 }
 0x20d   : > { %v2213_v52 = vadd.f32 %v7754_v50, %v8945_v51  ;;  %v2204_v54 = vpop.f32.mrb[17].mxu0 }
 0x20e   : > { %v2205_v56 = vadd.f32 %v8945_v51, %v2204_v54  ;;  %v7755_v28 = vpop.f32.mrb[18].mxu0 }
 0x20f   : > { %v2317_v39 = vmul.f32 0.1, %v2213_v52  ;;  %v2216_v43 = vadd.f32 %v7755_v28, %v8945_v51  ;;  %v2207_v4 = vpop.f32.mrb[19].mxu0  ;;  %vm2285_vm9 = vcmp.gt.f32.partialorder %v2213_v52, 0.0 }
 0x210   : > { %v2315_v47 = vmul.f32 0.1, %v2205_v56  ;;  %v2208_v57 = vadd.f32 %v8945_v51, %v2207_v4  ;;  %vm2283_vm10 = vcmp.gt.f32.partialorder %v2205_v56, 0.0 }
 0x211   : > { %vm2286_vm11 = vcmp.gt.f32.partialorder %v2216_v43, 0.0  ;;  %v2318_v60 = vmul.f32 0.1, %v2216_v43  ;;  %v2349_v5 = vsel %vm2285_vm9, %v2213_v52, %v2317_v39 }
 0x212   : > { %vm2284_vm12 = vcmp.gt.f32.partialorder %v2208_v57, 0.0  ;;  %v2316_v1 = vmul.f32 0.1, %v2208_v57  ;;  %v2347_v61 = vsel %vm2283_vm10, %v2205_v56, %v2315_v47 }
 0x213   : > { %v2350_v11 = vsel %vm2286_vm11, %v2216_v43, %v2318_v60 }
 0x214   : > { %v2348_v6 = vsel %vm2284_vm12, %v2208_v57, %v2316_v1  ;;  %v9017_v20 = vpack.c.bf16 %v2350_v11, %v2349_v5 }
 0x215   : > { %v9019_v63 = vpack.c.bf16 %v2348_v6, %v2347_v61 }
 0x216   : > { %11214 = vst [vmem:[#allocation4_spill] sm:$0xff] %v9017_v20 }
 0x217   : > { %7344 = vmatprep.subr.bf16.mxu1 %v9019_v63 }
 0x218   : > { %7345 = vmatpush3.bf16.msra.mxu1 %v8981_v53 }
 0x219   : > { %7346 = vmatprep.subr.bf16.mxu1 %v9017_v20 }
 0x21c   : > { %7347 = vmatpush3.bf16.msra.mxu1 %v8978_v12 }
 0x22c   : > { %v7758_v41 = vpop.f32.mrb[20].mxu0 }
 0x22d   : > { %v2229_v58 = vadd.f32 %v7758_v41, %v8945_v51  ;;  %v2220_v55 = vpop.f32.mrb[21].mxu0 }
 0x22e   : > { %v2221_v9 = vadd.f32 %v8945_v51, %v2220_v55  ;;  %v7759_v13 = vpop.f32.mrb[22].mxu0 }
 0x22f   : > { %v2321_v15 = vmul.f32 0.1, %v2229_v58  ;;  %v2232_v16 = vadd.f32 %v7759_v13, %v8945_v51  ;;  %v2223_v0 = vpop.f32.mrb[23].mxu0  ;;  %vm2289_vm14 = vcmp.gt.f32.partialorder %v2229_v58, 0.0 }
 0x230   : > { %v2319_v7 = vmul.f32 0.1, %v2221_v9  ;;  %v2224_v19 = vadd.f32 %v8945_v51, %v2223_v0  ;;  %vm2287_vm0 = vcmp.gt.f32.partialorder %v2221_v9, 0.0 }
 0x231   : > { %vm2290_vm1 = vcmp.gt.f32.partialorder %v2232_v16, 0.0  ;;  %v2322_v17 = vmul.f32 0.1, %v2232_v16  ;;  %v2353_v24 = vsel %vm2289_vm14, %v2229_v58, %v2321_v15 }
 0x232   : > { %vm2288_vm5 = vcmp.gt.f32.partialorder %v2224_v19, 0.0  ;;  %v2320_v23 = vmul.f32 0.1, %v2224_v19  ;;  %v2351_v34 = vsel %vm2287_vm0, %v2221_v9, %v2319_v7  ;;  %vm2588_vm0 = vcmask 1044480  }
 0x233   : > { %v2354_v29 = vsel %vm2290_vm1, %v2232_v16, %v2322_v17  ;;  %v8083_v17 = vld [vmem:[%s11213_s6 + $0x14] ss:$8 sps:$4 sm:$0xff]   ;;  %vm2589_vm1 = vsmask.f32 4352 }
 0x234   : > { %v2352_v14 = vsel %vm2288_vm5, %v2224_v19, %v2320_v23  ;;  %v9029_v27 = vpack.c.bf16 %v2354_v29, %v2353_v24  ;;  %v8085_v23 = vld [vmem:[%s11213_s6 + $0x10] ss:$8 sps:$4 sm:$0xff]   ;;  %v8086_v24 = vld [vmem:[%s11213_s6 + $0x24] ss:$8 sps:$4 sm:$0xff]   ;;  %v8088_v29 = vld [vmem:[%s11213_s6 + $0x20] ss:$8 sps:$4 sm:$0xff]  }
 0x235   : > { %v9031_v30 = vpack.c.bf16 %v2352_v14, %v2351_v34  ;;  %v8089_v34 = vld [vmem:[%s11213_s6 + $0x34] ss:$8 sps:$4 sm:$0xff]   ;;  %v8091_v14 = vld [vmem:[%s11213_s6 + $0x30] ss:$8 sps:$4 sm:$0xff]   ;;  %vm9099_vm5 = vmand %vm2588_vm0, %vm2589_vm1 }
 0x236   : > { %11215 = vst [vmem:[#allocation5_spill] sm:$0xff] %v9029_v27 }
 0x237   : > { %11216 = vst [vmem:[#allocation6_spill] sm:$0xff] %v9031_v30  ;;  %7348 = vmatprep.subr.bf16.mxu1 %v9031_v30 }
 0x238   : > { %7349 = vmatpush3.bf16.msra.mxu1 %v8992_v8 }
 0x239   : > { %7350 = vmatprep.subr.bf16.mxu1 %v9029_v27 }
 0x23c   : > { %7351 = vmatpush3.bf16.msra.mxu1 %v8990_v62 }
 0x24c   : > { %v7762_v35 = vpop.f32.mrb[24].mxu0 }
 0x24d   : > { %v2245_v21 = vadd.f32 %v7762_v35, %v8945_v51  ;;  %v2236_v22 = vpop.f32.mrb[25].mxu0  ;;  %v8092_v35 = vld [vmem:[%s11141_s18 + $0x40] sm:$0xff]  }
 0x24e   : > { %v2237_v38 = vadd.f32 %v8945_v51, %v2236_v22  ;;  %v7763_v42 = vpop.f32.mrb[26].mxu0  ;;  %v8094_v22 = vld [vmem:[%s11141_s18 + $0x48] sm:$0xff]  }
 0x24f   : > { %v2325_v26 = vmul.f32 0.1, %v2245_v21  ;;  %v2248_v33 = vadd.f32 %v7763_v42, %v8945_v51  ;;  %v2239_v36 = vpop.f32.mrb[27].mxu0  ;;  %vm2293_vm6 = vcmp.gt.f32.partialorder %v2245_v21, 0.0  ;;  %v8096_v42 = vld [vmem:[%s11141_s18 + $0x50] sm:$0xff]  }
 0x250   : > { %v2323_v40 = vmul.f32 0.1, %v2237_v38  ;;  %v2240_v44 = vadd.f32 %v8945_v51, %v2239_v36  ;;  %vm2291_vm7 = vcmp.gt.f32.partialorder %v2237_v38, 0.0 }
 0x251   : > { %vm2294_vm8 = vcmp.gt.f32.partialorder %v2248_v33, 0.0  ;;  %v2326_v31 = vmul.f32 0.1, %v2248_v33  ;;  %v2357_v46 = vsel %vm2293_vm6, %v2245_v21, %v2325_v26  ;;  %v8093_v21 = vld [vmem:[%s11141_s18] sm:$0xff]   ;;  %vm2755_vm6 = vcmask 1042432  }
 0x252   : > { %vm2292_vm9 = vcmp.gt.f32.partialorder %v2240_v44, 0.0  ;;  %v2324_v45 = vmul.f32 0.1, %v2240_v44  ;;  %v2355_v50 = vsel %vm2291_vm7, %v2237_v38, %v2323_v40  ;;  %v8095_v38 = vld [vmem:[%s11141_s18 + $0x8] sm:$0xff]   ;;  %vm2756_vm7 = vcmask 1046532  }
 0x253   : > { %v2358_v49 = vsel %vm2294_vm8, %v2248_v33, %v2326_v31  ;;  %v9106_v33 = vsel %vm9099_vm5, %v8360_v3, 0  ;;  %vm2640_vm8 = vsmask.f32 3328 }
 0x254   : > { %v2356_v52 = vsel %vm2292_vm9, %v2240_v44, %v2324_v45  ;;  %v9041_v54 = vpack.c.bf16 %v2358_v49, %v2357_v46  ;;  %v7005_v36 = vcombine.low %v9106_v33, %v9106_v33  ;;  %vm2641_vm9 = vsmask.f32 7440 }
 0x255   : > { %v9043_v56 = vpack.c.bf16 %v2356_v52, %v2355_v50 }
 0x256   : > { %11217 = vst [vmem:[#allocation7_spill] sm:$0xff] %v9041_v54  ;;  %v2644_v40 = vshrl.u32 %v7005_v36, 16  ;;  %v2647_v44 = vshll.u32 %v7005_v36, 16 }
 0x257   : > { %11218 = vst [vmem:[#allocation8_spill] sm:$0xff] %v9043_v56  ;;  %7352 = vmatprep.subr.bf16.mxu1 %v9043_v56 }
 0x258   : > { %7353 = vmatpush3.bf16.msra.mxu1 %v9000_v37  ;;  %v2646_v52 = vrot.slane %v2644_v40, 4  ;;  %v8100_v40 = vld [vmem:[%s11141_s18 + $0x60] sm:$0xff]  }
 0x259   : > { %7354 = vmatprep.subr.bf16.mxu1 %v9041_v54 }
 0x25c   : > { %7355 = vmatpush3.bf16.msra.mxu1 %v8998_v32 }
 0x26a   : > { %v7766_v28 = vpop.f32.mrb[28].mxu0 }
 0x26b   : > { %v2261_v39 = vadd.f32 %v7766_v28, %v8945_v51  ;;  %v2252_v43 = vpop.f32.mrb[29].mxu0  ;;  %v9053_v61 = vpop.f32.mrb[4].mxu1  ;;  %v2649_v28 = vrot.slane %v2647_v44, 5 }
 0x26c   : > { %v2253_v4 = vadd.f32 %v8945_v51, %v2252_v43  ;;  %v7767_v47 = vpop.f32.mrb[30].mxu0  ;;  %v7728_v41 = vpop.f32.mrb[5].mxu1 }
 0x26d   : > { %v2329_v57 = vmul.f32 0.1, %v2261_v39  ;;  %v2264_v60 = vadd.f32 %v7767_v47, %v8945_v51  ;;  %v2255_v1 = vpop.f32.mrb[31].mxu0  ;;  %vm2297_vm10 = vcmp.gt.f32.partialorder %v2261_v39, 0.0  ;;  %v924_v55 = vpop.f32.mrb[6].mxu1  ;;  %v8098_v47 = vld [vmem:[%s11141_s18 + $0x58] sm:$0xff]  }
 0x26e   : > { %v2327_v5 = vmul.f32 0.1, %v2253_v4  ;;  %v2256_v11 = vadd.f32 %v8945_v51, %v2255_v1  ;;  %vm2295_vm11 = vcmp.gt.f32.partialorder %v2253_v4, 0.0  ;;  %v7729_v15 = vpop.f32.mrb[7].mxu1  ;;  %v8080_v51 = vld [vmem:[%s11213_s6] ss:$8 sps:$4 sm:$0xff]  }
 0x26f   : > { %vm2298_vm12 = vcmp.gt.f32.partialorder %v2264_v60, 0.0  ;;  %v2330_v6 = vmul.f32 0.1, %v2264_v60  ;;  %v2361_v9 = vsel %vm2297_vm10, %v2261_v39, %v2329_v57  ;;  %v7006_v57 = vcombine.high %v9106_v33, %v9106_v33  ;;  %vm9123_vm10 = vmor %vm2755_vm6, %vm2756_vm7 }
 0x270   : > { %vm2296_vm14 = vcmp.gt.f32.partialorder %v2256_v11, 0.0  ;;  %v2328_v58 = vmul.f32 0.1, %v2256_v11  ;;  %v2359_v16 = vsel %vm2295_vm11, %v2253_v4, %v2327_v5  ;;  %v8097_v4 = vld [vmem:[%s11141_s18 + $0x10] sm:$0xff]   ;;  %v2650_v5 = vor.u32 %v2649_v28, %v2646_v52  ;;  %vm9131_vm11 = vmor %vm2640_vm8, %vm2641_vm9  ;;  %v8101_v52 = vld [vmem:[%s11141_s18 + $0x20] sm:$0xff]  }
 0x271   : > { %v2362_v13 = vsel %vm2298_vm12, %v2264_v60, %v2330_v6  ;;  %vm2918_vm12 = vcmask 523264  }
 0x272   : > { %v2360_v0 = vsel %vm2296_vm14, %v2256_v11, %v2328_v58  ;;  %v9055_v7 = vpack.c.bf16 %v2362_v13, %v2361_v9  ;;  %v2653_v11 = vshll.u32 %v7006_v57, 16  ;;  %v7021_v9 = vrot.slane %v7005_v36, 9  ;;  %v8099_v13 = vld [vmem:[%s11141_s18 + $0x18] sm:$0xff]  }
 0x273   : > { %v9057_v19 = vpack.c.bf16 %v2360_v0, %v2359_v16  ;;  %v2760_v16 = vrot.slane %v7006_v57, 5  ;;  %vm2927_vm14 = vcmask 785408  }
 0x274   : > { %11219 = vst [vmem:[#allocation9_spill] sm:$0xff] %v9055_v7 }
 0x275   : > { %11220 = vst [vmem:[#allocation10_spill] sm:$0xff] %v9057_v19  ;;  %7356 = vmatprep.subr.bf16.mxu1 %v9057_v19 }
 0x276   : > { %7357 = vmatpush3.bf16.msra.mxu1 %v9008_v48 }
 0x277   : > { %7358 = vmatprep.subr.bf16.mxu1 %v9055_v7 }
 0x27a   : > { %7359 = vmatpush3.bf16.msra.mxu1 %v9006_v59 }
 0x27b   : > { %7384 = vmatprep.subr.bf16.mxu1 %v8092_v35  ;;  %v2655_v35 = vrot.slane %v2653_v11, 5  ;;  %v8102_v11 = vld [vmem:[%s11141_s18 + $0x68] sm:$0xff]  }
 0x27d   : > { %2460 = vmatmul.mubr.bf16.vlgmr.msra.gmra.mrb[8].mxu1 %v8080_v51 }
 0x27e   : > { %2467 = vmatprep.mubr.bf16.mxu1 %v8083_v17  ;;  %7385 = vmatpush3.bf16.msra.mxu1 %v8093_v21 }
 0x27f   : > { %7386 = vmatprep.subr.bf16.mxu1 %v8094_v22 }
 0x282   : > { %7387 = vmatpush3.bf16.msra.mxu1 %v8095_v38 }
 0x283   : > { %7388 = vmatprep.subr.bf16.mxu1 %v8096_v42 }
 0x285   : > { %2468 = vmatmul.mubr.bf16.gmra.mrb[12].mxu1 %v8085_v23 }
 0x286   : > { %2475 = vmatprep.mubr.bf16.mxu1 %v8086_v24  ;;  %7389 = vmatpush3.bf16.msra.mxu1 %v8097_v4 }
 0x287   : > { %7390 = vmatprep.subr.bf16.mxu1 %v8098_v47 }
 0x28a   : > { %7391 = vmatpush3.bf16.msra.mxu1 %v8099_v13 }
 0x28b   : > { %7392 = vmatprep.subr.bf16.mxu1 %v8100_v40 }
 0x28d   : > { %2476 = vmatmul.mubr.bf16.gmra.mrb[16].mxu1 %v8088_v29 }
 0x28e   : > { %2483 = vmatprep.mubr.bf16.mxu1 %v8089_v34  ;;  %7393 = vmatpush3.bf16.msra.mxu1 %v8101_v52 }
 0x28f   : > { %7394 = vmatprep.subr.bf16.mxu1 %v8102_v11 }
 0x295   : > { %2484 = vmatmul.mubr.bf16.gmra.mrb[20].mxu1 %v8091_v14  ;;  %v2651_v14 = vrot.slane %v2650_v5, 4 }
 0x297   : > { %v9161_v4 = vsel %vm9131_vm11, %v2651_v14, %v2655_v35 }
 0x350   : > { %v7360_v31 = vpop.f32.mrb[8].mxu1 }
 0x351   : > { %v7361_v45 = vpop.f32.mrb[9].mxu1 }
 0x352   : > { %v7362_v46 = vadd.f32 %v7361_v45, %v7360_v31  ;;  %v7363_v49 = vpop.f32.mrb[10].mxu1  ;;  %v9144_v31 = vsel %vm9123_vm10, %v7021_v9, %v2760_v16 }
 0x353   : > { %v7364_v50 = vpop.f32.mrb[11].mxu1 }
 0x354   : > { %v7304_v39 = vpack.c.bf16 %v7362_v46, %v7362_v46  ;;  %v7365_v43 = vadd.f32 %v7364_v50, %v7363_v49 }
 0x356   : > { %v2517_v60 = vshrl.u32 %v7304_v39, 16  ;;  %v7305_v1 = vpack.c.bf16 %v7365_v43, %v7365_v43  ;;  %v2520_v41 = vshll.u32 %v7304_v39, 16 }
 0x358   : > { %v2519_v6 = vrot.slane %v2517_v60, 7  ;;  %v2524_v58 = vshrl.u32 %v7305_v1, 16  ;;  %v7366_v55 = vpop.f32.mrb[12].mxu1  ;;  %v2527_v17 = vshll.u32 %v7305_v1, 16 }
 0x359   : > { %v7367_v15 = vpop.f32.mrb[13].mxu1 }
 0x35a   : > { %v2522_v0 = vor.u32 %v2520_v41, %v2519_v6  ;;  %v2526_v51 = vrot.slane %v2524_v58, 7  ;;  %v7368_v23 = vadd.f32 %v7367_v15, %v7366_v55  ;;  %v7369_v24 = vpop.f32.mrb[14].mxu1 }
 0x35b   : > { %v7370_v34 = vpop.f32.mrb[15].mxu1 }
 0x35c   : > { %v2580_v21 = vsel %vm8354_vm2, 0, %v2522_v0  ;;  %v2529_v22 = vor.u32 %v2527_v17, %v2526_v51  ;;  %v7306_v38 = vpack.c.bf16 %v7368_v23, %v7368_v23  ;;  %v7371_v42 = vadd.f32 %v7370_v34, %v7369_v24 }
 0x35d   : > { %v9140_v44 = vsel %vm9099_vm5, %v2580_v21, 0 }
 0x35e   : > { %v7007_v45 = vcombine.low %v9140_v44, %v9140_v44  ;;  %v9150_v46 = vcombine.high %v9140_v44, %v9140_v44  ;;  %v2581_v49 = vsel %vm8354_vm2, 0, %v2529_v22  ;;  %v2531_v50 = vshrl.u32 %v7306_v38, 16 }
 0x35f   : > { %v2593_v28 = vsel %vm9099_vm5, %v2581_v49, 0  ;;  %v2534_v39 = vshll.u32 %v7306_v38, 16  ;;  %v7307_v43 = vpack.c.bf16 %v7371_v42, %v7371_v42 }
 0x360   : > { %v9163_v47 = vcombine.low %v2593_v28, %v2593_v28  ;;  %v9165_v57 = vcombine.high %v2593_v28, %v2593_v28  ;;  %v2533_v60 = vrot.slane %v2531_v50, 7  ;;  %v7372_v1 = vpop.f32.mrb[16].mxu1  ;;  %v7044_v5 = vcombine.low %v9140_v44, %v2593_v28 }
 0x361   : > { %v2538_v6 = vshrl.u32 %v7307_v43, 16  ;;  %v2541_v41 = vshll.u32 %v7307_v43, 16  ;;  %v7373_v58 = vpop.f32.mrb[17].mxu1  ;;  %v7022_v55 = vrot.slane %v7007_v45, 9  ;;  %v2764_v9 = vrot.slane %v9150_v46, 5 }
 0x362   : > { %v2536_v13 = vor.u32 %v2534_v39, %v2533_v60  ;;  %v7374_v15 = vadd.f32 %v7373_v58, %v7372_v1  ;;  %v7375_v16 = vpop.f32.mrb[18].mxu1  ;;  %2861 = vrot.lane.b32.xlu1 %v7044_v5, %s11170_s8  ;;  %v7023_v0 = vrot.slane %v9163_v47, 9  ;;  %v2768_v51 = vrot.slane %v9165_v57, 5  ;;  %v8103_v60 = vld [vmem:[%s11141_s18 + $0x28] sm:$0xff]  }
 0x363   : > { %v2540_v17 = vrot.slane %v2538_v6, 7  ;;  %v7376_v23 = vpop.f32.mrb[19].mxu1  ;;  %v2765_v24 = vsel %vm9123_vm10, %v7022_v55, %v2764_v9  ;;  %v2658_v34 = vshrl.u32 %v7007_v45, 16  ;;  %v2661_v14 = vshll.u32 %v7007_v45, 16  ;;  %7395 = vmatpush3.bf16.msra.mxu1 %v8103_v60 }
 0x364   : > { %v2582_v35 = vsel %vm8354_vm2, 0, %v2536_v13  ;;  %v7308_v21 = vpack.c.bf16 %v7374_v15, %v7374_v15  ;;  %v7377_v22 = vadd.f32 %v7376_v23, %v7375_v16  ;;  %v7040_v38 = vcombine.low %v9144_v31, %v2765_v24  ;;  %v8104_v15 = vld [vmem:[%s11141_s18 + $0x70] sm:$0xff]  }
 0x365   : > { %v2594_v42 = vsel %vm9099_vm5, %v2582_v35, 0  ;;  %v2543_v40 = vor.u32 %v2541_v41, %v2540_v17  ;;  %v9184_v49 = vsel %vm9123_vm10, %v7023_v0, %v2768_v51  ;;  %v2660_v50 = vrot.slane %v2658_v34, 4  ;;  %v8105_v23 = vld [vmem:[%s11141_s18 + $0x30] sm:$0xff]   ;;  %7396 = vmatprep.subr.bf16.mxu1 %v8104_v15 }
 0x366   : > { %v9186_v52 = vcombine.low %v2594_v42, %v2594_v42  ;;  %v9188_v39 = vcombine.high %v2594_v42, %v2594_v42  ;;  %v2545_v45 = vshrl.u32 %v7308_v21, 16  ;;  %v2548_v43 = vshll.u32 %v7308_v21, 16  ;;  %2849 = vrot.lane.b32.xlu1 %v7040_v38, %s11172_s29 }
 0x367   : > { %v2583_v1 = vsel %vm8354_vm2, 0, %v2543_v40  ;;  %v7309_v5 = vpack.c.bf16 %v7377_v22, %v7377_v22  ;;  %v7052_v11 = vcombine.low %v2765_v24, %v9184_v49  ;;  %v9197_v6 = vcombine.low %v2593_v28, %v2594_v42  ;;  %7397 = vmatpush3.bf16.msra.mxu1 %v8105_v23 }
 0x368   : > { %v2595_v41 = vsel %vm9099_vm5, %v2583_v1, 0  ;;  %v2547_v58 = vrot.slane %v2545_v45, 7  ;;  %v7378_v55 = vpop.f32.mrb[20].mxu1  ;;  %v2663_v9 = vrot.slane %v2661_v14, 5  ;;  %v2667_v13 = vshll.u32 %v9150_v46, 16 }
 0x369   : > { %v9205_v16 = vcombine.low %v2595_v41, %v2595_v41  ;;  %v9207_v0 = vcombine.high %v2595_v41, %v2595_v41  ;;  %v2552_v51 = vshrl.u32 %v7309_v5, 16  ;;  %v2555_v28 = vshll.u32 %v7309_v5, 16  ;;  %2879 = vrot.lane.b32.xlu0 %v7052_v11, %s11227_s1  ;;  %v7379_v17 = vpop.f32.mrb[21].mxu1 }
 0x36a   : > { %v2550_v24 = vor.u32 %v2548_v43, %v2547_v58  ;;  %v7380_v46 = vadd.f32 %v7379_v17, %v7378_v55  ;;  %v7381_v34 = vpop.f32.mrb[22].mxu1  ;;  %v7045_v14 = vcombine.low %v2594_v42, %v2595_v41  ;;  %v2664_v35 = vor.u32 %v2663_v9, %v2660_v50  ;;  %v8106_v42 = vld [vmem:[%s11141_s18 + $0x78] sm:$0xff]  }
 0x36b   : > { %v2554_v21 = vrot.slane %v2552_v51, 7  ;;  %v7382_v22 = vpop.f32.mrb[23].mxu1  ;;  %v2669_v38 = vrot.slane %v2667_v13, 5  ;;  %v7024_v40 = vrot.slane %v9186_v52, 9  ;;  %v2772_v45 = vrot.slane %v9188_v39, 5  ;;  %v8107_v50 = vld [vmem:[%s11141_s18 + $0x38] sm:$0xff]   ;;  %7398 = vmatprep.subr.bf16.mxu1 %v8106_v42 }
 0x36c   : > { %v2584_v60 = vsel %vm8354_vm2, 0, %v2550_v24  ;;  %v7310_v1 = vpack.c.bf16 %v7380_v46, %v7380_v46  ;;  %2863 = vrot.lane.b32.xlu1 %v7045_v14, %s11170_s8  ;;  %v7383_v5 = vadd.f32 %v7382_v22, %v7381_v34  ;;  %v2665_v43 = vrot.slane %v2664_v35, 4  ;;  %7399 = vmatpush3.bf16.msra.mxu1 %v8107_v50 }
 0x36d   : > { %v2596_v11 = vsel %vm9099_vm5, %v2584_v60, 0  ;;  %v2557_v58 = vor.u32 %v2555_v28, %v2554_v21  ;;  %2888 = vrot.lane.b32.xlu0 %v9197_v6, %s11172_s29  ;;  %v2773_v55 = vsel %vm9123_vm10, %v7024_v40, %v2772_v45  ;;  %v7025_v9 = vrot.slane %v9205_v16, 9 }
 0x36e   : > { %v9231_v13 = vcombine.low %v2596_v11, %v2596_v11  ;;  %v9233_v15 = vcombine.high %v2596_v11, %v2596_v11  ;;  %v2559_v51 = vshrl.u32 %v7310_v1, 16  ;;  %v2562_v17 = vshll.u32 %v7310_v1, 16 }
 0x36f   : > { %v2585_v23 = vsel %vm8354_vm2, 0, %v2557_v58  ;;  %v7311_v24 = vpack.c.bf16 %v7383_v5, %v7383_v5  ;;  %v9239_v28 = vsel %vm9131_vm11, %v2665_v43, %v2669_v38  ;;  %v2776_v46 = vrot.slane %v9207_v0, 5 }
 0x370   : > { %v2597_v34 = vsel %vm9099_vm5, %v2585_v23, 0  ;;  %v2561_v14 = vrot.slane %v2559_v51, 7  ;;  %v7036_v35 = vcombine.low %v9161_v4, %v9239_v28  ;;  %v9247_v21 = vcombine.low %v9184_v49, %v2773_v55 }
 0x371   : > { %v9249_v22 = vcombine.low %v2597_v34, %v2597_v34  ;;  %v9251_v40 = vcombine.high %v2597_v34, %v2597_v34  ;;  %v2566_v45 = vshrl.u32 %v7311_v24, 16  ;;  %v2569_v38 = vshll.u32 %v7311_v24, 16 }
 0x372   : > { %v2564_v60 = vor.u32 %v2562_v17, %v2561_v14  ;;  %2829 = vrot.lane.b32.xlu1 %v7036_v35, %s11227_s1  ;;  %v2777_v1 = vsel %vm9123_vm10, %v7025_v9, %v2776_v46  ;;  %v9256_v5 = vcombine.low %v2595_v41, %v2596_v11  ;;  %v7046_v43 = vcombine.low %v2596_v11, %v2597_v34 }
 0x373   : > { %v2568_v42 = vrot.slane %v2566_v45, 7  ;;  %v7053_v58 = vcombine.low %v2773_v55, %v2777_v1  ;;  %v2672_v49 = vshrl.u32 %v9163_v47, 16  ;;  %v2675_v50 = vshll.u32 %v9163_v47, 16 }
 0x374   : > { %v2586_v51 = vsel %vm8354_vm2, 0, %v2564_v60  ;;  %v2681_v23 = vshll.u32 %v9165_v57, 16  ;;  %v2686_v17 = vshrl.u32 %v9186_v52, 16  ;;  %v2689_v24 = vshll.u32 %v9186_v52, 16 }
 0x375   : > { %v9267_v41 = vsel %vm9099_vm5, %v2586_v51, 0  ;;  %v2571_v11 = vor.u32 %v2569_v38, %v2568_v42  ;;  %2881 = vrot.lane.b32.xlu0 %v7053_v58, %s11227_s1  ;;  %v2674_v55 = vrot.slane %v2672_v49, 4  ;;  %v2677_v9 = vrot.slane %v2675_v50, 5 }
 0x376   : > { %v9272_v47 = vcombine.low %v9267_v41, %v9267_v41  ;;  %v9276_v57 = vcombine.high %v9267_v41, %v9267_v41  ;;  %2851 = vrot.lane.b32.xlu1 %v9247_v21, %s11172_s29  ;;  %v2683_v52 = vrot.slane %v2681_v23, 5  ;;  %v2688_v46 = vrot.slane %v2686_v17, 4 }
 0x377   : > { %v2587_v14 = vsel %vm8354_vm2, 0, %v2571_v11  ;;  %v2678_v35 = vor.u32 %v2677_v9, %v2674_v55  ;;  %v2691_v45 = vrot.slane %v2689_v24, 5  ;;  %v2695_v38 = vshll.u32 %v9188_v39, 16 }
 0x378   : > { %v9285_v60 = vsel %vm9099_vm5, %v2587_v14, 0  ;;  %v7026_v42 = vrot.slane %v9231_v13, 9  ;;  %v2780_v58 = vrot.slane %v9233_v15, 5  ;;  %v7027_v49 = vrot.slane %v9249_v22, 9 }
 0x379   : > { %v9292_v50 = vcombine.low %v9285_v60, %v9285_v60  ;;  %v9296_v51 = vcombine.high %v9285_v60, %v9285_v60  ;;  %2890 = vrot.lane.b32.xlu0 %v9256_v5, %s11172_s29  ;;  %v2679_v39 = vrot.slane %v2678_v35, 4  ;;  %v2692_v23 = vor.u32 %v2691_v45, %v2688_v46 }
 0x37a   : > { %2865 = vrot.lane.b32.xlu1 %v7046_v43, %s11170_s8  ;;  %v2697_v17 = vrot.slane %v2695_v38, 5  ;;  %v2781_v24 = vsel %vm9123_vm10, %v7026_v42, %v2780_v58  ;;  %v2784_v11 = vrot.slane %v9251_v40, 5  ;;  %v9305_v55 = vcombine.low %v2597_v34, %v9267_v41 }
 0x37b   : > { %v9309_v9 = vsel %vm9131_vm11, %v2679_v39, %v2683_v52  ;;  %v2693_v14 = vrot.slane %v2692_v23, 4  ;;  %v9311_v25 = vcombine.low %v2777_v1, %v2781_v24  ;;  %v2700_v46 = vshrl.u32 %v9205_v16, 16 }
 0x37c   : > { %v2785_v43 = vsel %vm9123_vm10, %v7027_v49, %v2784_v11  ;;  %v2703_v35 = vshll.u32 %v9205_v16, 16  ;;  %v2709_v45 = vshll.u32 %v9207_v0, 16  ;;  %v2714_v38 = vshrl.u32 %v9231_v13, 16 }
 0x37d   : > { %v9321_v34 = vsel %vm9131_vm11, %v2693_v14, %v2697_v17  ;;  %v7054_v52 = vcombine.low %v2781_v24, %v2785_v43  ;;  %v2702_v42 = vrot.slane %v2700_v46, 4  ;;  %v2717_v1 = vshll.u32 %v9231_v13, 16 }
 0x37e   : > { %v7037_v58 = vcombine.low %v9309_v9, %v9321_v34  ;;  %v2705_v39 = vrot.slane %v2703_v35, 5  ;;  %v2711_v23 = vrot.slane %v2709_v45, 5  ;;  %v2716_v49 = vrot.slane %v2714_v38, 4 }
 0x37f   : > { %v2719_v11 = vrot.slane %v2717_v1, 5  ;;  %v2723_v16 = vshll.u32 %v9233_v15, 16  ;;  %v7028_v0 = vrot.slane %v9272_v47, 9  ;;  %v2788_v3 = vrot.slane %v9276_v57, 5 }
 0x380   : > { %2897 = vrot.lane.b32.xlu0 %v7037_v58, %s11170_s8  ;;  %2831 = vrot.lane.b32.xlu1 %v7037_v58, %s11227_s1  ;;  %v2706_v17 = vor.u32 %v2705_v39, %v2702_v42  ;;  %v7031_v13 = vrot.slane %v9292_v50, 9  ;;  %v2811_v24 = vrot.slane %v9296_v51, 5  ;;  %v2728_v14 = vshrl.u32 %v9249_v22, 16 }
 0x381   : > { %v2720_v46 = vor.u32 %v2719_v11, %v2716_v49  ;;  %v2725_v35 = vrot.slane %v2723_v16, 5  ;;  %v2789_v15 = vsel %vm9123_vm10, %v7028_v0, %v2788_v3  ;;  %v2731_v45 = vshll.u32 %v9249_v22, 16 }
 0x382   : > { %v2707_v38 = vrot.slane %v2706_v17, 4  ;;  %v9337_v1 = vcombine.low %v2785_v43, %v2789_v15  ;;  %v9341_v58 = vsel %vm9123_vm10, %v7031_v13, %v2811_v24  ;;  %v2730_v42 = vrot.slane %v2728_v14, 4 }
 0x383   : > { %v2721_v39 = vrot.slane %v2720_v46, 4  ;;  %v7055_v7 = vcombine.low %v2789_v15, %v9341_v58  ;;  %v2733_v19 = vrot.slane %v2731_v45, 5  ;;  %v2737_v49 = vshll.u32 %v9251_v40, 16 }
 0x384   : > { %2883 = vrot.lane.b32.xlu0 %v7054_v52, %s11227_s1  ;;  %2853 = vrot.lane.b32.xlu1 %v9311_v25, %s11172_s29  ;;  %v2742_v3 = vshrl.u32 %v9272_v47, 16  ;;  %v2745_v22 = vshll.u32 %v9272_v47, 16  ;;  %v2751_v43 = vshll.u32 %v9276_v57, 16  ;;  %v9353_v11 = vsel %vm9131_vm11, %v2707_v38, %v2711_v23 }
 0x385   : > { %v9357_v16 = vsel %vm9131_vm11, %v2721_v39, %v2725_v35  ;;  %v2734_v40 = vor.u32 %v2733_v19, %v2730_v42  ;;  %v7047_v52 = vcombine.low %v9267_v41, %v9285_v60  ;;  %v2739_v24 = vrot.slane %v2737_v49, 5 }
 0x386   : > { %v7038_v0 = vcombine.low %v9353_v11, %v9357_v16  ;;  %v2744_v17 = vrot.slane %v2742_v3, 4  ;;  %v2747_v13 = vrot.slane %v2745_v22, 5  ;;  %v2796_v57 = vshrl.u32 %v9292_v50, 16  ;;  %v8108_v22 = vld [vmem:[%s11141_s18 + $0x80] sm:$0xff]  }
 0x387   : > { %v2735_v47 = vrot.slane %v2734_v40, 4  ;;  %v2799_v23 = vshll.u32 %v9292_v50, 16  ;;  %v2753_v14 = vrot.slane %v2751_v43, 5  ;;  %v2805_v41 = vshll.u32 %v9296_v51, 16  ;;  %7768 = vmatprep.subr.bf16.mxu1 %v8108_v22 }
 0x388   : > { %2892 = vrot.lane.b32.xlu0 %v9305_v55, %s11172_s29  ;;  %2833 = vrot.lane.b32.xlu1 %v7038_v0, %s11227_s1  ;;  %v2748_v19 = vor.u32 %v2747_v13, %v2744_v17  ;;  %v7048_v46 = vcombine.low %v9239_v28, %v9309_v9  ;;  %v2798_v15 = vrot.slane %v2796_v57, 4  ;;  %v7049_v50 = vcombine.low %v9321_v34, %v9353_v11 }
 0x389   : > { %v9373_v35 = vsel %vm9131_vm11, %v2735_v47, %v2739_v24  ;;  %v2801_v45 = vrot.slane %v2799_v23, 5  ;;  %v2807_v49 = vrot.slane %v2805_v41, 5  ;;  %v7056_v43 = vcombine.low %v9285_v60, %v9106_v33 }
 0x38a   : > { %v2749_v38 = vrot.slane %v2748_v19, 4  ;;  %v7050_v42 = vcombine.low %v9357_v16, %v9373_v35 }
 0x38b   : > { %v2802_v39 = vor.u32 %v2801_v45, %v2798_v15 }
 0x38c   : > { %2899 = vrot.lane.b32.xlu0 %v7038_v0, %s11170_s8  ;;  %2855 = vrot.lane.b32.xlu1 %v9337_v1, %s11172_s29  ;;  %v9384_v28 = vsel %vm9131_vm11, %v2749_v38, %v2753_v14 }
 0x38d   : > { %v7039_v51 = vcombine.low %v9373_v35, %v9384_v28  ;;  %v2803_v9 = vrot.slane %v2802_v39, 4 }
 0x38f   : > { %v9390_v34 = vsel %vm9131_vm11, %v2803_v9, %v2807_v49 }
 0x390   : > { %2885 = vrot.lane.b32.xlu0 %v7055_v7, %s11227_s1  ;;  %2835 = vrot.lane.b32.xlu1 %v7039_v51, %s11227_s1  ;;  %v7051_v3 = vcombine.low %v9384_v28, %v9390_v34  ;;  %v7057_v7 = vcombine.low %v9390_v34, %v9161_v4  ;;  %v870_v28 = vld [vmem:[%s11229_s0] sm:$0x1]  ;;  %v8111_v34 = vld [vmem:[%s11143_s20 + $0x8] sm:$0xff]   ;;  %s11231_s0 = smov 64  }
 0x394   : > { %2901 = vrot.lane.b32.xlu0 %v7039_v51, %s11170_s8  ;;  %2867 = vrot.lane.b32.xlu1 %v7047_v52, %s11170_s8  ;;  %v7032_v52 = vcombine.low %v9106_v33, %v9140_v44  ;;  %v8109_v44 = vld [vmem:[%s11141_s18 + $0x88] sm:$0xff]  }
 0x398   : > { %2894 = vrot.lane.b32.xlu0 %v7056_v43, %s11172_s29  ;;  %s11233_s29 = sld [smem:[#allocation21_spill]] }
 0x39c   : > { %2903 = vrot.lane.b32.xlu0 %v7057_v7, %s11170_s8 }
 0x3d4   : > { %v2862_v11 = vpop.permute.xlu1 %2861 }
 0x3d8   : > { %v2850_v40 = vpop.permute.xlu1 %2849 }
 0x3db   : > { %v2880_v0 = vpop.permute.xlu0 %2879 }
 0x3dc   : > { %v2942_v14 = vsel %vm883_vm13, %v7048_v46, %v2880_v0 }
 0x3de   : > { %v2864_v17 = vpop.permute.xlu1 %2863 }
 0x3df   : > { %v2889_v13 = vpop.permute.xlu0 %2888 }
 0x3e0   : > { %v2953_v15 = vsel %vm2918_vm12, %v2942_v14, %v2889_v13 }
 0x3e4   : > { %v2830_v47 = vpop.permute.xlu1 %2829 }
 0x3e5   : > { %v2908_v19 = vsel %vm883_vm13, %v7032_v52, %v2830_v47 }
 0x3e6   : > { %v2920_v41 = vsel %vm2918_vm12, %v2908_v19, %v2850_v40  ;;  %v11228_v40 = vmov 0.0  }
 0x3e7   : > { %v2882_v24 = vpop.permute.xlu0 %2881  ;;  %v2929_v51 = vsel %vm2927_vm14, %v2920_v41, %v2862_v11 }
 0x3e8   : > { %v2852_v57 = vpop.permute.xlu1 %2851  ;;  %v2945_v0 = vsel %vm883_vm13, %v7049_v50, %v2882_v24 }
 0x3eb   : > { %v2891_v23 = vpop.permute.xlu0 %2890 }
 0x3ec   : > { %v2866_v60 = vpop.permute.xlu1 %2865  ;;  %v2955_v47 = vsel %vm2918_vm12, %v2945_v0, %v2891_v23 }
 0x3f2   : > { %v2898_v45 = vpop.permute.xlu0 %2897  ;;  %v2832_v38 = vpop.permute.xlu1 %2831 }
 0x3f3   : > { %v2961_v39 = vsel %vm2927_vm14, %v2953_v15, %v2898_v45  ;;  %v2911_v46 = vsel %vm883_vm13, %v9197_v6, %v2832_v38 }
 0x3f4   : > { %3167 = vmatprep.mubr.bf16.mxu1 %v2961_v39  ;;  %v2922_v13 = vsel %vm2918_vm12, %v2911_v46, %v2852_v57 }
 0x3f5   : > { %3168 = vmatmul.mubr.bf16.vlgmr.msra.gmra.mrb[24].mxu1 %v2929_v51 }
 0x3f6   : > { %v2884_v9 = vpop.permute.xlu0 %2883  ;;  %v2854_v49 = vpop.permute.xlu1 %2853  ;;  %7769 = vmatpush3.bf16.msra.mxu1 %v8108_v22  ;;  %v2932_v22 = vsel %vm2927_vm14, %v2922_v13, %v2864_v17 }
 0x3f7   : > { %7770 = vmatprep.subr.bf16.mxu1 %v8109_v44  ;;  %v2948_v50 = vsel %vm883_vm13, %v7050_v42, %v2884_v9 }
 0x3fa   : > { %v2893_v43 = vpop.permute.xlu0 %2892  ;;  %7771 = vmatpush3.bf16.msra.mxu1 %v8109_v44  ;;  %v2834_v7 = vpop.permute.xlu1 %2833 }
 0x3fb   : > { %7792 = vmatprep.subr.bf16.mxu1 %v11228_v40  ;;  %v2914_v6 = vsel %vm883_vm13, %v9256_v5, %v2834_v7  ;;  %v2957_v57 = vsel %vm2918_vm12, %v2948_v50, %v2893_v43 }
 0x3fc   : > { %v2924_v24 = vsel %vm2918_vm12, %v2914_v6, %v2854_v49 }
 0x3fd   : > { %v2935_v17 = vsel %vm2927_vm14, %v2924_v24, %v2866_v60 }
 0x3fe   : > { %v2900_v11 = vpop.permute.xlu0 %2899  ;;  %v2856_v19 = vpop.permute.xlu1 %2855 }
 0x3ff   : > { %v2964_v52 = vsel %vm2927_vm14, %v2955_v47, %v2900_v11 }
 0x400   : > { %3175 = vmatprep.mubr.bf16.mxu1 %v2964_v52 }
 0x401   : > { %3176 = vmatmul.mubr.bf16.gmra.mrb[28].mxu1 %v2932_v22 }
 0x402   : > { %v2886_v14 = vpop.permute.xlu0 %2885  ;;  %v2836_v41 = vpop.permute.xlu1 %2835 }
 0x403   : > { %v2917_v5 = vsel %vm883_vm13, %v9305_v55, %v2836_v41  ;;  %v2951_v16 = vsel %vm883_vm13, %v7051_v3, %v2886_v14  ;;  %v8110_v55 = vld [vmem:[%s11143_s20] sm:$0xff]   ;;  %v7058_v3 = vcombine.low %v9341_v58, %v9144_v31  ;;  %v8113_v58 = vld [vmem:[%s11145_s22 + $0x8] sm:$0xff]  }
 0x404   : > { %v2926_v44 = vsel %vm2918_vm12, %v2917_v5, %v2856_v19 }
 0x406   : > { %v2902_v23 = vpop.permute.xlu0 %2901  ;;  %v2868_v35 = vpop.permute.xlu1 %2867 }
 0x407   : > { %v2967_v15 = vsel %vm2927_vm14, %v2957_v57, %v2902_v23  ;;  %v2938_v60 = vsel %vm2927_vm14, %v2926_v44, %v2868_v35  ;;  %v7059_v35 = vld [vmem:[%s11142_s19] ss:$0 sm:$0xff] }
 0x408   : > { %3183 = vmatprep.mubr.bf16.mxu1 %v2967_v15 }
 0x409   : > { %3184 = vmatmul.mubr.bf16.gmra.mrb[32].mxu1 %v2935_v17 }
 0x40a   : > { %v2895_v45 = vpop.permute.xlu0 %2894 }
 0x40b   : > { %v2959_v42 = vsel %vm2918_vm12, %v2951_v16, %v2895_v45 }
 0x40e   : > { %v2904_v38 = vpop.permute.xlu0 %2903 }
 0x40f   : > { %v2970_v39 = vsel %vm2927_vm14, %v2959_v42, %v2904_v38 }
 0x410   : > { %3191 = vmatprep.mubr.bf16.mxu1 %v2970_v39 }
 0x411   : > { %3192 = vmatmul.mubr.bf16.gmra.mrb[36].mxu1 %v2938_v60 }
 0x412   : > { %7772 = vmatprep.mubr.msk.bf16.mxu1 %vm883_vm13, %v9247_v21  ;;  %v922_v21 = vadd.f32 %v9053_v61, %v870_v28  ;;  %v8112_v61 = vld [vmem:[%s11145_s22] sm:$0xff]  }
 0x413   : > { %7780 = vmatprep.subr.bf16.mxu0 %v8112_v61 }
 0x414   : > { %v928_v51 = vmul.f32 0.1, %v922_v21  ;;  %vm927_vm0 = vcmp.gt.f32.partialorder %v922_v21, 0.0  ;;  %7781 = vmatpush3.bf16.msra.mxu0 %v8112_v61 }
 0x415   : > { %7782 = vmatprep.subr.bf16.mxu0 %v8113_v58 }
 0x418   : > { %7783 = vmatpush3.bf16.msra.mxu0 %v8113_v58 }
 0x419   : > { %7773 = vmatmul.mubr.msk.bf16.vlgmr.msra.gmra.mrb[40].mxu1 %vm883_vm13, %v9311_v25  ;;  %v929_v25 = vsel %vm927_vm0, %v922_v21, %v928_v51 }
 0x41a   : > { %7776 = vmatprep.mubr.msk.bf16.mxu1 %vm883_vm13, %v9337_v1  ;;  %7793 = vmatpush3.bf16.msra.mxu1 %v8110_v55  ;;  %v9468_v1 = vpack.c.bf16 %v929_v25, %v929_v25 }
 0x41b   : > { %7794 = vmatprep.subr.bf16.mxu1 %v11228_v40 }
 0x41e   : > { %7795 = vmatpush3.bf16.msra.mxu1 %v8111_v34 }
 0x421   : > { %7777 = vmatmul.mubr.msk.bf16.gmra.mrb[44].mxu1 %vm883_vm13, %v7058_v3 }
 0x422   : > { %7796 = vmatprep.mubr.msk.bf16.mxu1 %vm8208_vm15, %v11228_v40 }
 0x429   : > { %7797 = vmatmul.mubr.msk.bf16.vlgmr.msra.gmra.mrb[48].mxu1 %vm883_vm13, %v9468_v1 }
 0x4c8   : > { %v7400_v9 = vpop.f32.mrb[24].mxu1 }
 0x4c9   : > { %v7401_v49 = vpop.f32.mrb[25].mxu1 }
 0x4ca   : > { %v7402_v46 = vadd.f32 %v7401_v49, %v7400_v9  ;;  %v7403_v43 = vpop.f32.mrb[26].mxu1 }
 0x4cb   : > { %v7404_v7 = vpop.f32.mrb[27].mxu1 }
 0x4cc   : > { %v7405_v0 = vadd.f32 %v7404_v7, %v7403_v43  ;;  %v3170_v39 = vadd.f32 %v7402_v46, %v7059_v35 }
 0x4ce   : > { %v3173_v21 = vadd.f32 %v7405_v0, %v7059_v35 }
 0x4d4   : > { %v7406_v13 = vpop.f32.mrb[28].mxu1 }
 0x4d5   : > { %v7407_v47 = vpop.f32.mrb[29].mxu1 }
 0x4d6   : > { %v7408_v11 = vadd.f32 %v7407_v47, %v7406_v13  ;;  %v7409_v52 = vpop.f32.mrb[30].mxu1 }
 0x4d7   : > { %v7410_v22 = vpop.f32.mrb[31].mxu1 }
 0x4d8   : > { %v7411_v19 = vadd.f32 %v7410_v22, %v7409_v52  ;;  %v3178_v42 = vadd.f32 %v7408_v11, %v7059_v35 }
 0x4da   : > { %v3181_v55 = vadd.f32 %v7411_v19, %v7059_v35 }
 0x4dc   : > { %v7412_v6 = vpop.f32.mrb[32].mxu1 }
 0x4dd   : > { %v7413_v14 = vpop.f32.mrb[33].mxu1 }
 0x4de   : > { %v7414_v50 = vadd.f32 %v7413_v14, %v7412_v6  ;;  %v7415_v24 = vpop.f32.mrb[34].mxu1 }
 0x4df   : > { %v7416_v57 = vpop.f32.mrb[35].mxu1 }
 0x4e0   : > { %v7417_v23 = vadd.f32 %v7416_v57, %v7415_v24  ;;  %v3186_v22 = vadd.f32 %v7414_v50, %v7059_v35 }
 0x4e4   : > { %v7418_v41 = vpop.f32.mrb[36].mxu1 }
 0x4e5   : > { %v7419_v15 = vpop.f32.mrb[37].mxu1 }
 0x4e6   : > { %v7420_v17 = vadd.f32 %v7419_v15, %v7418_v41  ;;  %v7421_v45 = vpop.f32.mrb[38].mxu1  ;;  %v3189_v41 = vadd.f32 %v7417_v23, %v7059_v35 }
 0x4e7   : > { %v7422_v5 = vpop.f32.mrb[39].mxu1 }
 0x4e8   : > { %v7423_v16 = vadd.f32 %v7422_v5, %v7421_v45  ;;  %v3194_v46 = vadd.f32 %v7420_v17, %v7059_v35 }
 0x4ea   : > { %v3197_v14 = vadd.f32 %v7423_v16, %v7059_v35 }
 0x4ec   : > { %v7774_v38 = vpop.f32.mrb[40].mxu1 }
 0x4ed   : > { %v3243_v44 = vadd.f32 %v7774_v38, %v3178_v42  ;;  %v3234_v60 = vpop.f32.mrb[41].mxu1 }
 0x4ee   : > { %v3235_v28 = vadd.f32 %v3234_v60, %v3170_v39  ;;  %v7775_v34 = vpop.f32.mrb[42].mxu1 }
 0x4ef   : > { %v3275_v3 = vmul.f32 0.1, %v3243_v44  ;;  %v3246_v51 = vadd.f32 %v7775_v34, %v3181_v55  ;;  %v3237_v25 = vpop.f32.mrb[43].mxu1  ;;  %vm3267_vm1 = vcmp.gt.f32.partialorder %v3243_v44, 0.0 }
 0x4f0   : > { %v3273_v61 = vmul.f32 0.1, %v3235_v28  ;;  %v3238_v58 = vadd.f32 %v3237_v25, %v3173_v21  ;;  %vm3265_vm6 = vcmp.gt.f32.partialorder %v3235_v28, 0.0  ;;  %v8116_v25 = vld [vmem:[%s11147_s24 + $0x48] sm:$0xff]  }
 0x4f1   : > { %vm3268_vm7 = vcmp.gt.f32.partialorder %v3246_v51, 0.0  ;;  %v3276_v9 = vmul.f32 0.1, %v3246_v51  ;;  %v3283_v43 = vsel %vm3267_vm1, %v3243_v44, %v3275_v3  ;;  %v8114_v3 = vld [vmem:[%s11147_s24 + $0x40] sm:$0xff]  }
 0x4f2   : > { %vm3266_vm8 = vcmp.gt.f32.partialorder %v3238_v58, 0.0  ;;  %v3274_v49 = vmul.f32 0.1, %v3238_v58  ;;  %v3281_v13 = vsel %vm3265_vm6, %v3235_v28, %v3273_v61  ;;  %v8118_v61 = vld [vmem:[%s11147_s24 + $0xc0] sm:$0xff]   ;;  %7439 = vmatprep.subr.bf16.mxu0 %v8114_v3 }
 0x4f3   : > { %v3284_v7 = vsel %vm3268_vm7, %v3246_v51, %v3276_v9  ;;  %v8115_v51 = vld [vmem:[%s11147_s24] sm:$0xff]   ;;  %v8122_v9 = vld [vmem:[%s11147_s24 + $0xc8] sm:$0xff]   ;;  %7479 = vmatprep.subr.bf16.mxu1 %v8118_v61 }
 0x4f4   : > { %v3290_v47 = vpack.c.bf16 %v3284_v7, %v3283_v43  ;;  %v3282_v11 = vsel %vm3266_vm8, %v3238_v58, %v3274_v49  ;;  %v7778_v52 = vpop.f32.mrb[44].mxu1  ;;  %v8119_v58 = vld [vmem:[%s11147_s24 + $0x80] sm:$0xff]   ;;  %v8117_v49 = vld [vmem:[%s11147_s24 + $0x8] sm:$0xff]   ;;  %v8120_v43 = vld [vmem:[%s11147_s24 + $0x50] sm:$0xff]  }
 0x4f5   : > { %v3289_v0 = vpack.c.bf16 %v3282_v11, %v3281_v13  ;;  %v3259_v19 = vadd.f32 %v7778_v52, %v3194_v46  ;;  %v3250_v6 = vpop.f32.mrb[45].mxu1  ;;  %7480 = vmatpush3.bf16.msra.mxu1 %v8119_v58  ;;  %v8123_v7 = vld [vmem:[%s11147_s24 + $0x88] sm:$0xff]   ;;  %v8126_v46 = vld [vmem:[%s11147_s24 + $0xd0] sm:$0xff]   ;;  %v8130_v52 = vld [vmem:[%s11147_s24 + $0xd8] sm:$0xff]  }
 0x4f6   : > { %v3251_v24 = vadd.f32 %v3250_v6, %v3186_v22  ;;  %v7779_v57 = vpop.f32.mrb[46].mxu1  ;;  %7481 = vmatprep.subr.bf16.mxu1 %v8122_v9  ;;  %v8121_v13 = vld [vmem:[%s11147_s24 + $0x10] sm:$0xff]   ;;  %v8125_v22 = vld [vmem:[%s11147_s24 + $0x18] sm:$0xff]   ;;  %v8134_v6 = vld [vmem:[%s11147_s24 + $0xe0] sm:$0xff]  }
 0x4f7   : > { %v3279_v15 = vmul.f32 0.1, %v3259_v19  ;;  %v3262_v45 = vadd.f32 %v7779_v57, %v3197_v14  ;;  %v3253_v5 = vpop.f32.mrb[47].mxu1  ;;  %7784 = vmatprep.mubr.msk.bf16.mxu0 %vm883_vm13, %v3289_v0  ;;  %vm3271_vm9 = vcmp.gt.f32.partialorder %v3259_v19, 0.0  ;;  %v8127_v11 = vld [vmem:[%s11147_s24 + $0x90] sm:$0xff]   ;;  %v8128_v0 = vld [vmem:[%s11147_s24 + $0x60] sm:$0xff]  }
 0x4f8   : > { %v3277_v42 = vmul.f32 0.1, %v3251_v24  ;;  %v3254_v17 = vadd.f32 %v3253_v5, %v3189_v41  ;;  %7785 = vmatmul.mubr.msk.bf16.vlgmr.msra.gmra.mrb[32].mxu0 %vm883_vm13, %v3290_v47  ;;  %vm3269_vm0 = vcmp.gt.f32.partialorder %v3251_v24, 0.0  ;;  %v8124_v47 = vld [vmem:[%s11147_s24 + $0x58] sm:$0xff]   ;;  %v8129_v14 = vld [vmem:[%s11147_s24 + $0x20] sm:$0xff]   ;;  %v8133_v57 = vld [vmem:[%s11147_s24 + $0x28] sm:$0xff]   ;;  %v3454_v41 = vlaneseq }
 0x4f9   : > { %vm3272_vm1 = vcmp.gt.f32.partialorder %v3262_v45, 0.0  ;;  %v3280_v50 = vmul.f32 0.1, %v3262_v45  ;;  %v3287_v39 = vsel %vm3271_vm9, %v3259_v19, %v3279_v15  ;;  %7440 = vmatpush3.bf16.msra.mxu0 %v8115_v51  ;;  %7482 = vmatpush3.bf16.msra.mxu1 %v8123_v7  ;;  %v8131_v19 = vld [vmem:[%s11147_s24 + $0x98] sm:$0xff]   ;;  %v3452_v5 = vld [vmem:[%s11144_s21] sm:$0x1] }
 0x4fa   : > { %vm3270_vm6 = vcmp.gt.f32.partialorder %v3254_v17, 0.0  ;;  %v3278_v38 = vmul.f32 0.1, %v3254_v17  ;;  %v3285_v44 = vsel %vm3269_vm0, %v3251_v24, %v3277_v42  ;;  %7441 = vmatprep.subr.bf16.mxu0 %v8116_v25  ;;  %7483 = vmatprep.subr.bf16.mxu1 %v8126_v46  ;;  %v8132_v24 = vld [vmem:[%s11147_s24 + $0x68] sm:$0xff]  }
 0x4fb   : > { %v3288_v16 = vsel %vm3272_vm1, %v3262_v45, %v3280_v50  ;;  %v9548_v45 = vshrl.u32 %v3454_v41, 7  ;;  %v7082_v50 = vld [vmem:[%s11146_s23] ss:$0 sm:$0xff] }
 0x4fc   : > { %v3292_v60 = vpack.c.bf16 %v3288_v16, %v3287_v39  ;;  %v3286_v23 = vsel %vm3270_vm6, %v3254_v17, %v3278_v38  ;;  %v3446_v35 = vpop.f32.mrb[48].mxu1 }
 0x4fd   : > { %v3291_v55 = vpack.c.bf16 %v3286_v23, %v3285_v44  ;;  %v7798_v28 = vpop.f32.mrb[49].mxu1  ;;  %7442 = vmatpush3.bf16.msra.mxu0 %v8117_v49  ;;  %7484 = vmatpush3.bf16.msra.mxu1 %v8127_v11  ;;  %v3447_v15 = vadd.f32 1.0, %v3446_v35  ;;  %11230 = vst [vmem:[#allocation11_spill] sm:$0xff] %v9548_v45  ;;  %v11176_v17 = vsub.s32 0, %v9548_v45 }
 0x4fe   : > { %v3449_v34 = vpop.f32.mrb[50].mxu1  ;;  %7443 = vmatprep.subr.bf16.mxu0 %v8120_v43  ;;  %7485 = vmatprep.subr.bf16.mxu1 %v8130_v52 }
 0x4ff   : > { %7788 = vmatprep.mubr.msk.bf16.mxu0 %vm883_vm13, %v3291_v55  ;;  %v7799_v21 = vpop.f32.mrb[51].mxu1  ;;  %v3453_v42 = vadd.f32 %v3452_v5, %v3447_v15  ;;  %v8136_v15 = vld [vmem:[%s11147_s24 + $0x70] sm:$0xff]  }
 0x500   : > { %7789 = vmatmul.mubr.msk.bf16.gmra.mrb[36].mxu0 %vm883_vm13, %v3292_v60  ;;  %v8137_v5 = vld [vmem:[%s11147_s24 + $0x30] sm:$0xff]  }
 0x501   : > { %7444 = vmatpush3.bf16.msra.mxu0 %v8121_v13  ;;  %7486 = vmatpush3.bf16.msra.mxu1 %v8131_v19  ;;  %v9559_v39 = vrot.slane %v3453_v42, %v11176_v17 }
 0x502   : > { %7445 = vmatprep.subr.bf16.mxu0 %v8124_v47  ;;  %7487 = vmatprep.subr.bf16.mxu1 %v8134_v6  ;;  %v8135_v47 = vld [vmem:[%s11147_s24 + $0xa0] sm:$0xff]  }
 0x505   : > { %7446 = vmatpush3.bf16.msra.mxu0 %v8125_v22  ;;  %7488 = vmatpush3.bf16.msra.mxu1 %v8135_v47 }
 0x506   : > { %7447 = vmatprep.subr.bf16.mxu0 %v8128_v0 }
 0x509   : > { %7448 = vmatpush3.bf16.msra.mxu0 %v8129_v14 }
 0x50a   : > { %7449 = vmatprep.subr.bf16.mxu0 %v8132_v24 }
 0x50d   : > { %7450 = vmatpush3.bf16.msra.mxu0 %v8133_v57 }
 0x50e   : > { %7451 = vmatprep.subr.bf16.mxu0 %v8136_v15 }
 0x511   : > { %7452 = vmatpush3.bf16.msra.mxu0 %v8137_v5 }
 0x5cb   : > { %v7786_v38 = vpop.f32.mrb[32].mxu0 }
 0x5cc   : > { %v3371_v16 = vadd.f32 %v7786_v38, %v7082_v50  ;;  %v3362_v44 = vpop.f32.mrb[33].mxu0 }
 0x5cd   : > { %v3363_v60 = vadd.f32 %v7082_v50, %v3362_v44  ;;  %v7787_v23 = vpop.f32.mrb[34].mxu0 }
 0x5ce   : > { %v3460_v35 = vmul.f32 %v9559_v39, %v3371_v16  ;;  %v3374_v55 = vadd.f32 %v7787_v23, %v7082_v50  ;;  %v3365_v28 = vpop.f32.mrb[35].mxu0  ;;  %v8138_v23 = vld [vmem:[%s11147_s24 + $0xe8] sm:$0xff]  }
 0x5cf   : > { %v3458_v34 = vmul.f32 %v9559_v39, %v3363_v60  ;;  %v3366_v21 = vadd.f32 %v7082_v50, %v3365_v28  ;;  %7489 = vmatprep.subr.bf16.mxu1 %v8138_v23 }
 0x5d0   : > { %v7314_v3 = vpack.c.bf16 %v3460_v35, %v3460_v35  ;;  %v3461_v51 = vmul.f32 %v9559_v39, %v3374_v55 }
 0x5d1   : > { %v7312_v25 = vpack.c.bf16 %v3458_v34, %v3458_v34  ;;  %v3459_v61 = vmul.f32 %v9559_v39, %v3366_v21  ;;  %v8139_v21 = vld [vmem:[%s11147_s24 + $0xa8] sm:$0xff]  }
 0x5d2   : > { %v3505_v58 = vshrl.u32 %v7314_v3, 16  ;;  %v7315_v9 = vpack.c.bf16 %v3461_v51, %v3461_v51  ;;  %v3508_v49 = vshll.u32 %v7314_v3, 16  ;;  %v8140_v3 = vld [vmem:[%s11147_s24 + $0x78] sm:$0xff]   ;;  %7490 = vmatpush3.bf16.msra.mxu1 %v8139_v21 }
 0x5d3   : > { %v3491_v43 = vshrl.u32 %v7312_v25, 16  ;;  %v3494_v7 = vshll.u32 %v7312_v25, 16  ;;  %v7313_v46 = vpack.c.bf16 %v3459_v61, %v3459_v61  ;;  %v7790_v13 = vpop.f32.mrb[36].mxu0  ;;  %7453 = vmatprep.subr.bf16.mxu0 %v8140_v3  ;;  %v8143_v3 = vld [vmem:[%s11147_s24 + $0xb0] sm:$0xff]  }
 0x5d4   : > { %v3507_v11 = vrot.slane %v3505_v58, 7  ;;  %v3512_v52 = vshrl.u32 %v7315_v9, 16  ;;  %v3515_v22 = vshll.u32 %v7315_v9, 16  ;;  %v3387_v0 = vadd.f32 %v7790_v13, %v7082_v50  ;;  %v3378_v19 = vpop.f32.mrb[37].mxu0  ;;  %v8142_v9 = vld [vmem:[%s11147_s24 + $0xf0] sm:$0xff]  }
 0x5d5   : > { %v3493_v6 = vrot.slane %v3491_v43, 7  ;;  %v3498_v14 = vshrl.u32 %v7313_v46, 16  ;;  %v3501_v24 = vshll.u32 %v7313_v46, 16  ;;  %v3379_v57 = vadd.f32 %v7082_v50, %v3378_v19  ;;  %v7791_v41 = vpop.f32.mrb[38].mxu0  ;;  %7491 = vmatprep.subr.bf16.mxu1 %v8142_v9 }
 0x5d6   : > { %v3510_v42 = vor.u32 %v3508_v49, %v3507_v11  ;;  %v3514_v38 = vrot.slane %v3512_v52, 7  ;;  %v3464_v16 = vmul.f32 %v9559_v39, %v3387_v0  ;;  %v3390_v44 = vadd.f32 %v7791_v41, %v7082_v50  ;;  %v3381_v60 = vpop.f32.mrb[39].mxu0  ;;  %7492 = vmatpush3.bf16.msra.mxu1 %v8143_v3 }
 0x5d7   : > { %v3496_v35 = vor.u32 %v3494_v7, %v3493_v6  ;;  %v3500_v55 = vrot.slane %v3498_v14, 7  ;;  %v3462_v28 = vmul.f32 %v9559_v39, %v3379_v57  ;;  %v3382_v34 = vadd.f32 %v7082_v50, %v3381_v60  ;;  %v8141_v50 = vld [vmem:[%s11147_s24 + $0x38] sm:$0xff]  }
 0x5d8   : > { %v3556_v51 = vsel %vm8354_vm2, 0, %v3510_v42  ;;  %v3517_v25 = vor.u32 %v3515_v22, %v3514_v38  ;;  %v7318_v61 = vpack.c.bf16 %v3464_v16, %v3464_v16  ;;  %v3465_v58 = vmul.f32 %v9559_v39, %v3390_v44  ;;  %7454 = vmatpush3.bf16.msra.mxu0 %v8141_v50 }
 0x5d9   : > { %v9596_v49 = vsel %vm9099_vm5, %v3556_v51, 0  ;;  %v3554_v43 = vsel %vm8354_vm2, 0, %v3496_v35  ;;  %v3503_v7 = vor.u32 %v3501_v24, %v3500_v55  ;;  %v7316_v46 = vpack.c.bf16 %v3462_v28, %v3462_v28 }
 0x5da   : > { %v9602_v13 = vcombine.low %v9596_v49, %v9596_v49  ;;  %v9606_v47 = vcombine.high %v9596_v49, %v9596_v49  ;;  %v9610_v11 = vsel %vm9099_vm5, %v3554_v43, 0  ;;  %v3557_v52 = vsel %vm8354_vm2, 0, %v3517_v25  ;;  %v8144_v43 = vld [vmem:[%s11147_s24 + $0xf8] sm:$0xff]  }
 0x5db   : > { %v9616_v22 = vcombine.low %v9610_v11, %v9610_v11  ;;  %v9620_v0 = vcombine.high %v9610_v11, %v9610_v11  ;;  %v9624_v19 = vsel %vm9099_vm5, %v3557_v52, 0  ;;  %v3555_v6 = vsel %vm8354_vm2, 0, %v3503_v7  ;;  %7493 = vmatprep.subr.bf16.mxu1 %v8144_v43 }
 0x5dc   : > { %v9630_v14 = vcombine.low %v9624_v19, %v9624_v19  ;;  %v9634_v24 = vcombine.high %v9624_v19, %v9624_v19  ;;  %v9638_v57 = vsel %vm9099_vm5, %v3555_v6, 0  ;;  %v3533_v41 = vshrl.u32 %v7318_v61, 16 }
 0x5dd   : > { %v9642_v15 = vcombine.low %v9638_v57, %v9638_v57  ;;  %v9646_v5 = vcombine.high %v9638_v57, %v9638_v57  ;;  %v3536_v42 = vshll.u32 %v7318_v61, 16  ;;  %v3519_v38 = vshrl.u32 %v7316_v46, 16 }
 0x5de   : > { %v3535_v16 = vrot.slane %v3533_v41, 7  ;;  %v3522_v44 = vshll.u32 %v7316_v46, 16  ;;  %v7319_v60 = vpack.c.bf16 %v3465_v58, %v3465_v58  ;;  %v3463_v23 = vmul.f32 %v9559_v39, %v3382_v34 }
 0x5df   : > { %v3521_v35 = vrot.slane %v3519_v38, 7  ;;  %v7136_v55 = vcombine.low %v9610_v11, %v9638_v57  ;;  %v7137_v28 = vcombine.low %v9596_v49, %v9624_v19  ;;  %v3606_v21 = vshrl.u32 %v9616_v22, 16 }
 0x5e0   : > { %v3538_v51 = vor.u32 %v3536_v42, %v3535_v16  ;;  %v3540_v25 = vshrl.u32 %v7319_v60, 16  ;;  %v3543_v61 = vshll.u32 %v7319_v60, 16  ;;  %v7317_v50 = vpack.c.bf16 %v3463_v23, %v3463_v23 }
 0x5e1   : > { %v3524_v58 = vor.u32 %v3522_v44, %v3521_v35  ;;  %3792 = vrot.lane.b32.xlu0 %v7136_v55, %s11231_s0  ;;  %v3608_v39 = vrot.slane %v3606_v21, 4  ;;  %v3609_v34 = vshll.u32 %v9616_v22, 16  ;;  %v3615_v9 = vshll.u32 %v9620_v0, 16  ;;  %v8145_v55 = vld [vmem:[%s11147_s24 + $0xb8] sm:$0xff]  }
 0x5e2   : > { %v3560_v7 = vsel %vm8354_vm2, 0, %v3538_v51  ;;  %v3542_v46 = vrot.slane %v3540_v25, 7  ;;  %v3526_v52 = vshrl.u32 %v7317_v50, 16  ;;  %v3529_v6 = vshll.u32 %v7317_v50, 16  ;;  %7494 = vmatpush3.bf16.msra.mxu1 %v8145_v55 }
 0x5e3   : > { %v9667_v41 = vsel %vm9099_vm5, %v3560_v7, 0  ;;  %v3558_v42 = vsel %vm8354_vm2, 0, %v3524_v58  ;;  %v3611_v38 = vrot.slane %v3609_v34, 5  ;;  %v3617_v16 = vrot.slane %v3615_v9, 5 }
 0x5e4   : > { %v9673_v44 = vcombine.low %v9667_v41, %v9667_v41  ;;  %v9677_v60 = vcombine.high %v9667_v41, %v9667_v41  ;;  %v9681_v23 = vsel %vm9099_vm5, %v3558_v42, 0  ;;  %v3545_v35 = vor.u32 %v3543_v61, %v3542_v46 }
 0x5e5   : > { %v9688_v21 = vcombine.low %v9681_v23, %v9681_v23  ;;  %v9692_v3 = vcombine.high %v9681_v23, %v9681_v23  ;;  %v3528_v51 = vrot.slane %v3526_v52, 7  ;;  %3794 = vrot.lane.b32.xlu0 %v7137_v28, %s11231_s0  ;;  %v3612_v25 = vor.u32 %v3611_v38, %v3608_v39 }
 0x5e6   : > { %v3561_v50 = vsel %vm8354_vm2, 0, %v3545_v35  ;;  %v7114_v61 = vrot.slane %v9616_v22, 9  ;;  %v3705_v58 = vrot.slane %v9620_v0, 5  ;;  %v7115_v34 = vrot.slane %v9642_v15, 9 }
 0x5e7   : > { %v9702_v9 = vsel %vm9099_vm5, %v3561_v50, 0  ;;  %v3531_v43 = vor.u32 %v3529_v6, %v3528_v51  ;;  %v3613_v7 = vrot.slane %v3612_v25, 4  ;;  %v3709_v46 = vrot.slane %v9646_v5, 5 }
 0x5e8   : > { %v9707_v28 = vcombine.low %v9702_v9, %v9702_v9  ;;  %v9711_v22 = vcombine.high %v9702_v9, %v9702_v9  ;;  %v9715_v0 = vsel %vm9123_vm10, %v7114_v61, %v3705_v58  ;;  %v3620_v39 = vshrl.u32 %v9642_v15, 16 }
 0x5e9   : > { %v3559_v52 = vsel %vm8354_vm2, 0, %v3531_v43  ;;  %v9722_v6 = vsel %vm9131_vm11, %v3613_v7, %v3617_v16  ;;  %v9726_v42 = vsel %vm9123_vm10, %v7115_v34, %v3709_v46  ;;  %v3623_v38 = vshll.u32 %v9642_v15, 16 }
 0x5ea   : > { %v9731_v35 = vsel %vm9099_vm5, %v3559_v52, 0  ;;  %v7128_v55 = vcombine.low %v9161_v4, %v9722_v6  ;;  %v7144_v51 = vcombine.low %v9715_v0, %v9726_v42  ;;  %v3622_v25 = vrot.slane %v3620_v39, 4 }
 0x5eb   : > { %v9739_v16 = vcombine.low %v9731_v35, %v9731_v35  ;;  %v9743_v50 = vcombine.high %v9731_v35, %v9731_v35  ;;  %v7138_v26 = vcombine.low %v9681_v23, %v9731_v35  ;;  %v3625_v15 = vrot.slane %v3623_v38, 5 }
 0x5ec   : > { %3769 = vrot.lane.b32.xlu1 %v7128_v55, %s11231_s0  ;;  %v3629_v61 = vshll.u32 %v9646_v5, 16  ;;  %v3634_v58 = vshrl.u32 %v9602_v13, 16  ;;  %v3637_v34 = vshll.u32 %v9602_v13, 16  ;;  %v3643_v43 = vshll.u32 %v9606_v47, 16 }
 0x5ed   : > { %3796 = vrot.lane.b32.xlu0 %v7138_v26, %s11231_s0  ;;  %v3626_v7 = vor.u32 %v3625_v15, %v3622_v25  ;;  %v3648_v46 = vshrl.u32 %v9630_v14, 16  ;;  %v3651_v39 = vshll.u32 %v9630_v14, 16  ;;  %v3657_v52 = vshll.u32 %v9634_v24, 16 }
 0x5ee   : > { %v3631_v38 = vrot.slane %v3629_v61, 5  ;;  %v3636_v17 = vrot.slane %v3634_v58, 4  ;;  %v3639_v55 = vrot.slane %v3637_v34, 5  ;;  %v3645_v2 = vrot.slane %v3643_v43, 5 }
 0x5ef   : > { %v3627_v5 = vrot.slane %v3626_v7, 4  ;;  %v3650_v45 = vrot.slane %v3648_v46, 4  ;;  %v3653_v54 = vrot.slane %v3651_v39, 5  ;;  %v3659_v56 = vrot.slane %v3657_v52, 5 }
 0x5f0   : > { %v3640_v27 = vor.u32 %v3639_v55, %v3636_v17  ;;  %v3662_v30 = vshrl.u32 %v9688_v21, 16  ;;  %v3665_v26 = vshll.u32 %v9688_v21, 16  ;;  %v3671_v25 = vshll.u32 %v9692_v3, 16 }
 0x5f1   : > { %3810 = vrot.lane.b32.xlu0 %v7144_v51, %s11231_s0  ;;  %v9762_v15 = vsel %vm9131_vm11, %v3627_v5, %v3631_v38  ;;  %v3654_v61 = vor.u32 %v3653_v54, %v3650_v45  ;;  %v3676_v58 = vshrl.u32 %v9739_v16, 16  ;;  %v3679_v34 = vshll.u32 %v9739_v16, 16 }
 0x5f2   : > { %v3641_v43 = vrot.slane %v3640_v27, 4  ;;  %v3664_v7 = vrot.slane %v3662_v30, 4  ;;  %v3667_v17 = vrot.slane %v3665_v26, 5  ;;  %v3673_v46 = vrot.slane %v3671_v25, 5  ;;  %v9782_v25 = vld [vmem:[%s11147_s24 + $0x100] sm:$0xff]  }
 0x5f3   : > { %v3655_v39 = vrot.slane %v3654_v61, 4  ;;  %v3678_v52 = vrot.slane %v3676_v58, 4  ;;  %v3681_v55 = vrot.slane %v3679_v34, 5  ;;  %v3685_v20 = vshll.u32 %v9743_v50, 16  ;;  %7800 = vmatprep.subr.bf16.mxu0 %v9782_v25 }
 0x5f4   : > { %v9769_v51 = vsel %vm9131_vm11, %v3641_v43, %v3645_v2  ;;  %v3668_v38 = vor.u32 %v3667_v17, %v3664_v7  ;;  %v3690_v54 = vshrl.u32 %v9673_v44, 16  ;;  %v3693_v45 = vshll.u32 %v9673_v44, 16 }
 0x5f5   : > { %v7129_v27 = vcombine.low %v9762_v15, %v9769_v51  ;;  %v9777_v30 = vsel %vm9131_vm11, %v3655_v39, %v3659_v56  ;;  %v3682_v5 = vor.u32 %v3681_v55, %v3678_v52  ;;  %v3687_v26 = vrot.slane %v3685_v20, 5 }
 0x5f6   : > { %v3669_v2 = vrot.slane %v3668_v38, 4  ;;  %v3692_v61 = vrot.slane %v3690_v54, 4  ;;  %v3695_v58 = vrot.slane %v3693_v45, 5  ;;  %v3699_v34 = vshll.u32 %v9677_v60, 16 }
 0x5f7   : > { %3771 = vrot.lane.b32.xlu1 %v7129_v27, %s11231_s0  ;;  %v3683_v43 = vrot.slane %v3682_v5, 4  ;;  %v7139_v7 = vcombine.low %v9667_v41, %v9702_v9  ;;  %v7118_v56 = vrot.slane %v9688_v21, 9  ;;  %v3721_v20 = vrot.slane %v9692_v3, 5 }
 0x5f8   : > { %v9793_v17 = vsel %vm9131_vm11, %v3669_v2, %v3673_v46  ;;  %v3696_v39 = vor.u32 %v3695_v58, %v3692_v61  ;;  %v3701_v52 = vrot.slane %v3699_v34, 5  ;;  %v7119_v55 = vrot.slane %v9739_v16, 9 }
 0x5f9   : > { %v7130_v38 = vcombine.low %v9777_v30, %v9793_v17  ;;  %v9800_v54 = vsel %vm9131_vm11, %v3683_v43, %v3687_v26  ;;  %v3722_v21 = vsel %vm9123_vm10, %v7118_v56, %v3721_v20  ;;  %v3725_v3 = vrot.slane %v9743_v50, 5 }
 0x5fa   : > { %v3697_v45 = vrot.slane %v3696_v39, 4  ;;  %v7116_v46 = vrot.slane %v9602_v13, 9  ;;  %v3713_v27 = vrot.slane %v9606_v47, 5  ;;  %v7117_v5 = vrot.slane %v9630_v14, 9 }
 0x5fb   : > { %3773 = vrot.lane.b32.xlu1 %v7130_v38, %s11231_s0  ;;  %v3726_v16 = vsel %vm9123_vm10, %v7119_v55, %v3725_v3  ;;  %v3717_v26 = vrot.slane %v9634_v24, 5  ;;  %v7120_v2 = vrot.slane %v9673_v44, 9  ;;  %v3729_v61 = vrot.slane %v9677_v60, 5 }
 0x5fc   : > { %v9816_v50 = vsel %vm9131_vm11, %v3697_v45, %v3701_v52  ;;  %v7146_v13 = vcombine.low %v3722_v21, %v3726_v16  ;;  %v7123_v47 = vrot.slane %v9707_v28, 9  ;;  %v3714_v58 = vsel %vm9123_vm10, %v7116_v46, %v3713_v27 }
 0x5fd   : > { %v7131_v14 = vcombine.low %v9800_v54, %v9816_v50  ;;  %v3718_v24 = vsel %vm9123_vm10, %v7117_v5, %v3717_v26  ;;  %v3752_v44 = vrot.slane %v9711_v22, 5  ;;  %v3737_v60 = vshrl.u32 %v9707_v28, 16  ;;  %v8147_v26 = vld [vmem:[%s11147_s24 + $0x108] sm:$0xff]  }
 0x5fe   : > { %v7145_v34 = vcombine.low %v3714_v58, %v3718_v24  ;;  %v3740_v43 = vshll.u32 %v9707_v28, 16  ;;  %v3730_v56 = vsel %vm9123_vm10, %v7120_v2, %v3729_v61  ;;  %v3746_v38 = vshll.u32 %v9711_v22, 16 }
 0x5ff   : > { %3775 = vrot.lane.b32.xlu0 %v7131_v14, %s11231_s0  ;;  %3798 = vrot.lane.b32.xlu1 %v7139_v7, %s11231_s0  ;;  %v9834_v20 = vsel %vm9123_vm10, %v7123_v47, %v3752_v44  ;;  %v3739_v52 = vrot.slane %v3737_v60, 4  ;;  %v9839_v3 = vcombine.low %v9726_v42, %v3714_v58  ;;  %v7140_v28 = vcombine.low %v9722_v6, %v9762_v15 }
 0x600   : > { %v7147_v39 = vcombine.low %v3730_v56, %v9834_v20  ;;  %v3742_v55 = vrot.slane %v3740_v43, 5  ;;  %v7125_v7 = vcombine.low %v9638_v57, %v9596_v49  ;;  %v7126_v29 = vcombine.low %v9624_v19, %v9681_v23 }
 0x601   : > { %v9847_v46 = vcombine.low %v3718_v24, %v3722_v21  ;;  %v7141_v27 = vcombine.low %v9769_v51, %v9777_v30  ;;  %v9851_v5 = vcombine.low %v3726_v16, %v3730_v56  ;;  %v7127_v22 = vcombine.low %v9731_v35, %v9667_v41  ;;  %v8150_v41 = vld [vmem:[%s11232_s11] sm:$0xff]  }
 0x602   : > { %v3743_v45 = vor.u32 %v3742_v55, %v3739_v52  ;;  %v7142_v49 = vcombine.low %v9793_v17, %v9800_v54  ;;  %v3748_v19 = vrot.slane %v3746_v38, 5  ;;  %7816 = vmatprep.subr.bf16.mxu1 %v8150_v41  ;;  %v7132_v36 = vcombine.low %v9144_v31, %v9715_v0 }
 0x603   : > { %3814 = vrot.lane.b32.xlu0 %v7146_v13, %s11231_s0  ;;  %3812 = vrot.lane.b32.xlu1 %v7145_v34, %s11231_s0  ;;  %v7124_v21 = vcombine.low %v9106_v33, %v9610_v11  ;;  %v8148_v11 = vld [vmem:[%s11147_s24 + $0x110] sm:$0xff]   ;;  %v8149_v13 = vld [vmem:[%s11147_s24 + $0x118] sm:$0xff]   ;;  %v7150_v17 = vcombine.low %v9834_v20, %v9144_v31 }
 0x604   : > { %v3744_v57 = vrot.slane %v3743_v45, 4  ;;  %v8152_v45 = vld [vmem:[%s11233_s29] sm:$0xff]  }
 0x605   : > { %v9980_v20 = vld [vmem:[%s11148_s25] ss:$0 sm:$0xff] }
 0x606   : > { %v9861_v23 = vsel %vm9131_vm11, %v3744_v57, %v3748_v19 }
 0x607   : > { %3816 = vrot.lane.b32.xlu0 %v7147_v39, %s11231_s0  ;;  %v7149_v6 = vcombine.low %v9861_v23, %v9161_v4  ;;  %v7143_v42 = vcombine.low %v9816_v50, %v9861_v23 }
 0x609   : > { %3820 = vrot.lane.b32.xlu1 %v7149_v6, %s11231_s0 }
 0x60b   : > { %5545 = vrot.lane.b32.xlu0 %v8383_v18, %s11227_s1 }
 0x60f   : > { %5577 = vrot.lane.b32.xlu0 %v8371_v10, %s11231_s0 }
 0x653   : > { %v3793_v4 = vpop.permute.xlu0 %3792 }
 0x654   : > { %v3841_v35 = vsel %vm2918_vm12, %v7132_v36, %v3793_v4 }
 0x655   : > { %4211 = vmatprep.mubr.bf16.mxu0 %v3841_v35 }
 0x657   : > { %v3795_v15 = vpop.permute.xlu0 %3794 }
 0x658   : > { %v3845_v61 = vsel %vm2918_vm12, %v9839_v3, %v3795_v15 }
 0x65e   : > { %v3770_v16 = vpop.permute.xlu1 %3769 }
 0x65f   : > { %v3825_v2 = vsel %vm2918_vm12, %v7124_v21, %v3770_v16  ;;  %v3797_v0 = vpop.permute.xlu0 %3796 }
 0x660   : > { %4212 = vmatmul.mubr.bf16.vlgmr.msra.gmra.mrb[40].mxu0 %v3825_v2  ;;  %v3849_v44 = vsel %vm2918_vm12, %v9847_v46, %v3797_v0 }
 0x661   : > { %4219 = vmatprep.mubr.bf16.mxu0 %v3845_v61  ;;  %7801 = vmatpush3.bf16.msra.mxu0 %v9782_v25  ;;  %v8151_v25 = vld [vmem:[%s11232_s11 + $0x8] sm:$0xff]   ;;  %s11241_s11 = sld [smem:[#allocation22_spill]] }
 0x662   : > { %7802 = vmatprep.subr.bf16.mxu0 %v8147_v26 }
 0x663   : > { %v3811_v47 = vpop.permute.xlu0 %3810 }
 0x664   : > { %v3857_v24 = vsel %vm2918_vm12, %v7140_v28, %v3811_v47 }
 0x665   : > { %7803 = vmatpush3.bf16.msra.mxu0 %v8147_v26 }
 0x666   : > { %7804 = vmatprep.subr.bf16.mxu0 %v8148_v11 }
 0x669   : > { %v3772_v14 = vpop.permute.xlu1 %3771  ;;  %7805 = vmatpush3.bf16.msra.mxu0 %v8148_v11 }
 0x66a   : > { %v3829_v58 = vsel %vm2918_vm12, %v7125_v7, %v3772_v14  ;;  %7806 = vmatprep.subr.bf16.mxu0 %v8149_v13 }
 0x66b   : > { %4276 = vmatprep.mubr.bf16.mxu1 %v3829_v58  ;;  %4220 = vmatmul.mubr.bf16.gmra.mrb[44].mxu0 %v3829_v58 }
 0x66c   : > { %4277 = vmatmul.mubr.bf16.vlgmr.msra.gmra.mrb[52].mxu1 %v3857_v24  ;;  %4227 = vmatprep.mubr.bf16.mxu0 %v3849_v44 }
 0x66d   : > { %v3774_v34 = vpop.permute.xlu1 %3773  ;;  %7807 = vmatpush3.bf16.msra.mxu0 %v8149_v13  ;;  %7817 = vmatpush3.bf16.msra.mxu1 %v8150_v41 }
 0x66e   : > { %v3833_v60 = vsel %vm2918_vm12, %v7126_v29, %v3774_v34  ;;  %7818 = vmatprep.subr.bf16.mxu1 %v8151_v25  ;;  %7892 = vmatprep.subr.bf16.mxu0 %v11228_v40  ;;  %v7148_v29 = vcombine.low %v9702_v9, %v9106_v33  ;;  %v8153_v33 = vld [vmem:[%s11233_s29 + $0x8] sm:$0xff]  }
 0x66f   : > { %4284 = vmatprep.mubr.bf16.mxu1 %v3833_v60 }
 0x671   : > { %v3799_v43 = vpop.permute.xlu1 %3798  ;;  %7819 = vmatpush3.bf16.msra.mxu1 %v8151_v25  ;;  %v3776_v39 = vpop.permute.xlu0 %3775 }
 0x672   : > { %v3853_v56 = vsel %vm2918_vm12, %v9851_v5, %v3799_v43  ;;  %v3837_v38 = vsel %vm2918_vm12, %v7127_v22, %v3776_v39 }
 0x673   : > { %4228 = vmatmul.mubr.bf16.gmra.mrb[48].mxu0 %v3833_v60 }
 0x674   : > { %4235 = vmatprep.mubr.bf16.mxu0 %v3853_v56 }
 0x675   : > { %v3813_v52 = vpop.permute.xlu1 %3812  ;;  %v3815_v28 = vpop.permute.xlu0 %3814 }
 0x676   : > { %v3861_v55 = vsel %vm2918_vm12, %v7141_v27, %v3813_v52  ;;  %v3865_v51 = vsel %vm2918_vm12, %v7142_v49, %v3815_v28 }
 0x677   : > { %4285 = vmatmul.mubr.bf16.gmra.mrb[56].mxu1 %v3861_v55 }
 0x678   : > { %4292 = vmatprep.mubr.bf16.mxu1 %v3837_v38 }
 0x679   : > { %v3817_v27 = vpop.permute.xlu0 %3816 }
 0x67a   : > { %v3869_v9 = vsel %vm2918_vm12, %v7143_v42, %v3817_v27 }
 0x67b   : > { %4236 = vmatmul.mubr.bf16.gmra.mrb[52].mxu0 %v3837_v38  ;;  %v3821_v7 = vpop.permute.xlu1 %3820 }
 0x67c   : > { %7808 = vmatprep.mubr.msk.bf16.mxu0 %vm2918_vm12, %v9839_v3  ;;  %v3873_v30 = vsel %vm2918_vm12, %v7148_v29, %v3821_v7 }
 0x67f   : > { %4293 = vmatmul.mubr.bf16.gmra.mrb[60].mxu1 %v3865_v51 }
 0x680   : > { %4300 = vmatprep.mubr.bf16.mxu1 %v3873_v30 }
 0x683   : > { %7809 = vmatmul.mubr.msk.bf16.vlgmr.msra.gmra.mrb[56].mxu0 %vm2918_vm12, %v9847_v46 }
 0x684   : > { %7812 = vmatprep.mubr.msk.bf16.mxu0 %vm2918_vm12, %v9851_v5  ;;  %7893 = vmatpush3.bf16.msra.mxu0 %v8152_v45 }
 0x685   : > { %7894 = vmatprep.subr.bf16.mxu0 %v11228_v40 }
 0x687   : > { %4301 = vmatmul.mubr.bf16.gmra.mrb[64].mxu1 %v3869_v9 }
 0x688   : > { %7820 = vmatprep.mubr.msk.bf16.mxu1 %vm883_vm13, %v8981_v53  ;;  %7895 = vmatpush3.bf16.msra.mxu0 %v8153_v33  ;;  %v11235_v53 = vld [vmem:[#allocation6_spill] sm:$0xff] }
 0x68b   : > { %7813 = vmatmul.mubr.msk.bf16.gmra.mrb[60].mxu0 %vm2918_vm12, %v7150_v17 }
 0x68c   : > { %7896 = vmatprep.mubr.msk.bf16.mxu0 %vm8208_vm15, %v11228_v40 }
 0x68f   : > { %7821 = vmatmul.mubr.msk.bf16.vlgmr.msra.gmra.mrb[68].mxu1 %vm883_vm13, %v8978_v12  ;;  %v11234_v12 = vld [vmem:[#allocation4_spill] sm:$0xff] }
 0x690   : > { %7824 = vmatprep.mubr.msk.bf16.mxu1 %vm883_vm13, %v8992_v8  ;;  %v11237_v8 = vld [vmem:[#allocation8_spill] sm:$0xff] }
 0x693   : > { %7897 = vmatmul.mubr.msk.bf16.vlgmr.msra.gmra.mrb[64].mxu0 %vm883_vm13, %v9468_v1 }
 0x697   : > { %7825 = vmatmul.mubr.msk.bf16.gmra.mrb[72].mxu1 %vm883_vm13, %v8990_v62  ;;  %v11236_v62 = vld [vmem:[#allocation5_spill] sm:$0xff] }
 0x698   : > { %7828 = vmatprep.mubr.msk.bf16.mxu1 %vm883_vm13, %v9000_v37  ;;  %v11239_v37 = vld [vmem:[#allocation10_spill] sm:$0xff] }
 0x69f   : > { %7829 = vmatmul.mubr.msk.bf16.gmra.mrb[76].mxu1 %vm883_vm13, %v8998_v32  ;;  %v11238_v32 = vld [vmem:[#allocation7_spill] sm:$0xff] }
 0x6a0   : > { %7832 = vmatprep.mubr.msk.bf16.mxu1 %vm883_vm13, %v9008_v48  ;;  %v8154_v48 = vld [vmem:[%s11138_s15] sm:$0xff]  }
 0x6a7   : > { %7833 = vmatmul.mubr.msk.bf16.gmra.mrb[80].mxu1 %vm883_vm13, %v9006_v59  ;;  %v11240_v59 = vld [vmem:[#allocation9_spill] sm:$0xff] }
 0x6a8   : > { %7836 = vmatprep.mubr.msk.bf16.mxu1 %vm883_vm13, %v9019_v63 }
 0x6af   : > { %7837 = vmatmul.mubr.msk.bf16.gmra.mrb[84].mxu1 %vm883_vm13, %v11234_v12 }
 0x6b0   : > { %7840 = vmatprep.mubr.msk.bf16.mxu1 %vm883_vm13, %v11235_v53 }
 0x6b7   : > { %7841 = vmatmul.mubr.msk.bf16.gmra.mrb[88].mxu1 %vm883_vm13, %v11236_v62 }
 0x6b8   : > { %7844 = vmatprep.mubr.msk.bf16.mxu1 %vm883_vm13, %v11237_v8 }
 0x6bf   : > { %7845 = vmatmul.mubr.msk.bf16.gmra.mrb[92].mxu1 %vm883_vm13, %v11238_v32 }
 0x6c0   : > { %7848 = vmatprep.mubr.msk.bf16.mxu1 %vm883_vm13, %v11239_v37 }
 0x6c7   : > { %7849 = vmatmul.mubr.msk.bf16.gmra.mrb[96].mxu1 %vm883_vm13, %v11240_v59 }
 0x6c8   : > { %7860 = vmatprep.mubr.msk.bf16.mxu1 %vm2918_vm12, %v8154_v48 }
 0x733   : > { %v7455_v63 = vpop.f32.mrb[40].mxu0 }
 0x734   : > { %v7456_v31 = vpop.f32.mrb[41].mxu0 }
 0x735   : > { %v7457_v40 = vadd.f32 %v7456_v31, %v7455_v63  ;;  %v7458_v1 = vpop.f32.mrb[42].mxu0 }
 0x736   : > { %v7459_v54 = vpop.f32.mrb[43].mxu0 }
 0x737   : > { %v7460_v50 = vadd.f32 %v7459_v54, %v7458_v1  ;;  %v4214_v19 = vadd.f32 %v7457_v40, %v9980_v20 }
 0x739   : > { %v4217_v4 = vadd.f32 %v7460_v50, %v9980_v20 }
 0x73e   : > { %v7461_v3 = vpop.f32.mrb[44].mxu0 }
 0x73f   : > { %v7495_v46 = vpop.f32.mrb[52].mxu1  ;;  %v7462_v5 = vpop.f32.mrb[45].mxu0 }
 0x740   : > { %v7496_v22 = vpop.f32.mrb[53].mxu1  ;;  %v7463_v49 = vadd.f32 %v7462_v5, %v7461_v3  ;;  %v7464_v57 = vpop.f32.mrb[46].mxu0 }
 0x741   : > { %v7497_v23 = vadd.f32 %v7496_v22, %v7495_v46  ;;  %v7498_v6 = vpop.f32.mrb[54].mxu1  ;;  %v7465_v42 = vpop.f32.mrb[47].mxu0 }
 0x742   : > { %v7499_v41 = vpop.f32.mrb[55].mxu1  ;;  %v7466_v36 = vadd.f32 %v7465_v42, %v7464_v57  ;;  %v4222_v14 = vadd.f32 %v7463_v49, %v9980_v20 }
 0x743   : > { %v7500_v35 = vadd.f32 %v7499_v41, %v7498_v6  ;;  %v4279_v15 = vadd.f32 %v7497_v23, %v4214_v19 }
 0x744   : > { %v4225_v44 = vadd.f32 %v7466_v36, %v9980_v20 }
 0x745   : > { %v4282_v21 = vadd.f32 %v7500_v35, %v4217_v4 }
 0x746   : > { %v7467_v16 = vpop.f32.mrb[48].mxu0 }
 0x747   : > { %v7468_v26 = vpop.f32.mrb[49].mxu0 }
 0x748   : > { %v7469_v2 = vadd.f32 %v7468_v26, %v7467_v16  ;;  %v7470_v61 = vpop.f32.mrb[50].mxu0 }
 0x749   : > { %v7471_v0 = vpop.f32.mrb[51].mxu0 }
 0x74a   : > { %v7501_v11 = vpop.f32.mrb[56].mxu1  ;;  %v7472_v13 = vadd.f32 %v7471_v0, %v7470_v61  ;;  %v4230_v51 = vadd.f32 %v7469_v2, %v9980_v20 }
 0x74b   : > { %v7502_v47 = vpop.f32.mrb[57].mxu1 }
 0x74c   : > { %v7503_v58 = vadd.f32 %v7502_v47, %v7501_v11  ;;  %v7504_v25 = vpop.f32.mrb[58].mxu1  ;;  %v4233_v33 = vadd.f32 %v7472_v13, %v9980_v20 }
 0x74d   : > { %v7505_v24 = vpop.f32.mrb[59].mxu1 }
 0x74e   : > { %v7506_v34 = vadd.f32 %v7505_v24, %v7504_v25  ;;  %v7473_v60 = vpop.f32.mrb[52].mxu0  ;;  %v4287_v43 = vadd.f32 %v7503_v58, %v4222_v14 }
 0x74f   : > { %v7474_v56 = vpop.f32.mrb[53].mxu0 }
 0x750   : > { %v7475_v39 = vadd.f32 %v7474_v56, %v7473_v60  ;;  %v7476_v52 = vpop.f32.mrb[54].mxu0  ;;  %v4290_v55 = vadd.f32 %v7506_v34, %v4225_v44 }
 0x751   : > { %v7477_v38 = vpop.f32.mrb[55].mxu0 }
 0x752   : > { %v7507_v28 = vpop.f32.mrb[60].mxu1  ;;  %v7478_v7 = vadd.f32 %v7477_v38, %v7476_v52  ;;  %v4238_v3 = vadd.f32 %v7475_v39, %v9980_v20  ;;  %v8155_v38 = vld [vmem:[%s11138_s15 + $0x8] sm:$0xff]  }
 0x753   : > { %v7508_v29 = vpop.f32.mrb[61].mxu1 }
 0x754   : > { %v7509_v30 = vadd.f32 %v7508_v29, %v7507_v28  ;;  %v7510_v45 = vpop.f32.mrb[62].mxu1  ;;  %v4241_v49 = vadd.f32 %v7478_v7, %v9980_v20  ;;  %v8156_v28 = vld [vmem:[%s11138_s15 + $0x10] sm:$0xff]   ;;  %v8157_v7 = vld [vmem:[%s11138_s15 + $0x18] sm:$0xff]   ;;  %v8158_v29 = vld [vmem:[%s11138_s15 + $0x20] sm:$0xff]  }
 0x755   : > { %v7511_v27 = vpop.f32.mrb[63].mxu1 }
 0x756   : > { %v7512_v9 = vadd.f32 %v7511_v27, %v7510_v45  ;;  %v7810_v17 = vpop.f32.mrb[56].mxu0  ;;  %v4295_v12 = vadd.f32 %v7509_v30, %v4230_v51  ;;  %v8159_v51 = vld [vmem:[%s11138_s15 + $0x28] sm:$0xff]   ;;  %v8160_v30 = vld [vmem:[%s11138_s15 + $0x30] sm:$0xff]   ;;  %v8161_v45 = vld [vmem:[%s11138_s15 + $0x38] sm:$0xff]  }
 0x757   : > { %v4352_v53 = vadd.f32 %v7810_v17, %v4287_v43  ;;  %v4343_v62 = vpop.f32.mrb[57].mxu0  ;;  %v8162_v27 = vld [vmem:[%s11138_s15 + $0x40] sm:$0xff]   ;;  %v8165_v17 = vld [vmem:[%s11138_s15 + $0x58] sm:$0xff]  }
 0x758   : > { %v4344_v8 = vadd.f32 %v4343_v62, %v4279_v15  ;;  %v7811_v32 = vpop.f32.mrb[58].mxu0  ;;  %v4298_v37 = vadd.f32 %v7512_v9, %v4233_v33  ;;  %v8163_v33 = vld [vmem:[%s11138_s15 + $0x48] sm:$0xff]   ;;  %v8164_v9 = vld [vmem:[%s11138_s15 + $0x50] sm:$0xff]  }
 0x759   : > { %v4384_v59 = vmul.f32 0.1, %v4352_v53  ;;  %v4355_v48 = vadd.f32 %v7811_v32, %v4290_v55  ;;  %v4346_v63 = vpop.f32.mrb[59].mxu0  ;;  %vm4376_vm15 = vcmp.gt.f32.partialorder %v4352_v53, 0.0  ;;  %v8168_v62 = vld [vmem:[%s11138_s15 + $0x70] sm:$0xff]   ;;  %v8170_v32 = vld [vmem:[%s11136_s13 + $0x80] sm:$0xff]  }
 0x75a   : > { %v7513_v31 = vpop.f32.mrb[64].mxu1  ;;  %vm4374_vm5 = vcmp.gt.f32.partialorder %v4344_v8, 0.0  ;;  %v4382_v40 = vmul.f32 0.1, %v4344_v8  ;;  %v4347_v1 = vadd.f32 %v4346_v63, %v4282_v21  ;;  %v8174_v63 = vld [vmem:[%s11136_s13 + $0x48] sm:$0xff]  }
 0x75b   : > { %v7514_v54 = vpop.f32.mrb[65].mxu1  ;;  %vm4377_vm10 = vcmp.gt.f32.partialorder %v4355_v48, 0.0  ;;  %v4385_v50 = vmul.f32 0.1, %v4355_v48  ;;  %v4392_v23 = vsel %vm4376_vm15, %v4352_v53, %v4384_v59  ;;  %v8167_v53 = vld [vmem:[%s11138_s15 + $0x68] sm:$0xff]   ;;  %v8172_v59 = vld [vmem:[%s11136_s13 + $0x40] sm:$0xff]  }
 0x75c   : > { %v7515_v46 = vadd.f32 %v7514_v54, %v7513_v31  ;;  %v7516_v5 = vpop.f32.mrb[66].mxu1  ;;  %vm4375_vm11 = vcmp.gt.f32.partialorder %v4347_v1, 0.0  ;;  %v4383_v22 = vmul.f32 0.1, %v4347_v1  ;;  %v4390_v19 = vsel %vm4374_vm5, %v4344_v8, %v4382_v40  ;;  %v8169_v8 = vld [vmem:[%s11138_s15 + $0x78] sm:$0xff]   ;;  %7568 = vmatprep.subr.bf16.mxu0 %v8172_v59  ;;  %v8175_v31 = vld [vmem:[%s11136_s13 + $0x8] sm:$0xff]  }
 0x75d   : > { %v7517_v57 = vpop.f32.mrb[67].mxu1  ;;  %v4393_v6 = vsel %vm4377_vm10, %v4355_v48, %v4385_v50  ;;  %v8173_v48 = vld [vmem:[%s11136_s13] sm:$0xff]   ;;  %v8176_v54 = vld [vmem:[%s11136_s13 + $0x50] sm:$0xff]  }
 0x75e   : > { %v7518_v42 = vadd.f32 %v7517_v57, %v7516_v5  ;;  %v4303_v41 = vadd.f32 %v7515_v46, %v4238_v3  ;;  %v7814_v36 = vpop.f32.mrb[60].mxu0  ;;  %v4391_v4 = vsel %vm4375_vm11, %v4347_v1, %v4383_v22  ;;  %v4399_v35 = vpack.c.bf16 %v4393_v6, %v4392_v23  ;;  %7569 = vmatpush3.bf16.msra.mxu0 %v8173_v48  ;;  %v5043_v1 = vld [vmem:[%s11241_s11] sm:$0x1]  ;;  %v8177_v50 = vld [vmem:[%s11136_s13 + $0x10] sm:$0xff]   ;;  %v8178_v22 = vld [vmem:[%s11136_s13 + $0x58] sm:$0xff]  }
 0x75f   : > { %v4359_v15 = vpop.f32.mrb[61].mxu0  ;;  %v4398_v21 = vpack.c.bf16 %v4391_v4, %v4390_v19  ;;  %7570 = vmatprep.subr.bf16.mxu0 %v8174_v63  ;;  %v10080_v46 = vld [vmem:[%s11135_s12] ss:$0 sm:$0xff]  ;;  %v11242_v57 = vld [vmem:[#allocation11_spill] sm:$0xff] }
 0x760   : > { %v4368_v16 = vadd.f32 %v7814_v36, %v4303_v41  ;;  %v4360_v26 = vadd.f32 %v4359_v15, %v4295_v12  ;;  %v4306_v2 = vadd.f32 %v7518_v42, %v4241_v49  ;;  %v7815_v61 = vpop.f32.mrb[62].mxu0  ;;  %v8166_v12 = vld [vmem:[%s11138_s15 + $0x60] sm:$0xff]   ;;  %v8179_v49 = vld [vmem:[%s11136_s13 + $0x18] sm:$0xff]   ;;  %v11243_v19 = vsub.s32 0, %v11242_v57 }
 0x761   : > { %v4362_v0 = vpop.f32.mrb[63].mxu0  ;;  %7852 = vmatprep.subr.bf16.mxu1 %v4398_v21 }
 0x762   : > { %7853 = vmatpush3.bf16.msra.mxu1 %v4398_v21  ;;  %v4388_v11 = vmul.f32 0.1, %v4368_v16  ;;  %v4386_v20 = vmul.f32 0.1, %v4360_v26  ;;  %v4371_v13 = vadd.f32 %v7815_v61, %v4306_v2  ;;  %v4363_v47 = vadd.f32 %v4362_v0, %v4298_v37  ;;  %v8171_v37 = vld [vmem:[%s11136_s13 + $0x88] sm:$0xff]   ;;  %7571 = vmatpush3.bf16.msra.mxu0 %v8175_v31  ;;  %v8181_v2 = vld [vmem:[%s11136_s13 + $0x20] sm:$0xff]  }
 0x763   : > { %7854 = vmatprep.subr.bf16.mxu1 %v4399_v35  ;;  %vm4380_vm7 = vcmp.gt.f32.partialorder %v4368_v16, 0.0  ;;  %vm4378_vm8 = vcmp.gt.f32.partialorder %v4360_v26, 0.0  ;;  %7572 = vmatprep.subr.bf16.mxu0 %v8176_v54  ;;  %v8186_v54 = vld [vmem:[%s11136_s13 + $0x78] sm:$0xff]  }
 0x764   : > { %vm4381_vm9 = vcmp.gt.f32.partialorder %v4371_v13, 0.0  ;;  %v4389_v14 = vmul.f32 0.1, %v4371_v13  ;;  %vm4379_vm0 = vcmp.gt.f32.partialorder %v4363_v47, 0.0  ;;  %v4387_v58 = vmul.f32 0.1, %v4363_v47 }
 0x765   : > { %v4394_v44 = vsel %vm4378_vm8, %v4360_v26, %v4386_v20  ;;  %v4396_v60 = vsel %vm4380_vm7, %v4368_v16, %v4388_v11  ;;  %v8180_v26 = vld [vmem:[%s11136_s13 + $0x60] sm:$0xff]  }
 0x766   : > { %7855 = vmatpush3.bf16.msra.mxu1 %v4399_v35  ;;  %v5037_v25 = vpop.f32.mrb[64].mxu0  ;;  %v4395_v34 = vsel %vm4379_vm0, %v4363_v47, %v4387_v58  ;;  %v4397_v43 = vsel %vm4381_vm9, %v4371_v13, %v4389_v14  ;;  %7573 = vmatpush3.bf16.msra.mxu0 %v8177_v50  ;;  %v8182_v47 = vld [vmem:[%s11136_s13 + $0x68] sm:$0xff]   ;;  %v8187_v50 = vld [vmem:[%s11136_s13 + $0x38] sm:$0xff]  }
 0x767   : > { %v7898_v24 = vpop.f32.mrb[65].mxu0  ;;  %v4400_v39 = vpack.c.bf16 %v4395_v34, %v4394_v44  ;;  %v4401_v52 = vpack.c.bf16 %v4397_v43, %v4396_v60  ;;  %v5038_v40 = vadd.f32 1.0, %v5037_v25  ;;  %7574 = vmatprep.subr.bf16.mxu0 %v8178_v22  ;;  %v8183_v14 = vld [vmem:[%s11136_s13 + $0x28] sm:$0xff]  }
 0x768   : > { %v5040_v56 = vpop.f32.mrb[66].mxu0 }
 0x769   : > { %v7899_v55 = vpop.f32.mrb[67].mxu0  ;;  %7856 = vmatprep.subr.bf16.mxu1 %v4400_v39  ;;  %v5044_v3 = vadd.f32 %v5043_v1, %v5038_v40 }
 0x76a   : > { %7857 = vmatpush3.bf16.msra.mxu1 %v4400_v39  ;;  %7575 = vmatpush3.bf16.msra.mxu0 %v8179_v49 }
 0x76b   : > { %7858 = vmatprep.subr.bf16.mxu1 %v4401_v52  ;;  %v10090_v23 = vrot.slane %v5044_v3, %v11243_v19  ;;  %7576 = vmatprep.subr.bf16.mxu0 %v8180_v26 }
 0x76e   : > { %7859 = vmatpush3.bf16.msra.mxu1 %v4401_v52  ;;  %7577 = vmatpush3.bf16.msra.mxu0 %v8181_v2 }
 0x76f   : > { %7900 = vmatprep.subr.bf16.mxu1 %v8170_v32  ;;  %7578 = vmatprep.subr.bf16.mxu0 %v8182_v47 }
 0x771   : > { %7861 = vmatmul.mubr.msk.bf16.vlgmr.msra.gmra.mrb[68].mxu1 %vm2918_vm12, %v8155_v38 }
 0x772   : > { %7864 = vmatprep.mubr.msk.bf16.mxu1 %vm2918_vm12, %v8156_v28  ;;  %7901 = vmatpush3.bf16.msra.mxu1 %v8170_v32 }
 0x773   : > { %7902 = vmatprep.subr.bf16.mxu1 %v8171_v37  ;;  %7579 = vmatpush3.bf16.msra.mxu0 %v8183_v14 }
 0x776   : > { %7903 = vmatpush3.bf16.msra.mxu1 %v8171_v37 }
 0x779   : > { %7865 = vmatmul.mubr.msk.bf16.gmra.mrb[72].mxu1 %vm2918_vm12, %v8157_v7 }
 0x77a   : > { %7868 = vmatprep.mubr.msk.bf16.mxu1 %vm2918_vm12, %v8158_v29 }
 0x781   : > { %7869 = vmatmul.mubr.msk.bf16.gmra.mrb[76].mxu1 %vm2918_vm12, %v8159_v51  ;;  %v8184_v51 = vld [vmem:[%s11136_s13 + $0x70] sm:$0xff]  }
 0x782   : > { %7872 = vmatprep.mubr.msk.bf16.mxu1 %vm2918_vm12, %v8160_v30  ;;  %v8185_v30 = vld [vmem:[%s11136_s13 + $0x30] sm:$0xff]   ;;  %7580 = vmatprep.subr.bf16.mxu0 %v8184_v51 }
 0x783   : > { %7581 = vmatpush3.bf16.msra.mxu0 %v8185_v30 }
 0x784   : > { %7582 = vmatprep.subr.bf16.mxu0 %v8186_v54 }
 0x787   : > { %7583 = vmatpush3.bf16.msra.mxu0 %v8187_v50 }
 0x789   : > { %7873 = vmatmul.mubr.msk.bf16.gmra.mrb[80].mxu1 %vm2918_vm12, %v8161_v45 }
 0x78a   : > { %7876 = vmatprep.mubr.msk.bf16.mxu1 %vm2918_vm12, %v8162_v27 }
 0x791   : > { %7877 = vmatmul.mubr.msk.bf16.gmra.mrb[84].mxu1 %vm2918_vm12, %v8163_v33 }
 0x792   : > { %7880 = vmatprep.mubr.msk.bf16.mxu1 %vm2918_vm12, %v8164_v9 }
 0x799   : > { %7881 = vmatmul.mubr.msk.bf16.gmra.mrb[88].mxu1 %vm2918_vm12, %v8165_v17 }
 0x79a   : > { %7884 = vmatprep.mubr.msk.bf16.mxu1 %vm2918_vm12, %v8166_v12 }
 0x7a1   : > { %7885 = vmatmul.mubr.msk.bf16.gmra.mrb[92].mxu1 %vm2918_vm12, %v8167_v53 }
 0x7a2   : > { %7888 = vmatprep.mubr.msk.bf16.mxu1 %vm2918_vm12, %v8168_v62 }
 0x7a9   : > { %7889 = vmatmul.mubr.msk.bf16.gmra.mrb[96].mxu1 %vm2918_vm12, %v8169_v8 }
 0x844   : > { %v7862_v5 = vpop.f32.mrb[68].mxu1 }
 0x845   : > { %v7972_v6 = vadd.f32 %v7862_v5, %v10080_v46  ;;  %v4828_v42 = vpop.f32.mrb[69].mxu1 }
 0x846   : > { %v7973_v41 = vadd.f32 %v10080_v46, %v4828_v42  ;;  %v7863_v36 = vpop.f32.mrb[70].mxu1 }
 0x847   : > { %v5051_v4 = vmul.f32 %v7972_v6, %v10090_v23  ;;  %v7974_v35 = vadd.f32 %v7863_v36, %v10080_v46  ;;  %v4831_v15 = vpop.f32.mrb[71].mxu1 }
 0x848   : > { %v5049_v21 = vmul.f32 %v7973_v41, %v10090_v23  ;;  %v7975_v16 = vadd.f32 %v10080_v46, %v4831_v15 }
 0x849   : > { %v5052_v61 = vmul.f32 %v7974_v35, %v10090_v23 }
 0x84a   : > { %v5050_v0 = vmul.f32 %v7975_v16, %v10090_v23 }
 0x84b   : > { %v5082_v11 = vpack.c.bf16 %v5052_v61, %v5051_v4 }
 0x84c   : > { %v5081_v20 = vpack.c.bf16 %v5050_v0, %v5049_v21  ;;  %v7866_v13 = vpop.f32.mrb[72].mxu1 }
 0x84d   : > { %v5105_v58 = vshrl.u32 %v5082_v11, 16  ;;  %v7976_v25 = vadd.f32 %v7866_v13, %v10080_v46  ;;  %v4844_v24 = vpop.f32.mrb[73].mxu1  ;;  %v5108_v56 = vshll.u32 %v5082_v11, 16 }
 0x84e   : > { %v5098_v44 = vshrl.u32 %v5081_v20, 16  ;;  %v7977_v34 = vadd.f32 %v10080_v46, %v4844_v24  ;;  %v7867_v60 = vpop.f32.mrb[74].mxu1  ;;  %v5101_v28 = vshll.u32 %v5081_v20, 16 }
 0x84f   : > { %v5107_v43 = vrot.slane %v5105_v58, 7  ;;  %v5055_v39 = vmul.f32 %v7976_v25, %v10090_v23  ;;  %v7978_v52 = vadd.f32 %v7867_v60, %v10080_v46  ;;  %v4847_v55 = vpop.f32.mrb[75].mxu1 }
 0x850   : > { %v5100_v38 = vrot.slane %v5098_v44, 7  ;;  %v5053_v7 = vmul.f32 %v7977_v34, %v10090_v23  ;;  %v7979_v29 = vadd.f32 %v10080_v46, %v4847_v55 }
 0x851   : > { %v5110_v45 = vor.u32 %v5108_v56, %v5107_v43  ;;  %v5056_v27 = vmul.f32 %v7978_v52, %v10090_v23  ;;  %v5258_v9 = vsel %vm8354_vm2, %v5107_v43, 0 }
 0x852   : > { %v5054_v17 = vmul.f32 %v7979_v29, %v10090_v23  ;;  %v5487_v12 = vrot.slane %v5258_v9, 1  ;;  %v5103_v53 = vor.u32 %v5101_v28, %v5100_v38  ;;  %v10130_v62 = vsel %vm8354_vm2, %v5100_v38, 0 }
 0x853   : > { %v5084_v8 = vpack.c.bf16 %v5056_v27, %v5055_v39  ;;  %v10134_v32 = vsel %vm8354_vm2, 0, %v5110_v45  ;;  %v5484_v37 = vrot.slane %v10130_v62, 1  ;;  %v5293_v59 = vshll.u32 %v5258_v9, 16 }
 0x854   : > { %v5083_v48 = vpack.c.bf16 %v5054_v17, %v5053_v7  ;;  %5611 = vrot.lane.b32.xlu0 %v10134_v32, %s11245_s4  ;;  %5673 = vrot.lane.b32.xlu1 %v10134_v32, %s11231_s0  ;;  %v7870_v63 = vpop.f32.mrb[76].mxu1  ;;  %v5486_v31 = vrot.slane %v10134_v32, 1  ;;  %v10144_v40 = vsel %vm8354_vm2, 0, %v5103_v53  ;;  %v5286_v1 = vshrl.u32 %v10134_v32, 16 }
 0x855   : > { %v5119_v3 = vshrl.u32 %v5084_v8, 16  ;;  %v5122_v5 = vshll.u32 %v5084_v8, 16  ;;  %v7980_v22 = vadd.f32 %v7870_v63, %v10080_v46  ;;  %v4860_v49 = vpop.f32.mrb[77].mxu1  ;;  %v5483_v57 = vrot.slane %v10144_v40, 1 }
 0x856   : > { %v5112_v19 = vshrl.u32 %v5083_v48, 16  ;;  %v5115_v6 = vshll.u32 %v5083_v48, 16  ;;  %v7981_v42 = vadd.f32 %v10080_v46, %v4860_v49  ;;  %v7871_v41 = vpop.f32.mrb[78].mxu1  ;;  %v5488_v36 = vsel %vm1458_vm3, %v5486_v31, %v5487_v12 }
 0x857   : > { %v5121_v4 = vrot.slane %v5119_v3, 7  ;;  %v5059_v35 = vmul.f32 %v7980_v22, %v10090_v23  ;;  %v7982_v15 = vadd.f32 %v7871_v41, %v10080_v46  ;;  %v4863_v21 = vpop.f32.mrb[79].mxu1  ;;  %7904 = vmatprep.mubr.msk.bf16.mxu1 %vm883_vm13, %v5488_v36  ;;  %v5485_v16 = vsel %vm1458_vm3, %v5483_v57, %v5484_v37 }
 0x858   : > { %v5114_v26 = vrot.slane %v5112_v19, 7  ;;  %v5057_v2 = vmul.f32 %v7981_v42, %v10090_v23  ;;  %v7983_v61 = vadd.f32 %v10080_v46, %v4863_v21  ;;  %5643 = vrot.lane.b32.xlu1 %v5488_v36, %s11227_s1  ;;  %5609 = vrot.lane.b32.xlu0 %v10144_v40, %s11245_s4  ;;  %v5288_v0 = vshll.u32 %v10134_v32, 16 }
 0x859   : > { %v5124_v11 = vor.u32 %v5122_v5, %v5121_v4  ;;  %v5060_v20 = vmul.f32 %v7982_v15, %v10090_v23  ;;  %v5295_v13 = vrot.slane %v5293_v59, 1  ;;  %v10170_v47 = vsel %vm8354_vm2, %v5121_v4, 0 }
 0x85a   : > { %v5117_v14 = vor.u32 %v5115_v6, %v5114_v26  ;;  %v10174_v58 = vsel %vm8354_vm2, %v5114_v26, 0  ;;  %v5058_v25 = vmul.f32 %v7983_v61, %v10090_v23  ;;  %v5290_v24 = vrot.slane %v5288_v0, 1 }
 0x85b   : > { %v10179_v44 = vsel %vm8354_vm2, 0, %v5124_v11  ;;  %v5490_v34 = vrot.slane %v10174_v58, 1  ;;  %v5086_v60 = vpack.c.bf16 %v5060_v20, %v5059_v35  ;;  %v5493_v43 = vrot.slane %v10170_v47, 1 }
 0x85c   : > { %v10185_v56 = vsel %vm8354_vm2, 0, %v5117_v14  ;;  %v5085_v39 = vpack.c.bf16 %v5058_v25, %v5057_v2  ;;  %5581 = vrot.lane.b32.xlu0 %v5488_v36, %s11231_s0  ;;  %5641 = vrot.lane.b32.xlu1 %v5485_v16, %s11227_s1  ;;  %v7874_v52 = vpop.f32.mrb[80].mxu1  ;;  %v5291_v55 = vor.u32 %v5290_v24, %v5286_v1  ;;  %v5492_v38 = vrot.slane %v10179_v44, 1 }
 0x85d   : > { %v5133_v28 = vshrl.u32 %v5086_v60, 16  ;;  %v5136_v7 = vshll.u32 %v5086_v60, 16  ;;  %v7984_v29 = vadd.f32 %v7874_v52, %v10080_v46  ;;  %v4876_v51 = vpop.f32.mrb[81].mxu1  ;;  %v5489_v30 = vrot.slane %v10185_v56, 1 }
 0x85e   : > { %v5126_v45 = vshrl.u32 %v5085_v39, 16  ;;  %v5129_v27 = vshll.u32 %v5085_v39, 16  ;;  %v7985_v9 = vadd.f32 %v10080_v46, %v4876_v51  ;;  %v7875_v17 = vpop.f32.mrb[82].mxu1  ;;  %v10194_v12 = vsel %vm1233_vm4, %v5291_v55, %v5295_v13 }
 0x85f   : > { %v5135_v53 = vrot.slane %v5133_v28, 7  ;;  %v5063_v8 = vmul.f32 %v7984_v29, %v10090_v23  ;;  %v7986_v37 = vadd.f32 %v7875_v17, %v10080_v46  ;;  %v4879_v59 = vpop.f32.mrb[83].mxu1  ;;  %v10199_v48 = vsel %vm1458_vm3, %v5489_v30, %v5490_v34 }
 0x860   : > { %v5128_v63 = vrot.slane %v5126_v45, 7  ;;  %v5061_v31 = vmul.f32 %v7985_v9, %v10090_v23  ;;  %v7987_v1 = vadd.f32 %v10080_v46, %v4879_v59  ;;  %5579 = vrot.lane.b32.xlu0 %v5485_v16, %s11231_s0  ;;  %5705 = vrot.lane.b32.xlu1 %v10194_v12, %s11245_s4  ;;  %v10207_v54 = vsel %vm1458_vm3, %v5492_v38, %v5493_v43 }
 0x861   : > { %v5138_v50 = vor.u32 %v5136_v7, %v5135_v53  ;;  %v5064_v3 = vmul.f32 %v7986_v37, %v10090_v23  ;;  %7905 = vmatmul.mubr.msk.bf16.vlgmr.msra.gmra.mrb[100].mxu1 %vm883_vm13, %v10199_v48  ;;  %v5274_v5 = vshrl.u32 %v10144_v40, 16  ;;  %v5276_v22 = vshll.u32 %v10144_v40, 16 }
 0x862   : > { %v5131_v49 = vor.u32 %v5129_v27, %v5128_v63  ;;  %v5062_v57 = vmul.f32 %v7987_v1, %v10090_v23  ;;  %7908 = vmatprep.mubr.msk.bf16.mxu1 %vm883_vm13, %v10207_v54  ;;  %v5281_v19 = vshll.u32 %v10130_v62, 16  ;;  %v10220_v6 = vsel %vm8354_vm2, %v5128_v63, 0 }
 0x863   : > { %v10224_v42 = vsel %vm8354_vm2, 0, %v5138_v50  ;;  %v5088_v41 = vpack.c.bf16 %v5064_v3, %v5063_v8  ;;  %v5278_v36 = vrot.slane %v5276_v22, 1  ;;  %v5496_v4 = vrot.slane %v10220_v6, 1 }
 0x864   : > { %v10229_v35 = vsel %vm8354_vm2, 0, %v5131_v49  ;;  %v5087_v15 = vpack.c.bf16 %v5062_v57, %v5061_v31  ;;  %5549 = vrot.lane.b32.xlu0 %v10194_v12, %s11227_s1  ;;  %5677 = vrot.lane.b32.xlu1 %v10179_v44, %s11231_s0  ;;  %v7878_v62 = vpop.f32.mrb[84].mxu1  ;;  %v5283_v21 = vrot.slane %v5281_v19, 1  ;;  %v10237_v16 = vsel %vm8354_vm2, %v5135_v53, 0 }
 0x865   : > { %v5147_v26 = vshrl.u32 %v5088_v41, 16  ;;  %v5150_v2 = vshll.u32 %v5088_v41, 16  ;;  %v7988_v61 = vadd.f32 %v7878_v62, %v10080_v46  ;;  %v4892_v0 = vpop.f32.mrb[85].mxu1  ;;  %v5279_v11 = vor.u32 %v5278_v36, %v5274_v5 }
 0x866   : > { %v5140_v20 = vshrl.u32 %v5087_v15, 16  ;;  %v5143_v13 = vshll.u32 %v5087_v15, 16  ;;  %v7989_v14 = vadd.f32 %v10080_v46, %v4892_v0  ;;  %v7879_v25 = vpop.f32.mrb[86].mxu1  ;;  %v5495_v24 = vrot.slane %v10229_v35, 1 }
 0x867   : > { %v5149_v34 = vrot.slane %v5147_v26, 7  ;;  %v5067_v60 = vmul.f32 %v7988_v61, %v10090_v23  ;;  %v7990_v43 = vadd.f32 %v7879_v25, %v10080_v46  ;;  %v4895_v39 = vpop.f32.mrb[87].mxu1  ;;  %v10245_v52 = vsel %vm1233_vm4, %v5279_v11, %v5283_v21 }
 0x868   : > { %v5142_v55 = vrot.slane %v5140_v20, 7  ;;  %v5065_v38 = vmul.f32 %v7989_v14, %v10090_v23  ;;  %v7991_v28 = vadd.f32 %v10080_v46, %v4895_v39  ;;  %5547 = vrot.lane.b32.xlu0 %v10245_v52, %s11227_s1  ;;  %5675 = vrot.lane.b32.xlu1 %v10185_v56, %s11231_s0  ;;  %v10254_v7 = vsel %vm1458_vm3, %v5495_v24, %v5496_v4 }
 0x869   : > { %v5152_v29 = vor.u32 %v5150_v2, %v5149_v34  ;;  %v5068_v51 = vmul.f32 %v7990_v43, %v10090_v23  ;;  %7909 = vmatmul.mubr.msk.bf16.gmra.mrb[104].mxu1 %vm883_vm13, %v10254_v7  ;;  %v5498_v30 = vrot.slane %v10224_v42, 1  ;;  %v5499_v45 = vrot.slane %v10237_v16, 1 }
 0x86a   : > { %v5145_v27 = vor.u32 %v5143_v13, %v5142_v55  ;;  %v5066_v9 = vmul.f32 %v7991_v28, %v10090_v23  ;;  %v10264_v17 = vsel %vm8354_vm2, %v5142_v55, 0  ;;  %v10268_v53 = vsel %vm8354_vm2, %v5149_v34, 0 }
 0x86b   : > { %v10272_v8 = vsel %vm8354_vm2, 0, %v5152_v29  ;;  %v5090_v37 = vpack.c.bf16 %v5068_v51, %v5067_v60  ;;  %v10275_v59 = vsel %vm1458_vm3, %v5498_v30, %v5499_v45  ;;  %v5502_v63 = vrot.slane %v10264_v17, 1 }
 0x86c   : > { %v10280_v31 = vsel %vm8354_vm2, 0, %v5145_v27  ;;  %v5089_v1 = vpack.c.bf16 %v5066_v9, %v5065_v38  ;;  %7912 = vmatprep.mubr.msk.bf16.mxu1 %vm883_vm13, %v10275_v59  ;;  %5615 = vrot.lane.b32.xlu0 %v10179_v44, %s11245_s4  ;;  %v7882_v50 = vpop.f32.mrb[88].mxu1  ;;  %v5504_v3 = vrot.slane %v10272_v8, 1  ;;  %v5505_v5 = vrot.slane %v10268_v53, 1 }
 0x86d   : > { %v5161_v22 = vshrl.u32 %v5090_v37, 16  ;;  %v5164_v49 = vshll.u32 %v5090_v37, 16  ;;  %5647 = vrot.lane.b32.xlu1 %v10207_v54, %s11227_s1  ;;  %v7992_v57 = vadd.f32 %v7882_v50, %v10080_v46  ;;  %v4908_v19 = vpop.f32.mrb[89].mxu1  ;;  %v5501_v41 = vrot.slane %v10280_v31, 1 }
 0x86e   : > { %v5154_v36 = vshrl.u32 %v5089_v1, 16  ;;  %v5157_v4 = vshll.u32 %v5089_v1, 16  ;;  %v7993_v15 = vadd.f32 %v10080_v46, %v4908_v19  ;;  %v7883_v62 = vpop.f32.mrb[90].mxu1  ;;  %v10294_v21 = vsel %vm1458_vm3, %v5504_v3, %v5505_v5 }
 0x86f   : > { %v5163_v26 = vrot.slane %v5161_v22, 7  ;;  %v5071_v2 = vmul.f32 %v7992_v57, %v10090_v23  ;;  %v7994_v61 = vadd.f32 %v7883_v62, %v10080_v46  ;;  %v4911_v0 = vpop.f32.mrb[91].mxu1  ;;  %v10299_v11 = vsel %vm1458_vm3, %v5501_v41, %v5502_v63 }
 0x870   : > { %v5156_v20 = vrot.slane %v5154_v36, 7  ;;  %v5069_v13 = vmul.f32 %v7993_v15, %v10090_v23  ;;  %v7995_v14 = vadd.f32 %v10080_v46, %v4911_v0  ;;  %5613 = vrot.lane.b32.xlu0 %v10185_v56, %s11245_s4  ;;  %v5310_v25 = vshrl.u32 %v10179_v44, 16 }
 0x871   : > { %v5166_v24 = vor.u32 %v5164_v49, %v5163_v26  ;;  %v5072_v34 = vmul.f32 %v7994_v61, %v10090_v23  ;;  %5645 = vrot.lane.b32.xlu1 %v10199_v48, %s11227_s1  ;;  %7913 = vmatmul.mubr.msk.bf16.gmra.mrb[108].mxu1 %vm883_vm13, %v10299_v11  ;;  %v5312_v60 = vshll.u32 %v10179_v44, 16  ;;  %v5317_v43 = vshll.u32 %v10170_v47, 16 }
 0x872   : > { %v5159_v39 = vor.u32 %v5157_v4, %v5156_v20  ;;  %v5070_v55 = vmul.f32 %v7995_v14, %v10090_v23  ;;  %7916 = vmatprep.mubr.msk.bf16.mxu1 %vm883_vm13, %v10294_v21  ;;  %v5298_v38 = vshrl.u32 %v10185_v56, 16  ;;  %v5300_v28 = vshll.u32 %v10185_v56, 16 }
 0x873   : > { %v10320_v29 = vsel %vm8354_vm2, 0, %v5166_v24  ;;  %v5092_v51 = vpack.c.bf16 %v5072_v34, %v5071_v2  ;;  %v5314_v30 = vrot.slane %v5312_v60, 1  ;;  %v5319_v45 = vrot.slane %v5317_v43, 1 }
 0x874   : > { %v10324_v47 = vsel %vm8354_vm2, 0, %v5159_v39  ;;  %v5091_v27 = vpack.c.bf16 %v5070_v55, %v5069_v13  ;;  %5585 = vrot.lane.b32.xlu0 %v10207_v54, %s11231_s0  ;;  %v7886_v9 = vpop.f32.mrb[92].mxu1  ;;  %v5302_v37 = vrot.slane %v5300_v28, 1  ;;  %v5305_v63 = vshll.u32 %v10174_v58, 16 }
 0x875   : > { %v5175_v1 = vshrl.u32 %v5092_v51, 16  ;;  %v5178_v50 = vshll.u32 %v5092_v51, 16  ;;  %v5315_v3 = vor.u32 %v5314_v30, %v5310_v25  ;;  %v7996_v5 = vadd.f32 %v7886_v9, %v10080_v46  ;;  %v4924_v22 = vpop.f32.mrb[93].mxu1 }
 0x876   : > { %v5168_v49 = vshrl.u32 %v5091_v27, 16  ;;  %v5171_v57 = vshll.u32 %v5091_v27, 16  ;;  %v7997_v19 = vadd.f32 %v10080_v46, %v4924_v22  ;;  %v7887_v41 = vpop.f32.mrb[94].mxu1  ;;  %v5303_v36 = vor.u32 %v5302_v37, %v5298_v38 }
 0x877   : > { %v5177_v4 = vrot.slane %v5175_v1, 7  ;;  %v10332_v15 = vsel %vm1233_vm4, %v5315_v3, %v5319_v45  ;;  %v5075_v54 = vmul.f32 %v7996_v5, %v10090_v23  ;;  %v7998_v58 = vadd.f32 %v7887_v41, %v10080_v46  ;;  %v4927_v62 = vpop.f32.mrb[95].mxu1 }
 0x878   : > { %v5170_v2 = vrot.slane %v5168_v49, 7  ;;  %5709 = vrot.lane.b32.xlu1 %v10332_v15, %s11245_s4  ;;  %v5073_v61 = vmul.f32 %v7997_v19, %v10090_v23  ;;  %v7999_v0 = vadd.f32 %v10080_v46, %v4927_v62  ;;  %5583 = vrot.lane.b32.xlu0 %v10199_v48, %s11231_s0  ;;  %v5307_v13 = vrot.slane %v5305_v63, 1 }
 0x879   : > { %v5180_v14 = vor.u32 %v5178_v50, %v5177_v4  ;;  %v5076_v25 = vmul.f32 %v7998_v58, %v10090_v23  ;;  %v10345_v24 = vsel %vm8354_vm2, %v5156_v20, 0  ;;  %v5507_v34 = vrot.slane %v10324_v47, 1 }
 0x87a   : > { %v5173_v60 = vor.u32 %v5171_v57, %v5170_v2  ;;  %v5074_v43 = vmul.f32 %v7999_v0, %v10090_v23  ;;  %v10350_v39 = vsel %vm1233_vm4, %v5303_v36, %v5307_v13  ;;  %v5508_v55 = vrot.slane %v10345_v24, 1 }
 0x87b   : > { %v10355_v48 = vsel %vm8354_vm2, 0, %v5180_v14  ;;  %v5094_v38 = vpack.c.bf16 %v5076_v25, %v5075_v54  ;;  %v10359_v28 = vsel %vm8354_vm2, %v5163_v26, 0  ;;  %v5510_v20 = vrot.slane %v10320_v29, 1 }
 0x87c   : > { %v10364_v51 = vsel %vm8354_vm2, 0, %v5173_v60  ;;  %v5093_v30 = vpack.c.bf16 %v5074_v43, %v5073_v61  ;;  %5707 = vrot.lane.b32.xlu1 %v10350_v39, %s11245_s4  ;;  %v10369_v45 = vsel %vm1458_vm3, %v5507_v34, %v5508_v55  ;;  %v5511_v27 = vrot.slane %v10359_v28, 1  ;;  %5553 = vrot.lane.b32.xlu0 %v10332_v15, %s11227_s1  ;;  %v7890_v26 = vpop.f32.mrb[96].mxu1 }
 0x87d   : > { %v5189_v9 = vshrl.u32 %v5094_v38, 16  ;;  %v5192_v37 = vshll.u32 %v5094_v38, 16  ;;  %7917 = vmatmul.mubr.msk.bf16.gmra.mrb[112].mxu1 %vm883_vm13, %v10369_v45  ;;  %v8000_v63 = vadd.f32 %v7890_v26, %v10080_v46  ;;  %v4940_v1 = vpop.f32.mrb[97].mxu1  ;;  %v10379_v50 = vsel %vm8354_vm2, %v5170_v2, 0 }
 0x87e   : > { %v5182_v3 = vshrl.u32 %v5093_v30, 16  ;;  %v5185_v5 = vshll.u32 %v5093_v30, 16  ;;  %v10382_v22 = vsel %vm1458_vm3, %v5510_v20, %v5511_v27  ;;  %v8001_v49 = vadd.f32 %v10080_v46, %v4940_v1  ;;  %v7891_v57 = vpop.f32.mrb[98].mxu1 }
 0x87f   : > { %v5191_v19 = vrot.slane %v5189_v9, 7  ;;  %7920 = vmatprep.mubr.msk.bf16.mxu1 %vm883_vm13, %v10382_v22  ;;  %v5079_v41 = vmul.f32 %v8000_v63, %v10090_v23  ;;  %v8002_v36 = vadd.f32 %v7891_v57, %v10080_v46  ;;  %v4943_v54 = vpop.f32.mrb[99].mxu1  ;;  %v5513_v58 = vrot.slane %v10364_v51, 1 }
 0x880   : > { %v5184_v62 = vrot.slane %v5182_v3, 7  ;;  %5681 = vrot.lane.b32.xlu1 %v10224_v42, %s11231_s0  ;;  %v5077_v2 = vmul.f32 %v8001_v49, %v10090_v23  ;;  %v8003_v61 = vadd.f32 %v10080_v46, %v4943_v54  ;;  %5551 = vrot.lane.b32.xlu0 %v10350_v39, %s11227_s1  ;;  %v5514_v0 = vrot.slane %v10379_v50, 1 }
 0x881   : > { %v5194_v13 = vor.u32 %v5192_v37, %v5191_v19  ;;  %v5080_v14 = vmul.f32 %v8002_v36, %v10090_v23  ;;  %v10400_v25 = vsel %vm8354_vm2, %v5177_v4, 0  ;;  %v5516_v34 = vrot.slane %v10355_v48, 1 }
 0x882   : > { %v5187_v60 = vor.u32 %v5185_v5, %v5184_v62  ;;  %v5078_v43 = vmul.f32 %v8003_v61, %v10090_v23  ;;  %v10405_v55 = vsel %vm1458_vm3, %v5513_v58, %v5514_v0  ;;  %v5517_v38 = vrot.slane %v10400_v25, 1 }
 0x883   : > { %v5096_v46 = vpack.c.bf16 %v5080_v14, %v5079_v41  ;;  %v10418_v23 = vsel %vm8354_vm2, %v5184_v62, 0  ;;  %v10422_v4 = vsel %vm8354_vm2, 0, %v5194_v13  ;;  %v10434_v63 = vsel %vm8354_vm2, %v5191_v19, 0 }
 0x884   : > { %v10410_v20 = vsel %vm8354_vm2, 0, %v5187_v60  ;;  %v5095_v30 = vpack.c.bf16 %v5078_v43, %v5077_v2  ;;  %5679 = vrot.lane.b32.xlu1 %v10229_v35, %s11231_s0  ;;  %5619 = vrot.lane.b32.xlu0 %v10224_v42, %s11245_s4  ;;  %v10427_v26 = vsel %vm1458_vm3, %v5516_v34, %v5517_v38  ;;  %v5520_v5 = vrot.slane %v10418_v23, 1 }
 0x885   : > { %v5203_v27 = vshrl.u32 %v5096_v46, 16  ;;  %7921 = vmatmul.mubr.msk.bf16.gmra.mrb[116].mxu1 %vm883_vm13, %v10405_v55  ;;  %v5519_v37 = vrot.slane %v10410_v20, 1  ;;  %v5206_v3 = vshll.u32 %v5096_v46, 16  ;;  %v5336_v49 = vshll.u32 %v10224_v42, 16 }
 0x886   : > { %v5196_v9 = vshrl.u32 %v5095_v30, 16  ;;  %7924 = vmatprep.mubr.msk.bf16.mxu1 %vm883_vm13, %v10427_v26  ;;  %v5199_v41 = vshll.u32 %v5095_v30, 16  ;;  %v5522_v36 = vrot.slane %v10422_v4, 1  ;;  %v5324_v54 = vshll.u32 %v10229_v35, 16 }
 0x887   : > { %v5205_v1 = vrot.slane %v5203_v27, 7  ;;  %v5334_v19 = vshrl.u32 %v10224_v42, 16  ;;  %v5338_v58 = vrot.slane %v5336_v49, 1  ;;  %v5341_v62 = vshll.u32 %v10237_v16, 16 }
 0x888   : > { %v5198_v57 = vrot.slane %v5196_v9, 7  ;;  %5651 = vrot.lane.b32.xlu1 %v10275_v59, %s11227_s1  ;;  %5617 = vrot.lane.b32.xlu0 %v10229_v35, %s11245_s4  ;;  %v10447_v0 = vsel %vm1458_vm3, %v5519_v37, %v5520_v5  ;;  %v5523_v13 = vrot.slane %v10434_v63, 1  ;;  %v5326_v34 = vrot.slane %v5324_v54, 1 }
 0x889   : > { %v5208_v2 = vor.u32 %v5206_v3, %v5205_v1  ;;  %v5339_v14 = vor.u32 %v5338_v58, %v5334_v19  ;;  %v5343_v16 = vrot.slane %v5341_v62, 1  ;;  %v5322_v46 = vshrl.u32 %v10229_v35, 16 }
 0x88a   : > { %v5201_v61 = vor.u32 %v5199_v41, %v5198_v57  ;;  %v10457_v43 = vsel %vm1458_vm3, %v5522_v36, %v5523_v13  ;;  %v5329_v38 = vshll.u32 %v10220_v6, 16  ;;  %v10467_v30 = vsel %vm8354_vm2, %v5198_v57, 0 }
 0x88b   : > { %v10471_v27 = vsel %vm8354_vm2, 0, %v5208_v2  ;;  %v10477_v9 = vsel %vm1233_vm4, %v5339_v14, %v5343_v16  ;;  %v5327_v37 = vor.u32 %v5326_v34, %v5322_v46  ;;  %v5526_v6 = vrot.slane %v10467_v30, 1 }
 0x88c   : > { %v10452_v60 = vsel %vm8354_vm2, 0, %v5201_v61  ;;  %5649 = vrot.lane.b32.xlu1 %v10254_v7, %s11227_s1  ;;  %5589 = vrot.lane.b32.xlu0 %v10275_v59, %s11231_s0  ;;  %v10486_v3 = vsel %vm8354_vm2, %v5205_v1, 0  ;;  %v5331_v5 = vrot.slane %v5329_v38, 1  ;;  %v5542_v49 = vrot.slane %v10471_v27, 1 }
 0x88d   : > { %7925 = vmatmul.mubr.msk.bf16.gmra.mrb[120].mxu1 %vm883_vm13, %v10447_v0  ;;  %v5525_v59 = vrot.slane %v10452_v60, 1  ;;  %v5543_v36 = vrot.slane %v10486_v3, 1  ;;  %v5348_v54 = vshll.u32 %v10280_v31, 16  ;;  %v5358_v19 = vshrl.u32 %v10272_v8, 16 }
 0x88e   : > { %7928 = vmatprep.mubr.msk.bf16.mxu1 %vm883_vm13, %v10457_v43  ;;  %v10493_v41 = vsel %vm1233_vm4, %v5327_v37, %v5331_v5  ;;  %v5365_v58 = vshll.u32 %v10268_v53, 16  ;;  %v5346_v61 = vshrl.u32 %v10280_v31, 16  ;;  %v5353_v13 = vshll.u32 %v10264_v17, 16 }
 0x88f   : > { %v10490_v57 = vsel %vm1458_vm3, %v5525_v59, %v5526_v6  ;;  %v10503_v33 = vsel %vm1458_vm3, %v5542_v49, %v5543_v36  ;;  %v5350_v2 = vrot.slane %v5348_v54, 1  ;;  %v5384_v17 = vshll.u32 %v10320_v29, 16  ;;  %v5546_v59 = vpop.permute.xlu0 %5545 }
 0x890   : > { %5713 = vrot.lane.b32.xlu1 %v10477_v9, %s11245_s4  ;;  %5587 = vrot.lane.b32.xlu0 %v10254_v7, %s11231_s0  ;;  %v5360_v7 = vshll.u32 %v10272_v8, 16  ;;  %v5355_v53 = vrot.slane %v5353_v13, 1  ;;  %v5382_v46 = vshrl.u32 %v10320_v29, 16  ;;  %v5389_v38 = vshll.u32 %v10359_v28, 16 }
 0x891   : > { %v5351_v34 = vor.u32 %v5350_v2, %v5346_v61  ;;  %v5370_v49 = vshrl.u32 %v10324_v47, 16  ;;  %v5377_v36 = vshll.u32 %v10345_v24, 16  ;;  %v11246_v2 = vld [vmem:[#allocation3_spill] sm:$0xff] }
 0x892   : > { %v5362_v1 = vrot.slane %v5360_v7, 1  ;;  %v5391_v5 = vrot.slane %v5389_v38, 1 }
 0x893   : > { %v10539_v16 = vsel %vm1233_vm4, %v5351_v34, %v5355_v53  ;;  %v5578_v28 = vpop.permute.xlu0 %5577  ;;  %v5379_v54 = vrot.slane %v5377_v36, 1 }
 0x894   : > { %5711 = vrot.lane.b32.xlu1 %v10493_v41, %s11245_s4  ;;  %5557 = vrot.lane.b32.xlu0 %v10477_v9, %s11227_s1  ;;  %v5363_v62 = vor.u32 %v5362_v1, %v5358_v19 }
 0x895   : > { %7929 = vmatmul.mubr.msk.bf16.gmra.mrb[124].mxu1 %vm883_vm13, %v10490_v57 }
 0x896   : > { %7932 = vmatprep.mubr.msk.bf16.mxu1 %vm883_vm13, %v10503_v33 }
 0x898   : > { %5685 = vrot.lane.b32.xlu1 %v10272_v8, %s11231_s0  ;;  %5555 = vrot.lane.b32.xlu0 %v10493_v41, %s11227_s1 }
 0x89c   : > { %5683 = vrot.lane.b32.xlu1 %v10280_v31, %s11231_s0  ;;  %5623 = vrot.lane.b32.xlu0 %v10272_v8, %s11245_s4 }
 0x89d   : > { %7933 = vmatmul.mubr.msk.bf16.gmra.mrb[128].mxu1 %vm883_vm13, %v8371_v10  ;;  %v5367_v10 = vrot.slane %v5365_v58, 1 }
 0x89f   : > { %v10532_v14 = vsel %vm1233_vm4, %v5363_v62, %v5367_v10  ;;  %v5408_v62 = vshll.u32 %v10355_v48, 16  ;;  %v5738_v10 = vsel %vm883_vm13, %v11246_v2, %v5546_v59 }
 0x8a0   : > { %5655 = vrot.lane.b32.xlu1 %v10294_v21, %s11227_s1  ;;  %5621 = vrot.lane.b32.xlu0 %v10280_v31, %s11245_s4 }
 0x8a1   : > { %v5410_v53 = vrot.slane %v5408_v62, 1 }
 0x8a4   : > { %5653 = vrot.lane.b32.xlu1 %v10299_v11, %s11227_s1  ;;  %5593 = vrot.lane.b32.xlu0 %v10294_v21, %s11231_s0  ;;  %v5386_v21 = vrot.slane %v5384_v17, 1  ;;  %v5396_v17 = vshll.u32 %v10364_v51, 16 }
 0x8a6   : > { %v5387_v37 = vor.u32 %v5386_v21, %v5382_v46  ;;  %v5770_v21 = vsel %vm2918_vm12, %v5738_v10, %v5578_v28  ;;  %v5413_v46 = vshll.u32 %v10400_v25, 16  ;;  %v5394_v25 = vshrl.u32 %v10364_v51, 16 }
 0x8a8   : > { %5717 = vrot.lane.b32.xlu1 %v10532_v14, %s11245_s4  ;;  %5591 = vrot.lane.b32.xlu0 %v10299_v11, %s11231_s0  ;;  %v5372_v11 = vshll.u32 %v10324_v47, 16  ;;  %v10568_v7 = vsel %vm1233_vm4, %v5387_v37, %v5391_v5  ;;  %v5398_v5 = vrot.slane %v5396_v17, 1  ;;  %v5415_v36 = vrot.slane %v5413_v46, 1 }
 0x8a9   : > { %v5420_v46 = vshll.u32 %v10410_v20, 16 }
 0x8aa   : > { %v5374_v6 = vrot.slane %v5372_v11, 1  ;;  %v5406_v11 = vshrl.u32 %v10355_v48, 16  ;;  %v5399_v62 = vor.u32 %v5398_v5, %v5394_v25 }
 0x8ac   : > { %5715 = vrot.lane.b32.xlu1 %v10539_v16, %s11245_s4  ;;  %5561 = vrot.lane.b32.xlu0 %v10532_v14, %s11227_s1  ;;  %v5375_v1 = vor.u32 %v5374_v6, %v5370_v49  ;;  %v5411_v6 = vor.u32 %v5410_v53, %v5406_v11  ;;  %v5432_v53 = vshll.u32 %v10422_v4, 16 }
 0x8ae   : > { %v10575_v19 = vsel %vm1233_vm4, %v5375_v1, %v5379_v54  ;;  %v5401_v1 = vshll.u32 %v10379_v50, 16  ;;  %v5434_v11 = vrot.slane %v5432_v53, 1 }
 0x8b0   : > { %5689 = vrot.lane.b32.xlu1 %v10320_v29, %s11231_s0  ;;  %5559 = vrot.lane.b32.xlu0 %v10539_v16, %s11227_s1 }
 0x8b4   : > { %5687 = vrot.lane.b32.xlu1 %v10324_v47, %s11231_s0  ;;  %5627 = vrot.lane.b32.xlu0 %v10320_v29, %s11245_s4 }
 0x8b8   : > { %5659 = vrot.lane.b32.xlu1 %v10382_v22, %s11227_s1  ;;  %5625 = vrot.lane.b32.xlu0 %v10324_v47, %s11245_s4 }
 0x8bc   : > { %5657 = vrot.lane.b32.xlu1 %v10369_v45, %s11227_s1  ;;  %5597 = vrot.lane.b32.xlu0 %v10382_v22, %s11231_s0 }
 0x8c0   : > { %5721 = vrot.lane.b32.xlu1 %v10568_v7, %s11245_s4  ;;  %5595 = vrot.lane.b32.xlu0 %v10369_v45, %s11231_s0 }
 0x8c4   : > { %5719 = vrot.lane.b32.xlu1 %v10575_v19, %s11245_s4  ;;  %5565 = vrot.lane.b32.xlu0 %v10568_v7, %s11227_s1 }
 0x8c6   : > { %v10581_v24 = vpop.permute.xlu0 %5611  ;;  %v5674_v22 = vpop.permute.xlu1 %5673 }
 0x8c8   : > { %5693 = vrot.lane.b32.xlu1 %v10355_v48, %s11231_s0  ;;  %5563 = vrot.lane.b32.xlu0 %v10575_v19, %s11227_s1 }
 0x8ca   : > { %v10587_v45 = vpop.permute.xlu1 %5643  ;;  %v5610_v58 = vpop.permute.xlu0 %5609 }
 0x8cb   : > { %v5802_v49 = vsel %vm2927_vm14, %v5770_v21, %v5610_v58  ;;  %v5403_v58 = vrot.slane %v5401_v1, 1  ;;  %v5418_v1 = vshrl.u32 %v10410_v20, 16 }
 0x8cc   : > { %5691 = vrot.lane.b32.xlu1 %v10364_v51, %s11231_s0  ;;  %5631 = vrot.lane.b32.xlu0 %v10355_v48, %s11245_s4 }
 0x8ce   : > { %v10596_v61 = vpop.permute.xlu0 %5581  ;;  %v5642_v13 = vpop.permute.xlu1 %5641 }
 0x8cf   : > { %v5851_v34 = vsel %vm883_vm13, %v10245_v52, %v5642_v13  ;;  %v10625_v13 = vsel %vm1233_vm4, %v5399_v62, %v5403_v58  ;;  %v5425_v58 = vshll.u32 %v10418_v23, 16 }
 0x8d0   : > { %5663 = vrot.lane.b32.xlu1 %v10427_v26, %s11227_s1  ;;  %5629 = vrot.lane.b32.xlu0 %v10364_v51, %s11245_s4  ;;  %v5898_v37 = vsel %vm2918_vm12, %v5851_v34, %v5674_v22  ;;  %v10618_v22 = vsel %vm1233_vm4, %v5411_v6, %v5415_v36  ;;  %v5422_v36 = vrot.slane %v5420_v46, 1 }
 0x8d2   : > { %v5580_v38 = vpop.permute.xlu0 %5579  ;;  %v5706_v59 = vpop.permute.xlu1 %5705 }
 0x8d3   : > { %v5930_v52 = vsel %vm2927_vm14, %v5898_v37, %v5706_v59  ;;  %v5437_v59 = vshll.u32 %v10434_v63, 16  ;;  %v5430_v37 = vshrl.u32 %v10422_v4, 16  ;;  %v5854_v63 = vsel %vm883_vm13, %v10194_v12, %v10587_v45 }
 0x8d4   : > { %5661 = vrot.lane.b32.xlu1 %v10405_v55, %s11227_s1  ;;  %6208 = vmatprep.mubr.bf16.mxu0 %v5930_v52  ;;  %v5423_v12 = vor.u32 %v5422_v36, %v5418_v1  ;;  %v5427_v45 = vrot.slane %v5425_v58, 1  ;;  %v5449_v1 = vshll.u32 %v10467_v30, 16  ;;  %v5529_v58 = vshrl.u32 %v10471_v27, 16 }
 0x8d5   : > { %5601 = vrot.lane.b32.xlu0 %v10427_v26, %s11231_s0  ;;  %6209 = vmatmul.mubr.bf16.vlgmr.msra.gmra.mrb[68].mxu0 %v5802_v49  ;;  %v5435_v49 = vor.u32 %v5434_v11, %v5430_v37  ;;  %v5439_v25 = vrot.slane %v5437_v59, 1 }
 0x8d6   : > { %v5550_v28 = vpop.permute.xlu0 %5549  ;;  %v5678_v54 = vpop.permute.xlu1 %5677 }
 0x8d7   : > { %v10674_v59 = vsel %vm1233_vm4, %v5435_v49, %v5439_v25  ;;  %v5742_v37 = vsel %vm883_vm13, %v10134_v32, %v5550_v28  ;;  %v5531_v25 = vshll.u32 %v10471_v27, 16 }
 0x8d8   : > { %5725 = vrot.lane.b32.xlu1 %v10618_v22, %s11245_s4 }
 0x8d9   : > { %5599 = vrot.lane.b32.xlu0 %v10405_v55, %s11231_s0 }
 0x8da   : > { %v5548_v26 = vpop.permute.xlu0 %5547  ;;  %v5676_v10 = vpop.permute.xlu1 %5675 }
 0x8db   : > { %v5740_v52 = vsel %vm883_vm13, %v10144_v40, %v5548_v26  ;;  %v5900_v26 = vsel %vm2918_vm12, %v5854_v63, %v5676_v10 }
 0x8dc   : > { %5723 = vrot.lane.b32.xlu1 %v10625_v13, %s11245_s4  ;;  %v5772_v40 = vsel %vm2918_vm12, %v5740_v52, %v5580_v38  ;;  %v5774_v52 = vsel %vm2918_vm12, %v5742_v37, %v10596_v61  ;;  %v5442_v61 = vshrl.u32 %v10452_v60, 16 }
 0x8dd   : > { %5569 = vrot.lane.b32.xlu0 %v10618_v22, %s11227_s1 }
 0x8de   : > { %v10631_v50 = vpop.permute.xlu0 %5615 }
 0x8df   : > { %v10633_v34 = vpop.permute.xlu1 %5647 }
 0x8e0   : > { %5697 = vrot.lane.b32.xlu1 %v10422_v4, %s11231_s0 }
 0x8e1   : > { %5567 = vrot.lane.b32.xlu0 %v10625_v13, %s11227_s1 }
 0x8e2   : > { %v5614_v55 = vpop.permute.xlu0 %5613 }
 0x8e3   : > { %v5646_v17 = vpop.permute.xlu1 %5645  ;;  %v5808_v49 = vsel %vm2927_vm14, %v5774_v52, %v5614_v55 }
 0x8e4   : > { %5695 = vrot.lane.b32.xlu1 %v10410_v20, %s11231_s0  ;;  %v5857_v62 = vsel %vm883_vm13, %v10350_v39, %v5646_v17  ;;  %v5805_v39 = vsel %vm2927_vm14, %v5772_v40, %v10581_v24  ;;  %v10685_v17 = vsel %vm1233_vm4, %v5423_v12, %v5427_v45  ;;  %v5451_v40 = vrot.slane %v5449_v1, 1 }
 0x8e5   : > { %5635 = vrot.lane.b32.xlu0 %v10422_v4, %s11245_s4  ;;  %v5902_v23 = vsel %vm2918_vm12, %v5857_v62, %v5678_v54 }
 0x8e6   : > { %v10644_v21 = vpop.permute.xlu0 %5585 }
 0x8e8   : > { %5667 = vrot.lane.b32.xlu1 %v10457_v43, %s11227_s1 }
 0x8e9   : > { %5633 = vrot.lane.b32.xlu0 %v10410_v20, %s11245_s4 }
 0x8ea   : > { %v5710_v6 = vpop.permute.xlu1 %5709  ;;  %v10655_v5 = vpop.permute.xlu0 %5583 }
 0x8ec   : > { %5665 = vrot.lane.b32.xlu1 %v10447_v0, %s11227_s1 }
 0x8ed   : > { %5603 = vrot.lane.b32.xlu0 %v10447_v0, %s11231_s0  ;;  %v5936_v0 = vsel %vm2927_vm14, %v5902_v23, %v5710_v6  ;;  %v5444_v6 = vshll.u32 %v10452_v60, 16 }
 0x8ee   : > { %v5708_v53 = vpop.permute.xlu1 %5707  ;;  %v10670_v11 = vpop.permute.xlu0 %5553 }
 0x8ef   : > { %v5933_v46 = vsel %vm2927_vm14, %v5900_v26, %v5708_v53  ;;  %v5446_v36 = vrot.slane %v5444_v6, 1  ;;  %v5536_v26 = vshll.u32 %v10486_v3, 16  ;;  %v5746_v6 = vsel %vm883_vm13, %v10179_v44, %v10670_v11 }
 0x8f0   : > { %6216 = vmatprep.mubr.bf16.mxu0 %v5933_v46  ;;  %5729 = vrot.lane.b32.xlu1 %v10674_v59, %s11245_s4 }
 0x8f1   : > { %6217 = vmatmul.mubr.bf16.gmra.mrb[72].mxu0 %v5805_v39  ;;  %5573 = vrot.lane.b32.xlu0 %v10674_v59, %s11227_s1  ;;  %v5447_v62 = vor.u32 %v5446_v36, %v5442_v61 }
 0x8f2   : > { %6224 = vmatprep.mubr.bf16.mxu0 %v5936_v0  ;;  %v5682_v38 = vpop.permute.xlu1 %5681  ;;  %v5552_v10 = vpop.permute.xlu0 %5551 }
 0x8f3   : > { %v5744_v53 = vsel %vm883_vm13, %v10185_v56, %v5552_v10  ;;  %v10721_v12 = vsel %vm1233_vm4, %v5447_v62, %v5451_v40  ;;  %v5538_v56 = vrot.slane %v5536_v26, 1 }
 0x8f4   : > { %5727 = vrot.lane.b32.xlu1 %v10685_v17, %s11245_s4  ;;  %v5776_v3 = vsel %vm2918_vm12, %v5744_v53, %v10655_v5 }
 0x8f5   : > { %5571 = vrot.lane.b32.xlu0 %v10685_v17, %s11227_s1 }
 0x8f6   : > { %v5680_v24 = vpop.permute.xlu1 %5679  ;;  %v10693_v54 = vpop.permute.xlu0 %5619 }
 0x8f8   : > { %5701 = vrot.lane.b32.xlu1 %v10471_v27, %s11231_s0 }
 0x8f9   : > { %6225 = vmatmul.mubr.bf16.gmra.mrb[76].mxu0 %v5808_v49  ;;  %5605 = vrot.lane.b32.xlu0 %v10457_v43, %s11231_s0  ;;  %v5533_v43 = vrot.slane %v5531_v25, 1 }
 0x8fa   : > { %v5652_v32 = vpop.permute.xlu1 %5651  ;;  %v5618_v28 = vpop.permute.xlu0 %5617 }
 0x8fb   : > { %v5534_v39 = vor.u32 %v5533_v43, %v5529_v58 }
 0x8fc   : > { %5699 = vrot.lane.b32.xlu1 %v10452_v60, %s11231_s0 }
 0x8fd   : > { %5637 = vrot.lane.b32.xlu0 %v10452_v60, %s11245_s4  ;;  %v10737_v52 = vsel %vm1233_vm4, %v5534_v39, %v5538_v56 }
 0x8fe   : > { %v5650_v55 = vpop.permute.xlu1 %5649  ;;  %v10710_v63 = vpop.permute.xlu0 %5589 }
 0x8ff   : > { %v5863_v23 = vsel %vm883_vm13, %v10493_v41, %v5650_v55 }
 0x900   : > { %5669 = vrot.lane.b32.xlu1 %v10490_v57, %s11227_s1  ;;  %v5906_v41 = vsel %vm2918_vm12, %v5863_v23, %v5682_v38  ;;  %v5778_v38 = vsel %vm2918_vm12, %v5746_v6, %v10644_v21  ;;  %v5866_v21 = vsel %vm883_vm13, %v10477_v9, %v5652_v32 }
 0x901   : > { %5607 = vrot.lane.b32.xlu0 %v10490_v57, %s11231_s0  ;;  %v5860_v57 = vsel %vm883_vm13, %v10332_v15, %v10633_v34  ;;  %v5811_v15 = vsel %vm2927_vm14, %v5776_v3, %v10631_v50 }
 0x902   : > { %v5714_v30 = vpop.permute.xlu1 %5713  ;;  %v5588_v46 = vpop.permute.xlu0 %5587  ;;  %v5904_v0 = vsel %vm2918_vm12, %v5860_v57, %v5680_v24 }
 0x903   : > { %v5942_v34 = vsel %vm2927_vm14, %v5906_v41, %v5714_v30 }
 0x904   : > { %5731 = vrot.lane.b32.xlu1 %v10721_v12, %s11245_s4 }
 0x905   : > { %5575 = vrot.lane.b32.xlu0 %v10721_v12, %s11227_s1 }
 0x906   : > { %v5712_v45 = vpop.permute.xlu1 %5711  ;;  %v5558_v10 = vpop.permute.xlu0 %5557 }
 0x907   : > { %v5939_v37 = vsel %vm2927_vm14, %v5904_v0, %v5712_v45  ;;  %v5750_v58 = vsel %vm883_vm13, %v10224_v42, %v5558_v10 }
 0x908   : > { %6232 = vmatprep.mubr.bf16.mxu0 %v5939_v37  ;;  %5733 = vrot.lane.b32.xlu1 %v10737_v52, %s11245_s4  ;;  %v5782_v30 = vsel %vm2918_vm12, %v5750_v58, %v10710_v63 }
 0x909   : > { %6233 = vmatmul.mubr.bf16.gmra.mrb[80].mxu0 %v5811_v15  ;;  %5639 = vrot.lane.b32.xlu0 %v10471_v27, %s11245_s4  ;;  %v5814_v27 = vsel %vm2927_vm14, %v5778_v38, %v5618_v28 }
 0x90a   : > { %6240 = vmatprep.mubr.bf16.mxu0 %v5942_v34  ;;  %v5686_v5 = vpop.permute.xlu1 %5685  ;;  %v5556_v24 = vpop.permute.xlu0 %5555 }
 0x90c   : > { %5671 = vrot.lane.b32.xlu1 %v10503_v33, %s11227_s1  ;;  %v5748_v33 = vsel %vm883_vm13, %v10229_v35, %v5556_v24 }
 0x90d   : > { %v5780_v28 = vsel %vm2918_vm12, %v5748_v33, %v5588_v46 }
 0x90e   : > { %v5684_v49 = vpop.permute.xlu1 %5683  ;;  %v5624_v50 = vpop.permute.xlu0 %5623  ;;  %v5817_v35 = vsel %vm2927_vm14, %v5780_v28, %v10693_v54 }
 0x90f   : > { %v5908_v55 = vsel %vm2918_vm12, %v5866_v21, %v5684_v49 }
 0x910   : > { %5703 = vrot.lane.b32.xlu1 %v11246_v2, %s11231_s0 }
 0x911   : > { %6241 = vmatmul.mubr.bf16.gmra.mrb[84].mxu0 %v5814_v27 }
 0x912   : > { %v5656_v36 = vpop.permute.xlu1 %5655  ;;  %v5622_v25 = vpop.permute.xlu0 %5621 }
 0x913   : > { %v5820_v46 = vsel %vm2927_vm14, %v5782_v30, %v5622_v25  ;;  %v5872_v42 = vsel %vm883_vm13, %v10532_v14, %v5656_v36 }
 0x914   : > { %5735 = vrot.lane.b32.xlu1 %v8383_v18, %s11245_s4 }
 0x916   : > { %v5654_v44 = vpop.permute.xlu1 %5653  ;;  %v5594_v11 = vpop.permute.xlu0 %5593 }
 0x917   : > { %v5869_v2 = vsel %vm883_vm13, %v10539_v16, %v5654_v44 }
 0x918   : > { %v5910_v40 = vsel %vm2918_vm12, %v5869_v2, %v5686_v5 }
 0x91a   : > { %v5718_v61 = vpop.permute.xlu1 %5717  ;;  %v5592_v1 = vpop.permute.xlu0 %5591 }
 0x91b   : > { %v5948_v9 = vsel %vm2927_vm14, %v5910_v40, %v5718_v61 }
 0x91e   : > { %v5716_v62 = vpop.permute.xlu1 %5715  ;;  %v5562_v43 = vpop.permute.xlu0 %5561 }
 0x91f   : > { %v5945_v18 = vsel %vm2927_vm14, %v5908_v55, %v5716_v62  ;;  %v5754_v27 = vsel %vm883_vm13, %v10272_v8, %v5562_v43 }
 0x920   : > { %6248 = vmatprep.mubr.bf16.mxu0 %v5945_v18 }
 0x921   : > { %6249 = vmatmul.mubr.bf16.gmra.mrb[88].mxu0 %v5817_v35 }
 0x922   : > { %6256 = vmatprep.mubr.bf16.mxu0 %v5948_v9  ;;  %v5690_v32 = vpop.permute.xlu1 %5689  ;;  %v5560_v16 = vpop.permute.xlu0 %5559 }
 0x923   : > { %v5752_v56 = vsel %vm883_vm13, %v10280_v31, %v5560_v16 }
 0x924   : > { %v5784_v37 = vsel %vm2918_vm12, %v5752_v56, %v5592_v1 }
 0x925   : > { %v5823_v14 = vsel %vm2927_vm14, %v5784_v37, %v5624_v50  ;;  %v5786_v50 = vsel %vm2918_vm12, %v5754_v27, %v5594_v11 }
 0x926   : > { %v5688_v26 = vpop.permute.xlu1 %5687  ;;  %v5628_v53 = vpop.permute.xlu0 %5627 }
 0x927   : > { %v5912_v15 = vsel %vm2918_vm12, %v5872_v42, %v5688_v26 }
 0x929   : > { %6257 = vmatmul.mubr.bf16.gmra.mrb[92].mxu0 %v5820_v46 }
 0x92a   : > { %v5660_v54 = vpop.permute.xlu1 %5659  ;;  %v5626_v39 = vpop.permute.xlu0 %5625 }
 0x92b   : > { %v5826_v21 = vsel %vm2927_vm14, %v5786_v50, %v5626_v39 }
 0x92e   : > { %v5658_v57 = vpop.permute.xlu1 %5657  ;;  %v10777_v23 = vpop.permute.xlu0 %5597 }
 0x92f   : > { %v5875_v63 = vsel %vm883_vm13, %v10575_v19, %v5658_v57 }
 0x930   : > { %v5914_v6 = vsel %vm2918_vm12, %v5875_v63, %v5690_v32  ;;  %v5878_v32 = vsel %vm883_vm13, %v10568_v7, %v5660_v54 }
 0x932   : > { %v5722_v3 = vpop.permute.xlu1 %5721  ;;  %v5596_v0 = vpop.permute.xlu0 %5595 }
 0x933   : > { %v5954_v19 = vsel %vm2927_vm14, %v5914_v6, %v5722_v3 }
 0x934   : > { %v10781_v45 = vpop.f32.mrb[100].mxu1 }
 0x935   : > { %v10787_v10 = vpop.f32.mrb[101].mxu1 }
 0x936   : > { %v5720_v41 = vpop.permute.xlu1 %5719  ;;  %v10791_v34 = vpop.f32.mrb[102].mxu1 }
 0x937   : > { %v5951_v31 = vsel %vm2927_vm14, %v5912_v15, %v5720_v41  ;;  %v5566_v5 = vpop.permute.xlu0 %5565  ;;  %v10794_v24 = vpop.f32.mrb[103].mxu1  ;;  %v8189_v15 = vld [vmem:[%s11139_s16 + $0x8] sm:$0xff]  }
 0x938   : > { %6264 = vmatprep.mubr.bf16.mxu0 %v5951_v31 }
 0x939   : > { %6265 = vmatmul.mubr.bf16.gmra.mrb[96].mxu0 %v5823_v14 }
 0x93a   : > { %6272 = vmatprep.mubr.bf16.mxu0 %v5954_v19  ;;  %v5694_v49 = vpop.permute.xlu1 %5693 }
 0x93b   : > { %v5564_v38 = vpop.permute.xlu0 %5563 }
 0x93c   : > { %v10801_v36 = vpop.f32.mrb[104].mxu1  ;;  %v5756_v11 = vsel %vm883_vm13, %v10324_v47, %v5564_v38 }
 0x93d   : > { %v10803_v25 = vpop.f32.mrb[105].mxu1  ;;  %v5788_v58 = vsel %vm2918_vm12, %v5756_v11, %v5596_v0 }
 0x93e   : > { %v5692_v44 = vpop.permute.xlu1 %5691  ;;  %v10805_v33 = vpop.f32.mrb[106].mxu1  ;;  %v5829_v47 = vsel %vm2927_vm14, %v5788_v58, %v5628_v53  ;;  %v5758_v53 = vsel %vm883_vm13, %v10320_v29, %v5566_v5 }
 0x93f   : > { %v10808_v61 = vpop.permute.xlu0 %5631  ;;  %v10810_v1 = vpop.f32.mrb[107].mxu1  ;;  %v5916_v26 = vsel %vm2918_vm12, %v5878_v32, %v5692_v44  ;;  %v5790_v41 = vsel %vm2918_vm12, %v5758_v53, %v10777_v23 }
 0x941   : > { %6273 = vmatmul.mubr.bf16.gmra.mrb[100].mxu0 %v5826_v21 }
 0x942   : > { %v5664_v2 = vpop.permute.xlu1 %5663 }
 0x943   : > { %v5630_v28 = vpop.permute.xlu0 %5629  ;;  %v5884_v32 = vsel %vm883_vm13, %v10618_v22, %v5664_v2 }
 0x944   : > { %v10813_v55 = vpop.f32.mrb[108].mxu1  ;;  %v5832_v6 = vsel %vm2927_vm14, %v5790_v41, %v5630_v28 }
 0x945   : > { %v10815_v8 = vpop.f32.mrb[109].mxu1 }
 0x946   : > { %v5662_v62 = vpop.permute.xlu1 %5661  ;;  %v10817_v43 = vpop.f32.mrb[110].mxu1 }
 0x947   : > { %v10819_v18 = vpop.permute.xlu0 %5601  ;;  %v10821_v35 = vpop.f32.mrb[111].mxu1  ;;  %v5881_v16 = vsel %vm883_vm13, %v10625_v13, %v5662_v62  ;;  %v8188_v13 = vld [vmem:[%s11139_s16] sm:$0xff]  }
 0x948   : > { %v5918_v56 = vsel %vm2918_vm12, %v5881_v16, %v5694_v49  ;;  %7936 = vmatprep.subr.bf16.mxu0 %v8188_v13 }
 0x949   : > { %7937 = vmatpush3.bf16.msra.mxu0 %v8188_v13 }
 0x94a   : > { %v5726_v40 = vpop.permute.xlu1 %5725  ;;  %7938 = vmatprep.subr.bf16.mxu0 %v8189_v15 }
 0x94b   : > { %v5600_v9 = vpop.permute.xlu0 %5599  ;;  %v5960_v7 = vsel %vm2927_vm14, %v5918_v56, %v5726_v40 }
 0x94d   : > { %7939 = vmatpush3.bf16.msra.mxu0 %v8189_v15 }
 0x94e   : > { %v5724_v30 = vpop.permute.xlu1 %5723 }
 0x94f   : > { %v5957_v46 = vsel %vm2927_vm14, %v5916_v26, %v5724_v30  ;;  %v5570_v39 = vpop.permute.xlu0 %5569 }
 0x950   : > { %v10832_v57 = vpop.f32.mrb[112].mxu1  ;;  %6280 = vmatprep.mubr.bf16.mxu0 %v5957_v46 }
 0x951   : > { %v10836_v3 = vpop.f32.mrb[113].mxu1  ;;  %6281 = vmatmul.mubr.bf16.gmra.mrb[104].mxu0 %v5829_v47 }
 0x952   : > { %v10842_v54 = vpop.f32.mrb[114].mxu1  ;;  %6288 = vmatprep.mubr.bf16.mxu0 %v5960_v7  ;;  %v5698_v0 = vpop.permute.xlu1 %5697 }
 0x953   : > { %v10844_v42 = vpop.f32.mrb[115].mxu1  ;;  %v5568_v63 = vpop.permute.xlu0 %5567 }
 0x954   : > { %v5760_v21 = vsel %vm883_vm13, %v10364_v51, %v5568_v63  ;;  %v5762_v63 = vsel %vm883_vm13, %v10355_v48, %v5570_v39 }
 0x955   : > { %v5792_v58 = vsel %vm2918_vm12, %v5760_v21, %v5600_v9 }
 0x956   : > { %v5696_v37 = vpop.permute.xlu1 %5695  ;;  %v5835_v56 = vsel %vm2927_vm14, %v5792_v58, %v10808_v61  ;;  %v5794_v61 = vsel %vm2918_vm12, %v5762_v63, %v10819_v18 }
 0x957   : > { %v5636_v31 = vpop.permute.xlu0 %5635  ;;  %v5920_v26 = vsel %vm2918_vm12, %v5884_v32, %v5696_v37 }
 0x958   : > { %v10853_v14 = vpop.f32.mrb[116].mxu1 }
 0x959   : > { %v10856_v19 = vpop.f32.mrb[117].mxu1  ;;  %6289 = vmatmul.mubr.bf16.gmra.mrb[108].mxu0 %v5832_v6 }
 0x95a   : > { %v10858_v49 = vpop.f32.mrb[118].mxu1  ;;  %v5668_v29 = vpop.permute.xlu1 %5667 }
 0x95b   : > { %v10860_v5 = vpop.f32.mrb[119].mxu1  ;;  %v5634_v38 = vpop.permute.xlu0 %5633 }
 0x95e   : > { %v5666_v27 = vpop.permute.xlu1 %5665 }
 0x95f   : > { %v5604_v44 = vpop.permute.xlu0 %5603  ;;  %v5887_v16 = vsel %vm883_vm13, %v10685_v17, %v5666_v27  ;;  %v5890_v27 = vsel %vm883_vm13, %v10674_v59, %v5668_v29 }
 0x960   : > { %v10862_v50 = vpop.f32.mrb[120].mxu1  ;;  %v5922_v7 = vsel %vm2918_vm12, %v5887_v16, %v5698_v0  ;;  %v5838_v0 = vsel %vm2927_vm14, %v5794_v61, %v5634_v38 }
 0x961   : > { %v10864_v23 = vpop.f32.mrb[121].mxu1 }
 0x962   : > { %v10868_v28 = vpop.f32.mrb[122].mxu1  ;;  %v5730_v62 = vpop.permute.xlu1 %5729 }
 0x963   : > { %v10870_v11 = vpop.f32.mrb[123].mxu1  ;;  %v5574_v40 = vpop.permute.xlu0 %5573  ;;  %v5966_v17 = vsel %vm2927_vm14, %v5922_v7, %v5730_v62 }
 0x964   : > { %v5766_v29 = vsel %vm883_vm13, %v10422_v4, %v5574_v40 }
 0x966   : > { %v5728_v30 = vpop.permute.xlu1 %5727 }
 0x967   : > { %v5963_v46 = vsel %vm2927_vm14, %v5920_v26, %v5728_v30  ;;  %v5572_v51 = vpop.permute.xlu0 %5571 }
 0x968   : > { %v10879_v47 = vpop.f32.mrb[124].mxu1  ;;  %6296 = vmatprep.mubr.bf16.mxu0 %v5963_v46  ;;  %v5764_v15 = vsel %vm883_vm13, %v10410_v20, %v5572_v51 }
 0x969   : > { %v10884_v22 = vpop.f32.mrb[125].mxu1  ;;  %6297 = vmatmul.mubr.bf16.gmra.mrb[112].mxu0 %v5835_v56  ;;  %v5796_v21 = vsel %vm2918_vm12, %v5764_v15, %v5604_v44 }
 0x96a   : > { %v10887_v2 = vpop.f32.mrb[126].mxu1  ;;  %6304 = vmatprep.mubr.bf16.mxu0 %v5966_v17  ;;  %v5702_v9 = vpop.permute.xlu1 %5701  ;;  %v5841_v38 = vsel %vm2927_vm14, %v5796_v21, %v5636_v31 }
 0x96b   : > { %v10889_v13 = vpop.f32.mrb[127].mxu1  ;;  %v5606_v53 = vpop.permute.xlu0 %5605 }
 0x96c   : > { %v5798_v58 = vsel %vm2918_vm12, %v5766_v29, %v5606_v53 }
 0x96e   : > { %v5700_v37 = vpop.permute.xlu1 %5699 }
 0x96f   : > { %v5638_v6 = vpop.permute.xlu0 %5637  ;;  %v5924_v48 = vsel %vm2918_vm12, %v5890_v27, %v5700_v37 }
 0x970   : > { %v5844_v26 = vsel %vm2927_vm14, %v5798_v58, %v5638_v6 }
 0x971   : > { %6305 = vmatmul.mubr.bf16.gmra.mrb[116].mxu0 %v5838_v0 }
 0x972   : > { %v5670_v41 = vpop.permute.xlu1 %5669 }
 0x973   : > { %v5893_v62 = vsel %vm883_vm13, %v10721_v12, %v5670_v41  ;;  %v5608_v32 = vpop.permute.xlu0 %5607 }
 0x974   : > { %v5926_v16 = vsel %vm2918_vm12, %v5893_v62, %v5702_v9 }
 0x976   : > { %v5732_v39 = vpop.permute.xlu1 %5731 }
 0x977   : > { %v5969_v18 = vsel %vm2927_vm14, %v5924_v48, %v5732_v39  ;;  %v5576_v12 = vpop.permute.xlu0 %5575 }
 0x978   : > { %6312 = vmatprep.mubr.bf16.mxu0 %v5969_v18  ;;  %v5768_v31 = vsel %vm883_vm13, %v10452_v60, %v5576_v12  ;;  %v10923_v60 = vld [vmem:[%s11137_s14] ss:$0 sm:$0xff] }
 0x979   : > { %6313 = vmatmul.mubr.bf16.gmra.mrb[120].mxu0 %v5841_v38  ;;  %v5800_v40 = vsel %vm2918_vm12, %v5768_v31, %v5608_v32 }
 0x97a   : > { %v5734_v20 = vpop.permute.xlu1 %5733 }
 0x97b   : > { %v5972_v59 = vsel %vm2927_vm14, %v5926_v16, %v5734_v20  ;;  %v5640_v46 = vpop.permute.xlu0 %5639 }
 0x97c   : > { %6320 = vmatprep.mubr.bf16.mxu0 %v5972_v59  ;;  %v5847_v17 = vsel %vm2927_vm14, %v5800_v40, %v5640_v46 }
 0x97e   : > { %v5672_v44 = vpop.permute.xlu1 %5671 }
 0x97f   : > { %v5896_v51 = vsel %vm883_vm13, %v10737_v52, %v5672_v44 }
 0x981   : > { %6321 = vmatmul.mubr.bf16.gmra.mrb[124].mxu0 %v5844_v26 }
 0x982   : > { %v5704_v30 = vpop.permute.xlu1 %5703 }
 0x983   : > { %v5928_v56 = vsel %vm2918_vm12, %v5896_v51, %v5704_v30 }
 0x986   : > { %v5736_v7 = vpop.permute.xlu1 %5735 }
 0x987   : > { %v5975_v4 = vsel %vm2927_vm14, %v5928_v56, %v5736_v7 }
 0x988   : > { %6328 = vmatprep.mubr.bf16.mxu0 %v5975_v4 }
 0x989   : > { %6329 = vmatmul.mubr.bf16.gmra.mrb[128].mxu0 %v5847_v17 }
 0x9a8   : > { %v7584_v9 = vpop.f32.mrb[68].mxu0 }
 0x9a9   : > { %v7585_v63 = vpop.f32.mrb[69].mxu0 }
 0x9aa   : > { %v7586_v53 = vadd.f32 %v7585_v63, %v7584_v9  ;;  %v7587_v52 = vpop.f32.mrb[70].mxu0 }
 0x9ab   : > { %v7588_v37 = vpop.f32.mrb[71].mxu0 }
 0x9ac   : > { %v6211_v61 = vadd.f32 %v7586_v53, %v10923_v60  ;;  %v7589_v0 = vadd.f32 %v7588_v37, %v7587_v52 }
 0x9ae   : > { %v6372_v15 = vadd.f32 %v10787_v10, %v6211_v61  ;;  %v6214_v41 = vadd.f32 %v7589_v0, %v10923_v60  ;;  %v10939_v61 = vpop.f32.mrb[128].mxu1 }
 0x9b0   : > { %v6530_v6 = vmul.f32 0.1, %v6372_v15  ;;  %v6375_v27 = vadd.f32 %v10794_v24, %v6214_v41  ;;  %vm6498_vm2 = vcmp.gt.f32.partialorder %v6372_v15, 0.0 }
 0x9b2   : > { %vm6499_vm3 = vcmp.gt.f32.partialorder %v6375_v27, 0.0  ;;  %v6531_v21 = vmul.f32 0.1, %v6375_v27  ;;  %v6562_v48 = vsel %vm6498_vm2, %v6372_v15, %v6530_v6  ;;  %v10941_v15 = vpop.f32.mrb[129].mxu1 }
 0x9b4   : > { %v6563_v39 = vsel %vm6499_vm3, %v6375_v27, %v6531_v21  ;;  %v10944_v21 = vpop.f32.mrb[130].mxu1 }
 0x9b5   : > { %v6594_v62 = vpack.c.bf16 %v6563_v39, %v6562_v48 }
 0x9b7   : > { %7940 = vmatprep.mubr.msk.bf16.mxu0 %vm883_vm13, %v6594_v62 }
 0x9c4   : > { %v7590_v18 = vpop.f32.mrb[72].mxu0 }
 0x9c5   : > { %v7591_v38 = vpop.f32.mrb[73].mxu0 }
 0x9c6   : > { %v7592_v32 = vadd.f32 %v7591_v38, %v7590_v18  ;;  %v7593_v20 = vpop.f32.mrb[74].mxu0 }
 0x9c7   : > { %v7594_v16 = vpop.f32.mrb[75].mxu0 }
 0x9c8   : > { %v6219_v10 = vadd.f32 %v7592_v32, %v10923_v60  ;;  %v7595_v59 = vadd.f32 %v7594_v16, %v7593_v20 }
 0x9ca   : > { %v6380_v29 = vadd.f32 %v10781_v45, %v6219_v10  ;;  %v6222_v24 = vadd.f32 %v7595_v59, %v10923_v60 }
 0x9cc   : > { %v6532_v44 = vmul.f32 0.1, %v6380_v29  ;;  %v6383_v58 = vadd.f32 %v10791_v34, %v6222_v24  ;;  %v7596_v12 = vpop.f32.mrb[76].mxu0  ;;  %vm6500_vm4 = vcmp.gt.f32.partialorder %v6380_v29, 0.0 }
 0x9cd   : > { %v7597_v26 = vpop.f32.mrb[77].mxu0 }
 0x9ce   : > { %vm6501_vm12 = vcmp.gt.f32.partialorder %v6383_v58, 0.0  ;;  %v6533_v30 = vmul.f32 0.1, %v6383_v58  ;;  %v7598_v31 = vadd.f32 %v7597_v26, %v7596_v12  ;;  %v7599_v46 = vpop.f32.mrb[78].mxu0  ;;  %v6564_v56 = vsel %vm6500_vm4, %v6380_v29, %v6532_v44 }
 0x9cf   : > { %v7600_v51 = vpop.f32.mrb[79].mxu0 }
 0x9d0   : > { %v6565_v7 = vsel %vm6501_vm12, %v6383_v58, %v6533_v30  ;;  %v6227_v4 = vadd.f32 %v7598_v31, %v10923_v60  ;;  %v7601_v40 = vadd.f32 %v7600_v51, %v7599_v46 }
 0x9d1   : > { %v6595_v17 = vpack.c.bf16 %v6565_v7, %v6564_v56 }
 0x9d2   : > { %v6388_v45 = vadd.f32 %v10803_v25, %v6227_v4  ;;  %v6230_v9 = vadd.f32 %v7601_v40, %v10923_v60 }
 0x9d3   : > { %7941 = vmatmul.mubr.msk.bf16.vlgmr.msra.gmra.mrb[132].mxu0 %vm883_vm13, %v6595_v17 }
 0x9d4   : > { %v6534_v34 = vmul.f32 0.1, %v6388_v45  ;;  %v6391_v63 = vadd.f32 %v10810_v1, %v6230_v9  ;;  %vm6502_vm14 = vcmp.gt.f32.partialorder %v6388_v45, 0.0  ;;  %v10946_v1 = vpop.f32.mrb[131].mxu1 }
 0x9d6   : > { %vm6503_vm1 = vcmp.gt.f32.partialorder %v6391_v63, 0.0  ;;  %v6535_v53 = vmul.f32 0.1, %v6391_v63  ;;  %v6566_v52 = vsel %vm6502_vm14, %v6388_v45, %v6534_v34 }
 0x9d8   : > { %v6567_v37 = vsel %vm6503_vm1, %v6391_v63, %v6535_v53 }
 0x9d9   : > { %v6596_v0 = vpack.c.bf16 %v6567_v37, %v6566_v52 }
 0x9db   : > { %7944 = vmatprep.mubr.msk.bf16.mxu0 %vm883_vm13, %v6596_v0 }
 0x9dc   : > { %v7602_v25 = vpop.f32.mrb[80].mxu0 }
 0x9dd   : > { %v7603_v41 = vpop.f32.mrb[81].mxu0 }
 0x9de   : > { %v7604_v6 = vadd.f32 %v7603_v41, %v7602_v25  ;;  %v7605_v27 = vpop.f32.mrb[82].mxu0 }
 0x9df   : > { %v7606_v48 = vpop.f32.mrb[83].mxu0 }
 0x9e0   : > { %v6235_v39 = vadd.f32 %v7604_v6, %v10923_v60  ;;  %v7607_v62 = vadd.f32 %v7606_v48, %v7605_v27 }
 0x9e2   : > { %v6396_v18 = vadd.f32 %v10801_v36, %v6235_v39  ;;  %v6238_v38 = vadd.f32 %v7607_v62, %v10923_v60 }
 0x9e4   : > { %v6536_v32 = vmul.f32 0.1, %v6396_v18  ;;  %v6399_v20 = vadd.f32 %v10805_v33, %v6238_v38  ;;  %v7608_v16 = vpop.f32.mrb[84].mxu0  ;;  %vm6504_vm6 = vcmp.gt.f32.partialorder %v6396_v18, 0.0 }
 0x9e5   : > { %v7609_v10 = vpop.f32.mrb[85].mxu0 }
 0x9e6   : > { %vm6505_vm15 = vcmp.gt.f32.partialorder %v6399_v20, 0.0  ;;  %v6537_v59 = vmul.f32 0.1, %v6399_v20  ;;  %v7610_v29 = vadd.f32 %v7609_v10, %v7608_v16  ;;  %v7611_v24 = vpop.f32.mrb[86].mxu0  ;;  %v6568_v26 = vsel %vm6504_vm6, %v6396_v18, %v6536_v32 }
 0x9e7   : > { %v7612_v44 = vpop.f32.mrb[87].mxu0 }
 0x9e8   : > { %v6243_v58 = vadd.f32 %v7610_v29, %v10923_v60  ;;  %v7613_v12 = vadd.f32 %v7612_v44, %v7611_v24  ;;  %v6569_v30 = vsel %vm6505_vm15, %v6399_v20, %v6537_v59 }
 0x9e9   : > { %v6597_v31 = vpack.c.bf16 %v6569_v30, %v6568_v26 }
 0x9ea   : > { %v6404_v36 = vadd.f32 %v10815_v8, %v6243_v58  ;;  %v6246_v46 = vadd.f32 %v7613_v12, %v10923_v60 }
 0x9eb   : > { %7945 = vmatmul.mubr.msk.bf16.gmra.mrb[136].mxu0 %vm883_vm13, %v6597_v31 }
 0x9ec   : > { %v6538_v33 = vmul.f32 0.1, %v6404_v36  ;;  %v6407_v51 = vadd.f32 %v10821_v35, %v6246_v46  ;;  %vm6506_vm5 = vcmp.gt.f32.partialorder %v6404_v36, 0.0 }
 0x9ee   : > { %vm6507_vm10 = vcmp.gt.f32.partialorder %v6407_v51, 0.0  ;;  %v6539_v56 = vmul.f32 0.1, %v6407_v51  ;;  %v6570_v7 = vsel %vm6506_vm5, %v6404_v36, %v6538_v33 }
 0x9f0   : > { %v6571_v4 = vsel %vm6507_vm10, %v6407_v51, %v6539_v56 }
 0x9f1   : > { %v6598_v40 = vpack.c.bf16 %v6571_v4, %v6570_v7 }
 0x9f3   : > { %7948 = vmatprep.mubr.msk.bf16.mxu0 %vm883_vm13, %v6598_v40 }
 0x9f4   : > { %v7614_v17 = vpop.f32.mrb[88].mxu0 }
 0x9f5   : > { %v7615_v45 = vpop.f32.mrb[89].mxu0 }
 0x9f6   : > { %v7616_v9 = vadd.f32 %v7615_v45, %v7614_v17  ;;  %v7617_v34 = vpop.f32.mrb[90].mxu0 }
 0x9f7   : > { %v7618_v8 = vpop.f32.mrb[91].mxu0 }
 0x9f8   : > { %v6251_v63 = vadd.f32 %v7616_v9, %v10923_v60  ;;  %v7619_v53 = vadd.f32 %v7618_v8, %v7617_v34 }
 0x9fa   : > { %v6412_v52 = vadd.f32 %v10813_v55, %v6251_v63  ;;  %v6254_v35 = vadd.f32 %v7619_v53, %v10923_v60 }
 0x9fc   : > { %v6540_v37 = vmul.f32 0.1, %v6412_v52  ;;  %v6415_v0 = vadd.f32 %v10817_v43, %v6254_v35  ;;  %v7620_v25 = vpop.f32.mrb[92].mxu0  ;;  %vm6508_vm11 = vcmp.gt.f32.partialorder %v6412_v52, 0.0 }
 0x9fd   : > { %v7621_v41 = vpop.f32.mrb[93].mxu0 }
 0x9fe   : > { %vm6509_vm7 = vcmp.gt.f32.partialorder %v6415_v0, 0.0  ;;  %v6541_v6 = vmul.f32 0.1, %v6415_v0  ;;  %v7622_v27 = vadd.f32 %v7621_v41, %v7620_v25  ;;  %v7623_v48 = vpop.f32.mrb[94].mxu0  ;;  %v6572_v38 = vsel %vm6508_vm11, %v6412_v52, %v6540_v37 }
 0x9ff   : > { %v7624_v39 = vpop.f32.mrb[95].mxu0 }
 0xa00   : > { %v6259_v62 = vadd.f32 %v7622_v27, %v10923_v60  ;;  %v7625_v18 = vadd.f32 %v7624_v39, %v7623_v48  ;;  %v6573_v32 = vsel %vm6509_vm7, %v6415_v0, %v6541_v6 }
 0xa01   : > { %v6599_v20 = vpack.c.bf16 %v6573_v32, %v6572_v38 }
 0xa02   : > { %v6420_v55 = vadd.f32 %v10836_v3, %v6259_v62  ;;  %v6262_v16 = vadd.f32 %v7625_v18, %v10923_v60 }
 0xa03   : > { %7949 = vmatmul.mubr.msk.bf16.gmra.mrb[140].mxu0 %vm883_vm13, %v6599_v20 }
 0xa04   : > { %v6542_v43 = vmul.f32 0.1, %v6420_v55  ;;  %v6423_v10 = vadd.f32 %v10844_v42, %v6262_v16  ;;  %vm6510_vm8 = vcmp.gt.f32.partialorder %v6420_v55, 0.0 }
 0xa06   : > { %vm6511_vm9 = vcmp.gt.f32.partialorder %v6423_v10, 0.0  ;;  %v6543_v59 = vmul.f32 0.1, %v6423_v10  ;;  %v6574_v29 = vsel %vm6510_vm8, %v6420_v55, %v6542_v43 }
 0xa08   : > { %v6575_v24 = vsel %vm6511_vm9, %v6423_v10, %v6543_v59 }
 0xa09   : > { %v6600_v44 = vpack.c.bf16 %v6575_v24, %v6574_v29 }
 0xa0b   : > { %7952 = vmatprep.mubr.msk.bf16.mxu0 %vm883_vm13, %v6600_v44 }
 0xa0c   : > { %v7626_v58 = vpop.f32.mrb[96].mxu0 }
 0xa0d   : > { %v7627_v12 = vpop.f32.mrb[97].mxu0 }
 0xa0e   : > { %v7628_v26 = vadd.f32 %v7627_v12, %v7626_v58  ;;  %v7629_v30 = vpop.f32.mrb[98].mxu0 }
 0xa0f   : > { %v7630_v3 = vpop.f32.mrb[99].mxu0 }
 0xa10   : > { %v6267_v31 = vadd.f32 %v7628_v26, %v10923_v60  ;;  %v7631_v36 = vadd.f32 %v7630_v3, %v7629_v30 }
 0xa12   : > { %v6428_v46 = vadd.f32 %v10832_v57, %v6267_v31  ;;  %v6270_v42 = vadd.f32 %v7631_v36, %v10923_v60 }
 0xa14   : > { %v6544_v33 = vmul.f32 0.1, %v6428_v46  ;;  %v6431_v51 = vadd.f32 %v10842_v54, %v6270_v42  ;;  %v7632_v56 = vpop.f32.mrb[100].mxu0  ;;  %vm6512_vm0 = vcmp.gt.f32.partialorder %v6428_v46, 0.0 }
 0xa15   : > { %v7633_v7 = vpop.f32.mrb[101].mxu0 }
 0xa16   : > { %vm6513_vm2 = vcmp.gt.f32.partialorder %v6431_v51, 0.0  ;;  %v6545_v4 = vmul.f32 0.1, %v6431_v51  ;;  %v7634_v40 = vadd.f32 %v7633_v7, %v7632_v56  ;;  %v7635_v17 = vpop.f32.mrb[102].mxu0  ;;  %v6576_v8 = vsel %vm6512_vm0, %v6428_v46, %v6544_v33 }
 0xa17   : > { %v7636_v45 = vpop.f32.mrb[103].mxu0 }
 0xa18   : > { %v6275_v9 = vadd.f32 %v7634_v40, %v10923_v60  ;;  %v7637_v34 = vadd.f32 %v7636_v45, %v7635_v17  ;;  %v6577_v63 = vsel %vm6513_vm2, %v6431_v51, %v6545_v4 }
 0xa19   : > { %v6601_v53 = vpack.c.bf16 %v6577_v63, %v6576_v8 }
 0xa1a   : > { %v6436_v57 = vadd.f32 %v10856_v19, %v6275_v9  ;;  %v6278_v52 = vadd.f32 %v7637_v34, %v10923_v60 }
 0xa1b   : > { %7953 = vmatmul.mubr.msk.bf16.gmra.mrb[144].mxu0 %vm883_vm13, %v6601_v53 }
 0xa1c   : > { %v6546_v54 = vmul.f32 0.1, %v6436_v57  ;;  %v6439_v35 = vadd.f32 %v10860_v5, %v6278_v52  ;;  %vm6514_vm3 = vcmp.gt.f32.partialorder %v6436_v57, 0.0 }
 0xa1e   : > { %vm6515_vm4 = vcmp.gt.f32.partialorder %v6439_v35, 0.0  ;;  %v6547_v37 = vmul.f32 0.1, %v6439_v35  ;;  %v6578_v0 = vsel %vm6514_vm3, %v6436_v57, %v6546_v54 }
 0xa20   : > { %v6579_v25 = vsel %vm6515_vm4, %v6439_v35, %v6547_v37  ;;  %vm6842_vm4 = vcmask 23552  }
 0xa21   : > { %v6602_v41 = vpack.c.bf16 %v6579_v25, %v6578_v0 }
 0xa23   : > { %7956 = vmatprep.mubr.msk.bf16.mxu0 %vm883_vm13, %v6602_v41 }
 0xa24   : > { %v7638_v6 = vpop.f32.mrb[104].mxu0 }
 0xa25   : > { %v7639_v27 = vpop.f32.mrb[105].mxu0 }
 0xa26   : > { %v7640_v48 = vadd.f32 %v7639_v27, %v7638_v6  ;;  %v7641_v39 = vpop.f32.mrb[106].mxu0 }
 0xa27   : > { %v7642_v19 = vpop.f32.mrb[107].mxu0 }
 0xa28   : > { %v6283_v62 = vadd.f32 %v7640_v48, %v10923_v60  ;;  %v7643_v18 = vadd.f32 %v7642_v19, %v7641_v39 }
 0xa2a   : > { %v6444_v38 = vadd.f32 %v10853_v14, %v6283_v62  ;;  %v6286_v5 = vadd.f32 %v7643_v18, %v10923_v60 }
 0xa2c   : > { %v6548_v32 = vmul.f32 0.1, %v6444_v38  ;;  %v6447_v20 = vadd.f32 %v10858_v49, %v6286_v5  ;;  %v7644_v55 = vpop.f32.mrb[108].mxu0  ;;  %vm6516_vm12 = vcmp.gt.f32.partialorder %v6444_v38, 0.0 }
 0xa2d   : > { %v7645_v16 = vpop.f32.mrb[109].mxu0 }
 0xa2e   : > { %vm6517_vm14 = vcmp.gt.f32.partialorder %v6447_v20, 0.0  ;;  %v6549_v43 = vmul.f32 0.1, %v6447_v20  ;;  %v7646_v10 = vadd.f32 %v7645_v16, %v7644_v55  ;;  %v7647_v59 = vpop.f32.mrb[110].mxu0  ;;  %v6580_v58 = vsel %vm6516_vm12, %v6444_v38, %v6548_v32 }
 0xa2f   : > { %v7648_v29 = vpop.f32.mrb[111].mxu0 }
 0xa30   : > { %v6291_v24 = vadd.f32 %v7646_v10, %v10923_v60  ;;  %v7649_v44 = vadd.f32 %v7648_v29, %v7647_v59  ;;  %v6581_v12 = vsel %vm6517_vm14, %v6447_v20, %v6549_v43 }
 0xa31   : > { %v6603_v26 = vpack.c.bf16 %v6581_v12, %v6580_v58 }
 0xa32   : > { %v6452_v14 = vadd.f32 %v10864_v23, %v6291_v24  ;;  %v6294_v30 = vadd.f32 %v7649_v44, %v10923_v60 }
 0xa33   : > { %7957 = vmatmul.mubr.msk.bf16.gmra.mrb[148].mxu0 %vm883_vm13, %v6603_v26 }
 0xa34   : > { %v6550_v49 = vmul.f32 0.1, %v6452_v14  ;;  %v6455_v3 = vadd.f32 %v10870_v11, %v6294_v30  ;;  %vm6518_vm1 = vcmp.gt.f32.partialorder %v6452_v14, 0.0 }
 0xa36   : > { %vm6519_vm6 = vcmp.gt.f32.partialorder %v6455_v3, 0.0  ;;  %v6551_v31 = vmul.f32 0.1, %v6455_v3  ;;  %v6582_v36 = vsel %vm6518_vm1, %v6452_v14, %v6550_v49 }
 0xa38   : > { %v6583_v46 = vsel %vm6519_vm6, %v6455_v3, %v6551_v31 }
 0xa39   : > { %v6604_v42 = vpack.c.bf16 %v6583_v46, %v6582_v36 }
 0xa3b   : > { %7960 = vmatprep.mubr.msk.bf16.mxu0 %vm883_vm13, %v6604_v42 }
 0xa3c   : > { %v7650_v33 = vpop.f32.mrb[112].mxu0 }
 0xa3d   : > { %v7651_v51 = vpop.f32.mrb[113].mxu0 }
 0xa3e   : > { %v7652_v56 = vadd.f32 %v7651_v51, %v7650_v33  ;;  %v7653_v7 = vpop.f32.mrb[114].mxu0 }
 0xa3f   : > { %v7654_v23 = vpop.f32.mrb[115].mxu0 }
 0xa40   : > { %v6299_v4 = vadd.f32 %v7652_v56, %v10923_v60  ;;  %v7655_v40 = vadd.f32 %v7654_v23, %v7653_v7 }
 0xa42   : > { %v6460_v17 = vadd.f32 %v10862_v50, %v6299_v4  ;;  %v6302_v11 = vadd.f32 %v7655_v40, %v10923_v60 }
 0xa44   : > { %v6552_v45 = vmul.f32 0.1, %v6460_v17  ;;  %v6463_v9 = vadd.f32 %v10868_v28, %v6302_v11  ;;  %v7656_v34 = vpop.f32.mrb[116].mxu0  ;;  %vm6520_vm15 = vcmp.gt.f32.partialorder %v6460_v17, 0.0 }
 0xa45   : > { %v7657_v8 = vpop.f32.mrb[117].mxu0 }
 0xa46   : > { %vm6521_vm5 = vcmp.gt.f32.partialorder %v6463_v9, 0.0  ;;  %v6553_v63 = vmul.f32 0.1, %v6463_v9  ;;  %v7658_v53 = vadd.f32 %v7657_v8, %v7656_v34  ;;  %v7659_v57 = vpop.f32.mrb[118].mxu0  ;;  %v6584_v37 = vsel %vm6520_vm15, %v6460_v17, %v6552_v45 }
 0xa47   : > { %v7660_v52 = vpop.f32.mrb[119].mxu0 }
 0xa48   : > { %v6307_v54 = vadd.f32 %v7658_v53, %v10923_v60  ;;  %v7661_v35 = vadd.f32 %v7660_v52, %v7659_v57  ;;  %v6585_v0 = vsel %vm6521_vm5, %v6463_v9, %v6553_v63 }
 0xa49   : > { %v6605_v25 = vpack.c.bf16 %v6585_v0, %v6584_v37 }
 0xa4a   : > { %v6468_v50 = vadd.f32 %v10884_v22, %v6307_v54  ;;  %v6310_v41 = vadd.f32 %v7661_v35, %v10923_v60 }
 0xa4b   : > { %7961 = vmatmul.mubr.msk.bf16.gmra.mrb[152].mxu0 %vm883_vm13, %v6605_v25 }
 0xa4c   : > { %v6554_v28 = vmul.f32 0.1, %v6468_v50  ;;  %v6471_v6 = vadd.f32 %v10889_v13, %v6310_v41  ;;  %v7662_v27 = vpop.f32.mrb[120].mxu0  ;;  %vm6522_vm10 = vcmp.gt.f32.partialorder %v6468_v50, 0.0 }
 0xa4d   : > { %v7663_v48 = vpop.f32.mrb[121].mxu0 }
 0xa4e   : > { %vm6523_vm11 = vcmp.gt.f32.partialorder %v6471_v6, 0.0  ;;  %v6555_v39 = vmul.f32 0.1, %v6471_v6  ;;  %v7664_v19 = vadd.f32 %v7663_v48, %v7662_v27  ;;  %v7665_v62 = vpop.f32.mrb[122].mxu0  ;;  %v6586_v32 = vsel %vm6522_vm10, %v6468_v50, %v6554_v28 }
 0xa4f   : > { %v7666_v18 = vpop.f32.mrb[123].mxu0 }
 0xa50   : > { %v6315_v38 = vadd.f32 %v7664_v19, %v10923_v60  ;;  %v7667_v5 = vadd.f32 %v7666_v18, %v7665_v62  ;;  %v6587_v22 = vsel %vm6523_vm11, %v6471_v6, %v6555_v39 }
 0xa51   : > { %v6606_v20 = vpack.c.bf16 %v6587_v22, %v6586_v32 }
 0xa52   : > { %v6476_v55 = vadd.f32 %v10879_v47, %v6315_v38  ;;  %v6318_v16 = vadd.f32 %v7667_v5, %v10923_v60 }
 0xa53   : > { %7964 = vmatprep.mubr.msk.bf16.mxu0 %vm883_vm13, %v6606_v20 }
 0xa54   : > { %v6556_v13 = vmul.f32 0.1, %v6476_v55  ;;  %v6479_v43 = vadd.f32 %v10887_v2, %v6318_v16  ;;  %v7668_v10 = vpop.f32.mrb[124].mxu0  ;;  %vm6524_vm7 = vcmp.gt.f32.partialorder %v6476_v55, 0.0 }
 0xa55   : > { %v7669_v59 = vpop.f32.mrb[125].mxu0 }
 0xa56   : > { %vm6525_vm8 = vcmp.gt.f32.partialorder %v6479_v43, 0.0  ;;  %v6557_v29 = vmul.f32 0.1, %v6479_v43  ;;  %v7670_v24 = vadd.f32 %v7669_v59, %v7668_v10  ;;  %v7671_v44 = vpop.f32.mrb[126].mxu0  ;;  %v6588_v14 = vsel %vm6524_vm7, %v6476_v55, %v6556_v13 }
 0xa57   : > { %v7672_v58 = vpop.f32.mrb[127].mxu0 }
 0xa58   : > { %v7673_v12 = vadd.f32 %v7672_v58, %v7671_v44  ;;  %v6323_v26 = vadd.f32 %v7670_v24, %v10923_v60  ;;  %v6589_v47 = vsel %vm6525_vm8, %v6479_v43, %v6557_v29 }
 0xa59   : > { %v6607_v30 = vpack.c.bf16 %v6589_v47, %v6588_v14 }
 0xa5a   : > { %v6484_v49 = vadd.f32 %v10941_v15, %v6323_v26  ;;  %v6326_v3 = vadd.f32 %v7673_v12, %v10923_v60 }
 0xa5b   : > { %7965 = vmatmul.mubr.msk.bf16.gmra.mrb[156].mxu0 %vm883_vm13, %v6607_v30 }
 0xa5c   : > { %v6558_v2 = vmul.f32 0.1, %v6484_v49  ;;  %v6487_v31 = vadd.f32 %v10946_v1, %v6326_v3  ;;  %v7674_v36 = vpop.f32.mrb[128].mxu0  ;;  %vm6526_vm9 = vcmp.gt.f32.partialorder %v6484_v49, 0.0 }
 0xa5d   : > { %v7675_v46 = vpop.f32.mrb[129].mxu0 }
 0xa5e   : > { %vm6527_vm0 = vcmp.gt.f32.partialorder %v6487_v31, 0.0  ;;  %v6559_v42 = vmul.f32 0.1, %v6487_v31  ;;  %v7676_v33 = vadd.f32 %v7675_v46, %v7674_v36  ;;  %v7677_v51 = vpop.f32.mrb[130].mxu0  ;;  %v6590_v7 = vsel %vm6526_vm9, %v6484_v49, %v6558_v2 }
 0xa5f   : > { %v7678_v56 = vpop.f32.mrb[131].mxu0 }
 0xa60   : > { %v6591_v23 = vsel %vm6527_vm0, %v6487_v31, %v6559_v42  ;;  %v6331_v15 = vadd.f32 %v7676_v33, %v10923_v60  ;;  %v7679_v4 = vadd.f32 %v7678_v56, %v7677_v51 }
 0xa61   : > { %v6608_v40 = vpack.c.bf16 %v6591_v23, %v6590_v7 }
 0xa62   : > { %v6492_v17 = vadd.f32 %v10939_v61, %v6331_v15  ;;  %v6334_v11 = vadd.f32 %v7679_v4, %v10923_v60  ;;  %v11017_v61 = vld [vmem:[%s11140_s17] ss:$0 sm:$0xff] }
 0xa63   : > { %7968 = vmatprep.mubr.msk.bf16.mxu0 %vm883_vm13, %v6608_v40 }
 0xa64   : > { %v6560_v1 = vmul.f32 0.1, %v6492_v17  ;;  %v6495_v45 = vadd.f32 %v10944_v21, %v6334_v11  ;;  %vm6528_vm2 = vcmp.gt.f32.partialorder %v6492_v17, 0.0 }
 0xa66   : > { %vm6529_vm3 = vcmp.gt.f32.partialorder %v6495_v45, 0.0  ;;  %v6561_v9 = vmul.f32 0.1, %v6495_v45  ;;  %v6592_v34 = vsel %vm6528_vm2, %v6492_v17, %v6560_v1 }
 0xa68   : > { %v6593_v8 = vsel %vm6529_vm3, %v6495_v45, %v6561_v9 }
 0xa69   : > { %v6609_v63 = vpack.c.bf16 %v6593_v8, %v6592_v34 }
 0xa6b   : > { %7969 = vmatmul.mubr.msk.bf16.gmra.mrb[160].mxu0 %vm883_vm13, %v6609_v63 }
 0xaa6   : > { %v7942_v60 = vpop.f32.mrb[132].mxu0 }
 0xaa7   : > { %v6724_v21 = vadd.f32 %v7942_v60, %v11017_v61  ;;  %v6715_v53 = vpop.f32.mrb[133].mxu0 }
 0xaa8   : > { %v6716_v57 = vadd.f32 %v11017_v61, %v6715_v53  ;;  %v7943_v52 = vpop.f32.mrb[134].mxu0 }
 0xaa9   : > { %6845 = vst.msk [vmem:[%s11022_s7 + $0x10] sm:$0xff] %vm6842_vm4, %v6724_v21  ;;  %v6727_v54 = vadd.f32 %v7943_v52, %v11017_v61  ;;  %v6718_v35 = vpop.f32.mrb[135].mxu0 }
 0xaaa   : > { %6843 = vst.msk [vmem:[%s11022_s7] sm:$0xff] %vm6842_vm4, %v6716_v57  ;;  %v6719_v37 = vadd.f32 %v11017_v61, %v6718_v35 }
 0xaab   : > { %6846 = vst.msk [vmem:[%s11022_s7 + $0x18] sm:$0xff] %vm6842_vm4, %v6727_v54 }
 0xaac   : > { %6844 = vst.msk [vmem:[%s11022_s7 + $0x8] sm:$0xff] %vm6842_vm4, %v6719_v37 }
 0xabe   : > { %v7946_v0 = vpop.f32.mrb[136].mxu0 }
 0xabf   : > { %v6740_v25 = vadd.f32 %v7946_v0, %v11017_v61  ;;  %v6731_v50 = vpop.f32.mrb[137].mxu0 }
 0xac0   : > { %v6732_v41 = vadd.f32 %v11017_v61, %v6731_v50  ;;  %v7947_v28 = vpop.f32.mrb[138].mxu0 }
 0xac1   : > { %6849 = vst.msk [vmem:[%s11022_s7 + $0x30] sm:$0xff] %vm6842_vm4, %v6740_v25  ;;  %v6743_v6 = vadd.f32 %v7947_v28, %v11017_v61  ;;  %v6734_v27 = vpop.f32.mrb[139].mxu0 }
 0xac2   : > { %6847 = vst.msk [vmem:[%s11022_s7 + $0x20] sm:$0xff] %vm6842_vm4, %v6732_v41  ;;  %v6735_v48 = vadd.f32 %v11017_v61, %v6734_v27 }
 0xac3   : > { %6850 = vst.msk [vmem:[%s11022_s7 + $0x38] sm:$0xff] %vm6842_vm4, %v6743_v6 }
 0xac4   : > { %6848 = vst.msk [vmem:[%s11022_s7 + $0x28] sm:$0xff] %vm6842_vm4, %v6735_v48 }
 0xad6   : > { %v7950_v39 = vpop.f32.mrb[140].mxu0 }
 0xad7   : > { %v6756_v19 = vadd.f32 %v7950_v39, %v11017_v61  ;;  %v6747_v62 = vpop.f32.mrb[141].mxu0 }
 0xad8   : > { %v6748_v18 = vadd.f32 %v11017_v61, %v6747_v62  ;;  %v7951_v38 = vpop.f32.mrb[142].mxu0 }
 0xad9   : > { %6853 = vst.msk [vmem:[%s11022_s7 + $0x50] sm:$0xff] %vm6842_vm4, %v6756_v19  ;;  %v6759_v5 = vadd.f32 %v7951_v38, %v11017_v61  ;;  %v6750_v32 = vpop.f32.mrb[143].mxu0 }
 0xada   : > { %6851 = vst.msk [vmem:[%s11022_s7 + $0x40] sm:$0xff] %vm6842_vm4, %v6748_v18  ;;  %v6751_v22 = vadd.f32 %v11017_v61, %v6750_v32 }
 0xadb   : > { %6854 = vst.msk [vmem:[%s11022_s7 + $0x58] sm:$0xff] %vm6842_vm4, %v6759_v5 }
 0xadc   : > { %6852 = vst.msk [vmem:[%s11022_s7 + $0x48] sm:$0xff] %vm6842_vm4, %v6751_v22 }
 0xaee   : > { %v7954_v20 = vpop.f32.mrb[144].mxu0 }
 0xaef   : > { %v6772_v55 = vadd.f32 %v7954_v20, %v11017_v61  ;;  %v6763_v16 = vpop.f32.mrb[145].mxu0 }
 0xaf0   : > { %v6764_v13 = vadd.f32 %v11017_v61, %v6763_v16  ;;  %v7955_v43 = vpop.f32.mrb[146].mxu0 }
 0xaf1   : > { %6857 = vst.msk [vmem:[%s11022_s7 + $0x70] sm:$0xff] %vm6842_vm4, %v6772_v55  ;;  %v6775_v10 = vadd.f32 %v7955_v43, %v11017_v61  ;;  %v6766_v59 = vpop.f32.mrb[147].mxu0 }
 0xaf2   : > { %6855 = vst.msk [vmem:[%s11022_s7 + $0x60] sm:$0xff] %vm6842_vm4, %v6764_v13  ;;  %v6767_v29 = vadd.f32 %v11017_v61, %v6766_v59 }
 0xaf3   : > { %6858 = vst.msk [vmem:[%s11022_s7 + $0x78] sm:$0xff] %vm6842_vm4, %v6775_v10 }
 0xaf4   : > { %6856 = vst.msk [vmem:[%s11022_s7 + $0x68] sm:$0xff] %vm6842_vm4, %v6767_v29 }
 0xb06   : > { %v7958_v24 = vpop.f32.mrb[148].mxu0 }
 0xb07   : > { %v6788_v44 = vadd.f32 %v7958_v24, %v11017_v61  ;;  %v6779_v58 = vpop.f32.mrb[149].mxu0 }
 0xb08   : > { %v6780_v12 = vadd.f32 %v11017_v61, %v6779_v58  ;;  %v7959_v26 = vpop.f32.mrb[150].mxu0 }
 0xb09   : > { %6861 = vst.msk [vmem:[%s11022_s7 + $0x90] sm:$0xff] %vm6842_vm4, %v6788_v44  ;;  %v6791_v14 = vadd.f32 %v7959_v26, %v11017_v61  ;;  %v6782_v47 = vpop.f32.mrb[151].mxu0 }
 0xb0a   : > { %6859 = vst.msk [vmem:[%s11022_s7 + $0x80] sm:$0xff] %vm6842_vm4, %v6780_v12  ;;  %v6783_v30 = vadd.f32 %v11017_v61, %v6782_v47 }
 0xb0b   : > { %6862 = vst.msk [vmem:[%s11022_s7 + $0x98] sm:$0xff] %vm6842_vm4, %v6791_v14 }
 0xb0c   : > { %6860 = vst.msk [vmem:[%s11022_s7 + $0x88] sm:$0xff] %vm6842_vm4, %v6783_v30 }
 0xb1e   : > { %v7962_v49 = vpop.f32.mrb[152].mxu0 }
 0xb1f   : > { %v6804_v3 = vadd.f32 %v7962_v49, %v11017_v61  ;;  %v6795_v2 = vpop.f32.mrb[153].mxu0 }
 0xb20   : > { %v6796_v31 = vadd.f32 %v11017_v61, %v6795_v2  ;;  %v7963_v36 = vpop.f32.mrb[154].mxu0 }
 0xb21   : > { %6865 = vst.msk [vmem:[%s11022_s7 + $0xb0] sm:$0xff] %vm6842_vm4, %v6804_v3  ;;  %v6807_v46 = vadd.f32 %v7963_v36, %v11017_v61  ;;  %v6798_v42 = vpop.f32.mrb[155].mxu0 }
 0xb22   : > { %6863 = vst.msk [vmem:[%s11022_s7 + $0xa0] sm:$0xff] %vm6842_vm4, %v6796_v31  ;;  %v6799_v33 = vadd.f32 %v11017_v61, %v6798_v42 }
 0xb23   : > { %6866 = vst.msk [vmem:[%s11022_s7 + $0xb8] sm:$0xff] %vm6842_vm4, %v6807_v46 }
 0xb24   : > { %6864 = vst.msk [vmem:[%s11022_s7 + $0xa8] sm:$0xff] %vm6842_vm4, %v6799_v33 }
 0xb2e   : > { %v7966_v51 = vpop.f32.mrb[156].mxu0 }
 0xb2f   : > { %v6820_v56 = vadd.f32 %v7966_v51, %v11017_v61  ;;  %v6811_v7 = vpop.f32.mrb[157].mxu0 }
 0xb30   : > { %v6812_v23 = vadd.f32 %v11017_v61, %v6811_v7  ;;  %v7967_v15 = vpop.f32.mrb[158].mxu0 }
 0xb31   : > { %6869 = vst.msk [vmem:[%s11022_s7 + $0xd0] sm:$0xff] %vm6842_vm4, %v6820_v56  ;;  %v6823_v4 = vadd.f32 %v7967_v15, %v11017_v61  ;;  %v6814_v40 = vpop.f32.mrb[159].mxu0 }
 0xb32   : > { %6867 = vst.msk [vmem:[%s11022_s7 + $0xc0] sm:$0xff] %vm6842_vm4, %v6812_v23  ;;  %v6815_v17 = vadd.f32 %v11017_v61, %v6814_v40 }
 0xb33   : > { %6870 = vst.msk [vmem:[%s11022_s7 + $0xd8] sm:$0xff] %vm6842_vm4, %v6823_v4 }
 0xb34   : > { %6868 = vst.msk [vmem:[%s11022_s7 + $0xc8] sm:$0xff] %vm6842_vm4, %v6815_v17 }
 0xb3e   : > { %v7970_v11 = vpop.f32.mrb[160].mxu0 }
 0xb3f   : > { %v6836_v1 = vadd.f32 %v7970_v11, %v11017_v61  ;;  %v6827_v45 = vpop.f32.mrb[161].mxu0 }
 0xb40   : > { %v6828_v9 = vadd.f32 %v11017_v61, %v6827_v45  ;;  %v7971_v34 = vpop.f32.mrb[162].mxu0 }
 0xb41   : > { %6873 = vst.msk [vmem:[%s11022_s7 + $0xf0] sm:$0xff] %vm6842_vm4, %v6836_v1  ;;  %v6839_v8 = vadd.f32 %v7971_v34, %v11017_v61  ;;  %v6830_v63 = vpop.f32.mrb[163].mxu0 }
 0xb42   : > { %6871 = vst.msk [vmem:[%s11022_s7 + $0xe0] sm:$0xff] %vm6842_vm4, %v6828_v9  ;;  %v6831_v60 = vadd.f32 %v11017_v61, %v6830_v63 }
 0xb43   : > { %6874 = vst.msk [vmem:[%s11022_s7 + $0xf8] sm:$0xff] %vm6842_vm4, %v6839_v8 }
 0xb44   : > { %6872 = vst.msk [vmem:[%s11022_s7 + $0xe8] sm:$0xff] %vm6842_vm4, %v6831_v60 }
 0xb45 PF: > { %s36_s27 = sadd.s32 1, %s8196_s27  }
 0xb46   : > { %p33_p4 = scmp.ge.s32.totalorder %s36_s27, 4  }
 0xb48   :  { %35 = sbr.rel (!%p33_p4) target bundleno = 13 (0xd), region = 157 }

</bundles_post_ra>
